<compile_context>
chip_gen: v5e
topology: v5e:2x2
jax: 0.10.0
libtpu: 0.0.40
codegen_flags: <defaults>
</compile_context>

<pallas_src>
import functools

import jax
import jax.numpy as jnp
from jax import lax
from jax.experimental import pallas as pl
from jax.experimental.pallas import tpu as pltpu


def _round_up(x, m):
    return (x + m - 1) // m * m


_VMEM_CAP_CACHE = []


def _vmem_capacity_bytes():
    """Physical VMEM per TensorCore; conservative 64 MiB fallback (v7x)."""
    if _VMEM_CAP_CACHE:
        return _VMEM_CAP_CACHE[0]
    cap = 64 << 20
    try:
        info = pltpu.get_tpu_info()
        for name in ("vmem_capacity_bytes", "vmem_bytes", "vmem_size_bytes"):
            v = getattr(info, name, None)
            if v:
                cap = int(v)
                break
    except Exception:
        pass
    _VMEM_CAP_CACHE.append(cap)
    return cap


def _spec(shape, index_map, single_buffer=False):
    """BlockSpec helper; request single-buffering for grid-invariant operands
    (saves VMEM).  Falls back silently if pipeline_mode is unsupported."""
    if single_buffer and hasattr(pl, "Buffered"):
        try:
            return pl.BlockSpec(shape, index_map, pipeline_mode=pl.Buffered(1))
        except TypeError:
            pass
    return pl.BlockSpec(shape, index_map)


# ----------------------------------------------------------------------------
# Pallas kernel: K-tiled (TM,TK)@(TK,TCP) -> f32 acc, affine + activation,
# bf16 store; optional per-tile BN partial statistics (sum, sum-of-squares).
# ----------------------------------------------------------------------------
def _matmul_affine_act_kernel(p_ref, w_ref, scale_ref, shift_ref, *refs,
                              act, fuse_stats):
    if fuse_stats:
        o_ref, stats_ref, acc_ref = refs
    else:
        o_ref, acc_ref = refs
        stats_ref = None

    k_step = pl.program_id(2)

    @pl.when(k_step == 0)
    def _():
        acc_ref[...] = jnp.zeros_like(acc_ref)

    acc_ref[...] += jnp.dot(p_ref[...], w_ref[...],
                            preferred_element_type=jnp.float32)

    @pl.when(k_step == pl.num_programs(2) - 1)
    def _():
        x = acc_ref[...] * scale_ref[...] + shift_ref[...]
        if act == "leaky":
            x = jnp.where(x > 0, x, 0.2 * x)
        elif act == "sigmoid":
            x = jax.nn.sigmoid(x)
        o_ref[...] = x.astype(o_ref.dtype)
        if fuse_stats:
            # Per-channel partial sums in f32 (from the accumulator, not the
            # bf16-rounded output).  Packed into 8 sublanes: row0=sum, row1=sumsq.
            s1 = jnp.sum(x, axis=0, keepdims=True)
            s2 = jnp.sum(x * x, axis=0, keepdims=True)
            row = lax.broadcasted_iota(jnp.int32, stats_ref.shape, 0)
            stats_ref[...] = (jnp.where(row == 0, s1, 0.0)
                              + jnp.where(row == 1, s2, 0.0))


def _matmul_affine_act(patches, w_mat, scale, shift, *, act, c_out,
                       fuse_stats=False):
    """patches: (M, K) bf16; w_mat: (K, c_out) bf16; scale/shift: (c_out,) f32.

    Returns y (M, c_out) bf16 and, if fuse_stats, stats (nm, 8, cp) f32 where
    row 0 holds per-channel sums and row 1 per-channel sums of squares.
    """
    m, k = patches.shape
    cp = _round_up(c_out, 128)  # lane-dense output -> unmasked stores

    # --- tile selection ------------------------------------------------------
    if k <= 512:
        tm_cap = 2048           # tiny-K layers: amortize per-grid-step overhead
    elif k <= 2048:
        tm_cap = 1024
    else:
        tm_cap = 512
    tm = min(tm_cap, _round_up(m, 16))      # bf16 sublane packing = 16
    m_pad = _round_up(m, tm)
    nm = m_pad // tm

    tk_cap = 2048                            # bound resident weight block (v7x)
    if k <= tk_cap:
        tk, k_pad = k, k
    else:
        tk = tk_cap
        k_pad = _round_up(k, tk)
    nk = k_pad // tk

    tcp = cp
    while tcp > 512 and (tcp // 2) % 128 == 0 and cp % (tcp // 2) == 0:
        tcp //= 2
    # v7x has 2 TensorCores: if the M axis has a single tile, split CP instead.
    if nm < 2 and (tcp // 2) % 128 == 0 and cp % (tcp // 2) == 0:
        tcp //= 2
    ncp = cp // tcp

    # --- padding (zeros are exact no-ops for the matmul / statistics) --------
    if m_pad != m:
        patches = jnp.pad(patches, ((0, m_pad - m), (0, 0)))
    if k_pad != k:
        patches = jnp.pad(patches, ((0, 0), (0, k_pad - k)))
        w_mat = jnp.pad(w_mat, ((0, k_pad - k), (0, 0)))
    if cp != c_out:
        w_mat = jnp.pad(w_mat, ((0, 0), (0, cp - c_out)))
        scale = jnp.pad(scale, (0, cp - c_out), constant_values=1.0)
        shift = jnp.pad(shift, (0, cp - c_out))
    scale = scale.reshape(1, cp).astype(jnp.float32)
    shift = shift.reshape(1, cp).astype(jnp.float32)

    grid = (nm, ncp, nk)
    invariant = (ncp == 1 and nk == 1)  # weight/scale/shift blocks never change

    in_specs = [
        pl.BlockSpec((tm, tk), lambda i, j, kk: (i, kk)),
        _spec((tk, tcp), lambda i, j, kk: (kk, j), single_buffer=invariant),
        _spec((1, tcp), lambda i, j, kk: (0, j), single_buffer=invariant),
        _spec((1, tcp), lambda i, j, kk: (0, j), single_buffer=invariant),
    ]
    out_shapes = [jax.ShapeDtypeStruct((m_pad, cp), jnp.bfloat16)]
    out_specs = [pl.BlockSpec((tm, tcp), lambda i, j, kk: (i, j))]
    if fuse_stats:
        out_shapes.append(jax.ShapeDtypeStruct((nm * 8, cp), jnp.float32))
        out_specs.append(pl.BlockSpec((8, tcp), lambda i, j, kk: (i, j)))

    # --- VMEM budget ----------------------------------------------------------
    w_bufs = 1 if invariant else 2
    vmem_needed = (2 * tm * tk * 2              # patches, double-buffered bf16
                   + w_bufs * tk * tcp * 2      # weights
                   + 2 * tm * tcp * 2           # bf16 output, double-buffered
                   + tm * tcp * 4               # f32 accumulator scratch
                   + 2 * 8 * tcp * 4            # stats
                   + w_bufs * 2 * tcp * 4)      # scale/shift
    vmem_cap = max(int(0.75 * _vmem_capacity_bytes()), 32 << 20)
    vmem_limit = int(min(max(vmem_needed + (8 << 20), 32 << 20), vmem_cap))

    cost = pl.CostEstimate(
        flops=2 * m_pad * k_pad * cp,
        transcendentals=m_pad * cp if act == "sigmoid" else 0,
        bytes_accessed=(ncp * m_pad * k_pad + k_pad * cp) * 2 + m_pad * cp * 2
        + (nm * 8 * cp * 4 if fuse_stats else 0),
    )

    kern = functools.partial(_matmul_affine_act_kernel, act=act,
                             fuse_stats=fuse_stats)
    outs = pl.pallas_call(
        kern,
        out_shape=tuple(out_shapes),
        grid=grid,
        in_specs=in_specs,
        out_specs=tuple(out_specs),
        scratch_shapes=[pltpu.VMEM((tm, tcp), jnp.float32)],
        compiler_params=pltpu.CompilerParams(
            dimension_semantics=("parallel", "parallel", "arbitrary"),
            vmem_limit_bytes=vmem_limit,
        ),
        cost_estimate=cost,
    )(patches, w_mat, scale, shift)

    y = outs[0][:m, :c_out]
    if fuse_stats:
        return y, outs[1].reshape(nm, 8, cp)
    return y


# ----------------------------------------------------------------------------
# Plain-JAX glue: patch extraction (NHWC, channel-major features) + layers
# ----------------------------------------------------------------------------
def _extract_patches(x_nhwc, ksize, stride, pad):
    pats = lax.conv_general_dilated_patches(
        x_nhwc, (ksize, ksize), (stride, stride),
        [(pad, pad), (pad, pad)],
        dimension_numbers=("NHWC", "HWIO", "NHWC"),
    )  # (N, OH, OW, C_in*k*k); feature order = (c_in, kh, kw)
    n, oh, ow, kk = pats.shape
    return pats.reshape(n * oh * ow, kk), (n, oh, ow)


def _w_as_mat(weight):
    # PyTorch (C_out, C_in, kh, kw) -> (C_in*kh*kw, C_out); matches patch order.
    c_out = weight.shape[0]
    return weight.reshape(c_out, -1).T.astype(jnp.bfloat16)


def _conv_bias_leaky(x_nhwc, weight, bias, *, stride, pad):
    c_out, _, ksize, _ = weight.shape
    patches, (n, oh, ow) = _extract_patches(
        x_nhwc.astype(jnp.bfloat16), ksize, stride, pad)
    y = _matmul_affine_act(
        patches, _w_as_mat(weight),
        jnp.ones((c_out,), jnp.float32), bias.astype(jnp.float32),
        act="leaky", c_out=c_out, fuse_stats=False)
    return y.reshape(n, oh, ow, c_out)


def _conv_bn_leaky(x_nhwc, weight, gamma, beta, *, stride=2, pad=1, eps=1e-5):
    c_out, _, ksize, _ = weight.shape
    patches, (n, oh, ow) = _extract_patches(
        x_nhwc.astype(jnp.bfloat16), ksize, stride, pad)
    m = patches.shape[0]
    ones = jnp.ones((c_out,), jnp.float32)
    zeros = jnp.zeros((c_out,), jnp.float32)
    # Kernel emits raw conv output (bf16) plus fused per-tile sum/sum-of-squares
    # (f32), so BatchNorm train-mode stats need no extra full-size passes.
    y, stats = _matmul_affine_act(
        patches, _w_as_mat(weight), ones, zeros,
        act="none", c_out=c_out, fuse_stats=True)
    # Padded M rows contribute exact zeros to both partial sums (zero patches,
    # identity affine), so dividing by the true M is exact.
    s1 = jnp.sum(stats[:, 0, :c_out], axis=0)
    s2 = jnp.sum(stats[:, 1, :c_out], axis=0)
    mean = s1 / m
    var = jnp.maximum(s2 / m - mean * mean, 0.0)   # biased variance (train mode)
    scale = gamma * lax.rsqrt(var + eps)
    shift = beta - mean * scale
    # One cheap elementwise pass over the bf16 raw output (affine + LeakyReLU).
    yf = y.astype(jnp.float32) * scale + shift
    yf = jnp.where(yf > 0, yf, 0.2 * yf)           # LeakyReLU(0.2)
    return yf.astype(jnp.bfloat16).reshape(n, oh, ow, c_out)


def _final_conv_sigmoid(x_nhwc, weight, bias):
    # C_out = 1, one output position per image -> plain JAX (a 1-lane Pallas
    # store would be ~99% masked and dominated by launch/DMA overhead).
    c_out, _, ksize, _ = weight.shape
    patches, (n, oh, ow) = _extract_patches(x_nhwc, ksize, 2, 0)
    w_mat = weight.reshape(c_out, -1).T.astype(jnp.float32)
    y = patches.astype(jnp.float32) @ w_mat + bias
    y = jax.nn.sigmoid(y)
    return y.reshape(n, oh, ow, c_out).transpose(0, 3, 1, 2)  # NCHW


# ----------------------------------------------------------------------------
# Discriminator forward (DCGAN)
# ----------------------------------------------------------------------------
def make_params(key, image_channels, fd):
    ks = jax.random.split(key, 6)
    std = 0.02  # DCGAN-style init
    return {
        "w1": jax.random.normal(ks[0], (fd, image_channels, 4, 4), jnp.float32) * std,
        "b1": jnp.zeros((fd,), jnp.float32),
        "w2": jax.random.normal(ks[1], (fd * 2, fd, 4, 4), jnp.float32) * std,
        "g2": jnp.ones((fd * 2,), jnp.float32),
        "beta2": jnp.zeros((fd * 2,), jnp.float32),
        "w3": jax.random.normal(ks[2], (fd * 4, fd * 2, 4, 4), jnp.float32) * std,
        "g3": jnp.ones((fd * 4,), jnp.float32),
        "beta3": jnp.zeros((fd * 4,), jnp.float32),
        "w4": jax.random.normal(ks[3], (fd * 8, fd * 4, 4, 4), jnp.float32) * std,
        "g4": jnp.ones((fd * 8,), jnp.float32),
        "beta4": jnp.zeros((fd * 8,), jnp.float32),
        "w5": jax.random.normal(ks[4], (1, fd * 8, 4, 4), jnp.float32) * std,
        "b5": jnp.zeros((1,), jnp.float32),
    }


def discriminator_forward(x_nchw, p):
    x = jnp.transpose(x_nchw, (0, 2, 3, 1))          # NCHW -> NHWC once
    # Conv(Cin, fd, 4, 2, 1) + bias + LeakyReLU  (fully fused in the kernel)
    x = _conv_bias_leaky(x, p["w1"], p["b1"], stride=2, pad=1)
    # _block(fd, 2fd): Conv(no bias) + BN(train stats) + LeakyReLU
    x = _conv_bn_leaky(x, p["w2"], p["g2"], p["beta2"])
    # _block(2fd, 4fd)
    x = _conv_bn_leaky(x, p["w3"], p["g3"], p["beta3"])
    # _block(4fd, 8fd)
    x = _conv_bn_leaky(x, p["w4"], p["g4"], p["beta4"])
    # Conv(8fd, 1, 4, 2, 0) + Sigmoid
    return _final_conv_sigmoid(x, p["w5"], p["b5"])  # (N, 1, 1, 1)


if __name__ == "__main__":
    # DCGAN discriminator needs 64x64 spatial input to reach the 1x1 output;
    # keep batch and features_d small for the demo.
    batch = 2
    image_channels = 1
    features_d = 8

    key = jax.random.PRNGKey(0)
    kx, kp = jax.random.split(key)
    x = jax.random.normal(kx, (batch, image_channels, 64, 64), jnp.float32)
    params = make_params(kp, image_channels, features_d)

    fwd = jax.jit(discriminator_forward)
    out = jax.block_until_ready(fwd(x, params))

    assert out.shape == (batch, 1, 1, 1), out.shape
    assert bool(jnp.all(jnp.isfinite(out)))
    assert bool(jnp.all((out >= 0.0) & (out <= 1.0)))
    print("KERNEL_OK")
</pallas_src>

<mosaic_0001>
module attributes {stable_mosaic.version = 11 : i64} {
  func.func @_matmul_affine_act_kernel(%arg0: i32, %arg1: i32, %arg2: i32, %arg3: memref<2048x16xbf16, #tpu.memory_space<vmem>>, %arg4: memref<16x128xbf16, #tpu.memory_space<vmem>>, %arg5: memref<1x128xf32, #tpu.memory_space<vmem>>, %arg6: memref<1x128xf32, #tpu.memory_space<vmem>>, %arg7: memref<2048x128xbf16, #tpu.memory_space<vmem>>, %arg8: memref<2048x128xf32, #tpu.memory_space<vmem>>) attributes {dimension_semantics = [#tpu.dimension_semantics<parallel>, #tpu.dimension_semantics<parallel>, #tpu.dimension_semantics<arbitrary>], iteration_bounds = array<i64: 1, 1, 1>, scalar_prefetch = 0 : i64, scratch_operands = 1 : i64, tpu.core_type = #tpu.core_type<tc>, window_params = [{transform_indices = @transform_0, window_bounds = array<i64: 2048, 16>}, {pipeline_mode = #tpu.pipeline_mode<synchronous>, transform_indices = @transform_1, window_bounds = array<i64: 16, 128>}, {pipeline_mode = #tpu.pipeline_mode<synchronous>, transform_indices = @transform_2, window_bounds = array<i64: 1, 128>}, {pipeline_mode = #tpu.pipeline_mode<synchronous>, transform_indices = @transform_3, window_bounds = array<i64: 1, 128>}, {transform_indices = @transform_4, window_bounds = array<i64: 2048, 128>}]} {
    %c0_i32 = arith.constant 0 : i32
    %0 = arith.cmpi eq, %arg2, %c0_i32 : i32
    %1 = arith.extui %0 : i1 to i32
    %c0_i32_0 = arith.constant 0 : i32
    %2 = arith.cmpi ne, %1, %c0_i32_0 : i32
    scf.if %2 {
      %cst_10 = arith.constant 0.000000e+00 : f32
      %12 = vector.broadcast %cst_10 : f32 to vector<2048x128xf32>
      %c0_11 = arith.constant 0 : index
      %c0_12 = arith.constant 0 : index
      %13 = vector.load %arg8[%c0_11, %c0_12] : memref<2048x128xf32, #tpu.memory_space<vmem>>, vector<2048x128xf32>
      tpu.vector_store %arg8[%c0_11, %c0_12], %12 {strides = array<i32>} : memref<2048x128xf32, #tpu.memory_space<vmem>>, vector<2048x128xf32>,
    } else {
    }
    %c0 = arith.constant 0 : index
    %c0_1 = arith.constant 0 : index
    %3 = vector.load %arg8[%c0, %c0_1] : memref<2048x128xf32, #tpu.memory_space<vmem>>, vector<2048x128xf32>
    %c0_2 = arith.constant 0 : index
    %c0_3 = arith.constant 0 : index
    %4 = vector.load %arg3[%c0_2, %c0_3] : memref<2048x16xbf16, #tpu.memory_space<vmem>>, vector<2048x16xbf16>
    %c0_4 = arith.constant 0 : index
    %c0_5 = arith.constant 0 : index
    %5 = vector.load %arg4[%c0_4, %c0_5] : memref<16x128xbf16, #tpu.memory_space<vmem>>, vector<16x128xbf16>
    %cst = arith.constant dense<0.000000e+00> : vector<2048x128xf32>
    %6 = tpu.matmul %4, %5, %cst {dimension_numbers = #tpu.dot_dimension_numbers<[1], [0], [0], [1], [0, 0, 1, 1], [], []>} : vector<2048x16xbf16>, vector<16x128xbf16>, vector<2048x128xf32> -> vector<2048x128xf32>
    %7 = arith.addf %3, %6 : vector<2048x128xf32>
    %c0_6 = arith.constant 0 : index
    %c0_7 = arith.constant 0 : index
    %8 = vector.load %arg8[%c0_6, %c0_7] : memref<2048x128xf32, #tpu.memory_space<vmem>>, vector<2048x128xf32>
    tpu.vector_store %arg8[%c0_6, %c0_7], %7 {strides = array<i32>} : memref<2048x128xf32, #tpu.memory_space<vmem>>, vector<2048x128xf32>,
    %c0_i32_8 = arith.constant 0 : i32
    %9 = arith.cmpi eq, %arg2, %c0_i32_8 : i32
    %10 = arith.extui %9 : i1 to i32
    %c0_i32_9 = arith.constant 0 : i32
    %11 = arith.cmpi ne, %10, %c0_i32_9 : i32
    scf.if %11 {
      %c0_10 = arith.constant 0 : index
      %c0_11 = arith.constant 0 : index
      %12 = vector.load %arg8[%c0_10, %c0_11] : memref<2048x128xf32, #tpu.memory_space<vmem>>, vector<2048x128xf32>
      %c0_12 = arith.constant 0 : index
      %c0_13 = arith.constant 0 : index
      %13 = vector.load %arg5[%c0_12, %c0_13] : memref<1x128xf32, #tpu.memory_space<vmem>>, vector<1x128xf32>
      %14 = vector.broadcast %13 : vector<1x128xf32> to vector<2048x128xf32>
      %15 = arith.mulf %12, %14 : vector<2048x128xf32>
      %c0_14 = arith.constant 0 : index
      %c0_15 = arith.constant 0 : index
      %16 = vector.load %arg6[%c0_14, %c0_15] : memref<1x128xf32, #tpu.memory_space<vmem>>, vector<1x128xf32>
      %17 = vector.broadcast %16 : vector<1x128xf32> to vector<2048x128xf32>
      %18 = arith.addf %15, %17 : vector<2048x128xf32>
      %cst_16 = arith.constant 0.000000e+00 : f32
      %19 = vector.broadcast %cst_16 : f32 to vector<2048x128xf32>
      %20 = arith.cmpf ogt, %18, %19 : vector<2048x128xf32>
      %cst_17 = arith.constant 2.000000e-01 : f32
      %21 = vector.broadcast %cst_17 : f32 to vector<2048x128xf32>
      %22 = arith.mulf %21, %18 : vector<2048x128xf32>
      %23 = arith.select %20, %18, %22 : vector<2048x128xi1>, vector<2048x128xf32>
      %24 = arith.truncf %23 : vector<2048x128xf32> to vector<2048x128xbf16>
      %c0_18 = arith.constant 0 : index
      %c0_19 = arith.constant 0 : index
      %25 = vector.load %arg7[%c0_18, %c0_19] : memref<2048x128xbf16, #tpu.memory_space<vmem>>, vector<2048x128xbf16>
      tpu.vector_store %arg7[%c0_18, %c0_19], %24 {strides = array<i32>} : memref<2048x128xbf16, #tpu.memory_space<vmem>>, vector<2048x128xbf16>,
    } else {
    }
    return
  }
  func.func @transform_0(%arg0: i32, %arg1: i32, %arg2: i32) -> (i32, i32) {
    %c0_i32 = arith.constant 0 : i32
    return %arg0, %arg2 : i32, i32
  }
  func.func @transform_1(%arg0: i32, %arg1: i32, %arg2: i32) -> (i32, i32) {
    %c0_i32 = arith.constant 0 : i32
    return %arg2, %arg1 : i32, i32
  }
  func.func @transform_2(%arg0: i32, %arg1: i32, %arg2: i32) -> (i32, i32) {
    %c0_i32 = arith.constant 0 : i32
    %c0_i32_0 = arith.constant 0 : i32
    return %c0_i32, %arg1 : i32, i32
  }
  func.func @transform_3(%arg0: i32, %arg1: i32, %arg2: i32) -> (i32, i32) {
    %c0_i32 = arith.constant 0 : i32
    %c0_i32_0 = arith.constant 0 : i32
    return %c0_i32, %arg1 : i32, i32
  }
  func.func @transform_4(%arg0: i32, %arg1: i32, %arg2: i32) -> (i32, i32) {
    %c0_i32 = arith.constant 0 : i32
    return %arg0, %arg1 : i32, i32
  }
}

module attributes {stable_mosaic.version = 11 : i64} {
  func.func @_matmul_affine_act_kernel(%arg0: i32, %arg1: i32, %arg2: i32, %arg3: memref<512x128xbf16, #tpu.memory_space<vmem>>, %arg4: memref<128x128xbf16, #tpu.memory_space<vmem>>, %arg5: memref<1x128xf32, #tpu.memory_space<vmem>>, %arg6: memref<1x128xf32, #tpu.memory_space<vmem>>, %arg7: memref<512x128xbf16, #tpu.memory_space<vmem>>, %arg8: memref<8x128xf32, #tpu.memory_space<vmem>>, %arg9: memref<512x128xf32, #tpu.memory_space<vmem>>) attributes {dimension_semantics = [#tpu.dimension_semantics<parallel>, #tpu.dimension_semantics<parallel>, #tpu.dimension_semantics<arbitrary>], iteration_bounds = array<i64: 1, 1, 1>, scalar_prefetch = 0 : i64, scratch_operands = 1 : i64, tpu.core_type = #tpu.core_type<tc>, window_params = [{transform_indices = @transform_0, window_bounds = array<i64: 512, 128>}, {pipeline_mode = #tpu.pipeline_mode<synchronous>, transform_indices = @transform_1, window_bounds = array<i64: 128, 128>}, {pipeline_mode = #tpu.pipeline_mode<synchronous>, transform_indices = @transform_2, window_bounds = array<i64: 1, 128>}, {pipeline_mode = #tpu.pipeline_mode<synchronous>, transform_indices = @transform_3, window_bounds = array<i64: 1, 128>}, {transform_indices = @transform_4, window_bounds = array<i64: 512, 128>}, {transform_indices = @transform_5, window_bounds = array<i64: 8, 128>}]} {
    %c0_i32 = arith.constant 0 : i32
    %0 = arith.cmpi eq, %arg2, %c0_i32 : i32
    %1 = arith.extui %0 : i1 to i32
    %c0_i32_0 = arith.constant 0 : i32
    %2 = arith.cmpi ne, %1, %c0_i32_0 : i32
    scf.if %2 {
      %cst_10 = arith.constant 0.000000e+00 : f32
      %12 = vector.broadcast %cst_10 : f32 to vector<512x128xf32>
      %c0_11 = arith.constant 0 : index
      %c0_12 = arith.constant 0 : index
      %13 = vector.load %arg9[%c0_11, %c0_12] : memref<512x128xf32, #tpu.memory_space<vmem>>, vector<512x128xf32>
      tpu.vector_store %arg9[%c0_11, %c0_12], %12 {strides = array<i32>} : memref<512x128xf32, #tpu.memory_space<vmem>>, vector<512x128xf32>,
    } else {
    }
    %c0 = arith.constant 0 : index
    %c0_1 = arith.constant 0 : index
    %3 = vector.load %arg9[%c0, %c0_1] : memref<512x128xf32, #tpu.memory_space<vmem>>, vector<512x128xf32>
    %c0_2 = arith.constant 0 : index
    %c0_3 = arith.constant 0 : index
    %4 = vector.load %arg3[%c0_2, %c0_3] : memref<512x128xbf16, #tpu.memory_space<vmem>>, vector<512x128xbf16>
    %c0_4 = arith.constant 0 : index
    %c0_5 = arith.constant 0 : index
    %5 = vector.load %arg4[%c0_4, %c0_5] : memref<128x128xbf16, #tpu.memory_space<vmem>>, vector<128x128xbf16>
    %cst = arith.constant dense<0.000000e+00> : vector<512x128xf32>
    %6 = tpu.matmul %4, %5, %cst {dimension_numbers = #tpu.dot_dimension_numbers<[1], [0], [0], [1], [0, 0, 1, 1], [], []>} : vector<512x128xbf16>, vector<128x128xbf16>, vector<512x128xf32> -> vector<512x128xf32>
    %7 = arith.addf %3, %6 : vector<512x128xf32>
    %c0_6 = arith.constant 0 : index
    %c0_7 = arith.constant 0 : index
    %8 = vector.load %arg9[%c0_6, %c0_7] : memref<512x128xf32, #tpu.memory_space<vmem>>, vector<512x128xf32>
    tpu.vector_store %arg9[%c0_6, %c0_7], %7 {strides = array<i32>} : memref<512x128xf32, #tpu.memory_space<vmem>>, vector<512x128xf32>,
    %c0_i32_8 = arith.constant 0 : i32
    %9 = arith.cmpi eq, %arg2, %c0_i32_8 : i32
    %10 = arith.extui %9 : i1 to i32
    %c0_i32_9 = arith.constant 0 : i32
    %11 = arith.cmpi ne, %10, %c0_i32_9 : i32
    scf.if %11 {
      %c0_10 = arith.constant 0 : index
      %c0_11 = arith.constant 0 : index
      %12 = vector.load %arg9[%c0_10, %c0_11] : memref<512x128xf32, #tpu.memory_space<vmem>>, vector<512x128xf32>
      %c0_12 = arith.constant 0 : index
      %c0_13 = arith.constant 0 : index
      %13 = vector.load %arg5[%c0_12, %c0_13] : memref<1x128xf32, #tpu.memory_space<vmem>>, vector<1x128xf32>
      %14 = vector.broadcast %13 : vector<1x128xf32> to vector<512x128xf32>
      %15 = arith.mulf %12, %14 : vector<512x128xf32>
      %c0_14 = arith.constant 0 : index
      %c0_15 = arith.constant 0 : index
      %16 = vector.load %arg6[%c0_14, %c0_15] : memref<1x128xf32, #tpu.memory_space<vmem>>, vector<1x128xf32>
      %17 = vector.broadcast %16 : vector<1x128xf32> to vector<512x128xf32>
      %18 = arith.addf %15, %17 : vector<512x128xf32>
      %19 = arith.truncf %18 : vector<512x128xf32> to vector<512x128xbf16>
      %c0_16 = arith.constant 0 : index
      %c0_17 = arith.constant 0 : index
      %20 = vector.load %arg7[%c0_16, %c0_17] : memref<512x128xbf16, #tpu.memory_space<vmem>>, vector<512x128xbf16>
      tpu.vector_store %arg7[%c0_16, %c0_17], %19 {strides = array<i32>} : memref<512x128xbf16, #tpu.memory_space<vmem>>, vector<512x128xbf16>,
      %cst_18 = arith.constant dense<0.000000e+00> : vector<128xf32>
      %21 = vector.multi_reduction <add>, %18, %cst_18 [0] : vector<512x128xf32> to vector<128xf32>
      %22 = vector.shape_cast %21 : vector<128xf32> to vector<1x128xf32>
      %23 = arith.mulf %18, %18 : vector<512x128xf32>
      %cst_19 = arith.constant dense<0.000000e+00> : vector<128xf32>
      %24 = vector.multi_reduction <add>, %23, %cst_19 [0] : vector<512x128xf32> to vector<128xf32>
      %25 = vector.shape_cast %24 : vector<128xf32> to vector<1x128xf32>
      %26 = tpu.iota {dimensions = array<i32: 0>} : vector<8x128xi32>
      %c0_i32_20 = arith.constant 0 : i32
      %27 = vector.broadcast %c0_i32_20 : i32 to vector<8x128xi32>
      %28 = arith.cmpi eq, %26, %27 : vector<8x128xi32>
      %cst_21 = arith.constant 0.000000e+00 : f32
      %29 = vector.shape_cast %22 : vector<1x128xf32> to vector<1x128xf32>
      %30 = vector.broadcast %29 : vector<1x128xf32> to vector<8x128xf32>
      %31 = vector.broadcast %cst_21 : f32 to vector<8x128xf32>
      %32 = arith.select %28, %30, %31 : vector<8x128xi1>, vector<8x128xf32>
      %c1_i32 = arith.constant 1 : i32
      %33 = vector.broadcast %c1_i32 : i32 to vector<8x128xi32>
      %34 = arith.cmpi eq, %26, %33 : vector<8x128xi32>
      %cst_22 = arith.constant 0.000000e+00 : f32
      %35 = vector.shape_cast %25 : vector<1x128xf32> to vector<1x128xf32>
      %36 = vector.broadcast %35 : vector<1x128xf32> to vector<8x128xf32>
      %37 = vector.broadcast %cst_22 : f32 to vector<8x128xf32>
      %38 = arith.select %34, %36, %37 : vector<8x128xi1>, vector<8x128xf32>
      %39 = arith.addf %32, %38 : vector<8x128xf32>
      %c0_23 = arith.constant 0 : index
      %c0_24 = arith.constant 0 : index
      %40 = vector.load %arg8[%c0_23, %c0_24] : memref<8x128xf32, #tpu.memory_space<vmem>>, vector<8x128xf32>
      tpu.vector_store %arg8[%c0_23, %c0_24], %39 {strides = array<i32>} : memref<8x128xf32, #tpu.memory_space<vmem>>, vector<8x128xf32>,
    } else {
    }
    return
  }
  func.func @transform_0(%arg0: i32, %arg1: i32, %arg2: i32) -> (i32, i32) {
    %c0_i32 = arith.constant 0 : i32
    return %arg0, %arg2 : i32, i32
  }
  func.func @transform_1(%arg0: i32, %arg1: i32, %arg2: i32) -> (i32, i32) {
    %c0_i32 = arith.constant 0 : i32
    return %arg2, %arg1 : i32, i32
  }
  func.func @transform_2(%arg0: i32, %arg1: i32, %arg2: i32) -> (i32, i32) {
    %c0_i32 = arith.constant 0 : i32
    %c0_i32_0 = arith.constant 0 : i32
    return %c0_i32, %arg1 : i32, i32
  }
  func.func @transform_3(%arg0: i32, %arg1: i32, %arg2: i32) -> (i32, i32) {
    %c0_i32 = arith.constant 0 : i32
    %c0_i32_0 = arith.constant 0 : i32
    return %c0_i32, %arg1 : i32, i32
  }
  func.func @transform_4(%arg0: i32, %arg1: i32, %arg2: i32) -> (i32, i32) {
    %c0_i32 = arith.constant 0 : i32
    return %arg0, %arg1 : i32, i32
  }
  func.func @transform_5(%arg0: i32, %arg1: i32, %arg2: i32) -> (i32, i32) {
    %c0_i32 = arith.constant 0 : i32
    return %arg0, %arg1 : i32, i32
  }
}

module attributes {stable_mosaic.version = 11 : i64} {
  func.func @_matmul_affine_act_kernel(%arg0: i32, %arg1: i32, %arg2: i32, %arg3: memref<128x256xbf16, #tpu.memory_space<vmem>>, %arg4: memref<256x128xbf16, #tpu.memory_space<vmem>>, %arg5: memref<1x128xf32, #tpu.memory_space<vmem>>, %arg6: memref<1x128xf32, #tpu.memory_space<vmem>>, %arg7: memref<128x128xbf16, #tpu.memory_space<vmem>>, %arg8: memref<8x128xf32, #tpu.memory_space<vmem>>, %arg9: memref<128x128xf32, #tpu.memory_space<vmem>>) attributes {dimension_semantics = [#tpu.dimension_semantics<parallel>, #tpu.dimension_semantics<parallel>, #tpu.dimension_semantics<arbitrary>], iteration_bounds = array<i64: 1, 1, 1>, scalar_prefetch = 0 : i64, scratch_operands = 1 : i64, tpu.core_type = #tpu.core_type<tc>, window_params = [{transform_indices = @transform_0, window_bounds = array<i64: 128, 256>}, {pipeline_mode = #tpu.pipeline_mode<synchronous>, transform_indices = @transform_1, window_bounds = array<i64: 256, 128>}, {pipeline_mode = #tpu.pipeline_mode<synchronous>, transform_indices = @transform_2, window_bounds = array<i64: 1, 128>}, {pipeline_mode = #tpu.pipeline_mode<synchronous>, transform_indices = @transform_3, window_bounds = array<i64: 1, 128>}, {transform_indices = @transform_4, window_bounds = array<i64: 128, 128>}, {transform_indices = @transform_5, window_bounds = array<i64: 8, 128>}]} {
    %c0_i32 = arith.constant 0 : i32
    %0 = arith.cmpi eq, %arg2, %c0_i32 : i32
    %1 = arith.extui %0 : i1 to i32
    %c0_i32_0 = arith.constant 0 : i32
    %2 = arith.cmpi ne, %1, %c0_i32_0 : i32
    scf.if %2 {
      %cst_10 = arith.constant 0.000000e+00 : f32
      %12 = vector.broadcast %cst_10 : f32 to vector<128x128xf32>
      %c0_11 = arith.constant 0 : index
      %c0_12 = arith.constant 0 : index
      %13 = vector.load %arg9[%c0_11, %c0_12] : memref<128x128xf32, #tpu.memory_space<vmem>>, vector<128x128xf32>
      tpu.vector_store %arg9[%c0_11, %c0_12], %12 {strides = array<i32>} : memref<128x128xf32, #tpu.memory_space<vmem>>, vector<128x128xf32>,
    } else {
    }
    %c0 = arith.constant 0 : index
    %c0_1 = arith.constant 0 : index
    %3 = vector.load %arg9[%c0, %c0_1] : memref<128x128xf32, #tpu.memory_space<vmem>>, vector<128x128xf32>
    %c0_2 = arith.constant 0 : index
    %c0_3 = arith.constant 0 : index
    %4 = vector.load %arg3[%c0_2, %c0_3] : memref<128x256xbf16, #tpu.memory_space<vmem>>, vector<128x256xbf16>
    %c0_4 = arith.constant 0 : index
    %c0_5 = arith.constant 0 : index
    %5 = vector.load %arg4[%c0_4, %c0_5] : memref<256x128xbf16, #tpu.memory_space<vmem>>, vector<256x128xbf16>
    %cst = arith.constant dense<0.000000e+00> : vector<128x128xf32>
    %6 = tpu.matmul %4, %5, %cst {dimension_numbers = #tpu.dot_dimension_numbers<[1], [0], [0], [1], [0, 0, 1, 1], [], []>} : vector<128x256xbf16>, vector<256x128xbf16>, vector<128x128xf32> -> vector<128x128xf32>
    %7 = arith.addf %3, %6 : vector<128x128xf32>
    %c0_6 = arith.constant 0 : index
    %c0_7 = arith.constant 0 : index
    %8 = vector.load %arg9[%c0_6, %c0_7] : memref<128x128xf32, #tpu.memory_space<vmem>>, vector<128x128xf32>
    tpu.vector_store %arg9[%c0_6, %c0_7], %7 {strides = array<i32>} : memref<128x128xf32, #tpu.memory_space<vmem>>, vector<128x128xf32>,
    %c0_i32_8 = arith.constant 0 : i32
    %9 = arith.cmpi eq, %arg2, %c0_i32_8 : i32
    %10 = arith.extui %9 : i1 to i32
    %c0_i32_9 = arith.constant 0 : i32
    %11 = arith.cmpi ne, %10, %c0_i32_9 : i32
    scf.if %11 {
      %c0_10 = arith.constant 0 : index
      %c0_11 = arith.constant 0 : index
      %12 = vector.load %arg9[%c0_10, %c0_11] : memref<128x128xf32, #tpu.memory_space<vmem>>, vector<128x128xf32>
      %c0_12 = arith.constant 0 : index
      %c0_13 = arith.constant 0 : index
      %13 = vector.load %arg5[%c0_12, %c0_13] : memref<1x128xf32, #tpu.memory_space<vmem>>, vector<1x128xf32>
      %14 = vector.broadcast %13 : vector<1x128xf32> to vector<128x128xf32>
      %15 = arith.mulf %12, %14 : vector<128x128xf32>
      %c0_14 = arith.constant 0 : index
      %c0_15 = arith.constant 0 : index
      %16 = vector.load %arg6[%c0_14, %c0_15] : memref<1x128xf32, #tpu.memory_space<vmem>>, vector<1x128xf32>
      %17 = vector.broadcast %16 : vector<1x128xf32> to vector<128x128xf32>
      %18 = arith.addf %15, %17 : vector<128x128xf32>
      %19 = arith.truncf %18 : vector<128x128xf32> to vector<128x128xbf16>
      %c0_16 = arith.constant 0 : index
      %c0_17 = arith.constant 0 : index
      %20 = vector.load %arg7[%c0_16, %c0_17] : memref<128x128xbf16, #tpu.memory_space<vmem>>, vector<128x128xbf16>
      tpu.vector_store %arg7[%c0_16, %c0_17], %19 {strides = array<i32>} : memref<128x128xbf16, #tpu.memory_space<vmem>>, vector<128x128xbf16>,
      %cst_18 = arith.constant dense<0.000000e+00> : vector<128xf32>
      %21 = vector.multi_reduction <add>, %18, %cst_18 [0] : vector<128x128xf32> to vector<128xf32>
      %22 = vector.shape_cast %21 : vector<128xf32> to vector<1x128xf32>
      %23 = arith.mulf %18, %18 : vector<128x128xf32>
      %cst_19 = arith.constant dense<0.000000e+00> : vector<128xf32>
      %24 = vector.multi_reduction <add>, %23, %cst_19 [0] : vector<128x128xf32> to vector<128xf32>
      %25 = vector.shape_cast %24 : vector<128xf32> to vector<1x128xf32>
      %26 = tpu.iota {dimensions = array<i32: 0>} : vector<8x128xi32>
      %c0_i32_20 = arith.constant 0 : i32
      %27 = vector.broadcast %c0_i32_20 : i32 to vector<8x128xi32>
      %28 = arith.cmpi eq, %26, %27 : vector<8x128xi32>
      %cst_21 = arith.constant 0.000000e+00 : f32
      %29 = vector.shape_cast %22 : vector<1x128xf32> to vector<1x128xf32>
      %30 = vector.broadcast %29 : vector<1x128xf32> to vector<8x128xf32>
      %31 = vector.broadcast %cst_21 : f32 to vector<8x128xf32>
      %32 = arith.select %28, %30, %31 : vector<8x128xi1>, vector<8x128xf32>
      %c1_i32 = arith.constant 1 : i32
      %33 = vector.broadcast %c1_i32 : i32 to vector<8x128xi32>
      %34 = arith.cmpi eq, %26, %33 : vector<8x128xi32>
      %cst_22 = arith.constant 0.000000e+00 : f32
      %35 = vector.shape_cast %25 : vector<1x128xf32> to vector<1x128xf32>
      %36 = vector.broadcast %35 : vector<1x128xf32> to vector<8x128xf32>
      %37 = vector.broadcast %cst_22 : f32 to vector<8x128xf32>
      %38 = arith.select %34, %36, %37 : vector<8x128xi1>, vector<8x128xf32>
      %39 = arith.addf %32, %38 : vector<8x128xf32>
      %c0_23 = arith.constant 0 : index
      %c0_24 = arith.constant 0 : index
      %40 = vector.load %arg8[%c0_23, %c0_24] : memref<8x128xf32, #tpu.memory_space<vmem>>, vector<8x128xf32>
      tpu.vector_store %arg8[%c0_23, %c0_24], %39 {strides = array<i32>} : memref<8x128xf32, #tpu.memory_space<vmem>>, vector<8x128xf32>,
    } else {
    }
    return
  }
  func.func @transform_0(%arg0: i32, %arg1: i32, %arg2: i32) -> (i32, i32) {
    %c0_i32 = arith.constant 0 : i32
    return %arg0, %arg2 : i32, i32
  }
  func.func @transform_1(%arg0: i32, %arg1: i32, %arg2: i32) -> (i32, i32) {
    %c0_i32 = arith.constant 0 : i32
    return %arg2, %arg1 : i32, i32
  }
  func.func @transform_2(%arg0: i32, %arg1: i32, %arg2: i32) -> (i32, i32) {
    %c0_i32 = arith.constant 0 : i32
    %c0_i32_0 = arith.constant 0 : i32
    return %c0_i32, %arg1 : i32, i32
  }
  func.func @transform_3(%arg0: i32, %arg1: i32, %arg2: i32) -> (i32, i32) {
    %c0_i32 = arith.constant 0 : i32
    %c0_i32_0 = arith.constant 0 : i32
    return %c0_i32, %arg1 : i32, i32
  }
  func.func @transform_4(%arg0: i32, %arg1: i32, %arg2: i32) -> (i32, i32) {
    %c0_i32 = arith.constant 0 : i32
    return %arg0, %arg1 : i32, i32
  }
  func.func @transform_5(%arg0: i32, %arg1: i32, %arg2: i32) -> (i32, i32) {
    %c0_i32 = arith.constant 0 : i32
    return %arg0, %arg1 : i32, i32
  }
}

module attributes {stable_mosaic.version = 11 : i64} {
  func.func @_matmul_affine_act_kernel(%arg0: i32, %arg1: i32, %arg2: i32, %arg3: memref<32x512xbf16, #tpu.memory_space<vmem>>, %arg4: memref<512x128xbf16, #tpu.memory_space<vmem>>, %arg5: memref<1x128xf32, #tpu.memory_space<vmem>>, %arg6: memref<1x128xf32, #tpu.memory_space<vmem>>, %arg7: memref<32x128xbf16, #tpu.memory_space<vmem>>, %arg8: memref<8x128xf32, #tpu.memory_space<vmem>>, %arg9: memref<32x128xf32, #tpu.memory_space<vmem>>) attributes {dimension_semantics = [#tpu.dimension_semantics<parallel>, #tpu.dimension_semantics<parallel>, #tpu.dimension_semantics<arbitrary>], iteration_bounds = array<i64: 1, 1, 1>, scalar_prefetch = 0 : i64, scratch_operands = 1 : i64, tpu.core_type = #tpu.core_type<tc>, window_params = [{transform_indices = @transform_0, window_bounds = array<i64: 32, 512>}, {pipeline_mode = #tpu.pipeline_mode<synchronous>, transform_indices = @transform_1, window_bounds = array<i64: 512, 128>}, {pipeline_mode = #tpu.pipeline_mode<synchronous>, transform_indices = @transform_2, window_bounds = array<i64: 1, 128>}, {pipeline_mode = #tpu.pipeline_mode<synchronous>, transform_indices = @transform_3, window_bounds = array<i64: 1, 128>}, {transform_indices = @transform_4, window_bounds = array<i64: 32, 128>}, {transform_indices = @transform_5, window_bounds = array<i64: 8, 128>}]} {
    %c0_i32 = arith.constant 0 : i32
    %0 = arith.cmpi eq, %arg2, %c0_i32 : i32
    %1 = arith.extui %0 : i1 to i32
    %c0_i32_0 = arith.constant 0 : i32
    %2 = arith.cmpi ne, %1, %c0_i32_0 : i32
    scf.if %2 {
      %cst_10 = arith.constant 0.000000e+00 : f32
      %12 = vector.broadcast %cst_10 : f32 to vector<32x128xf32>
      %c0_11 = arith.constant 0 : index
      %c0_12 = arith.constant 0 : index
      %13 = vector.load %arg9[%c0_11, %c0_12] : memref<32x128xf32, #tpu.memory_space<vmem>>, vector<32x128xf32>
      tpu.vector_store %arg9[%c0_11, %c0_12], %12 {strides = array<i32>} : memref<32x128xf32, #tpu.memory_space<vmem>>, vector<32x128xf32>,
    } else {
    }
    %c0 = arith.constant 0 : index
    %c0_1 = arith.constant 0 : index
    %3 = vector.load %arg9[%c0, %c0_1] : memref<32x128xf32, #tpu.memory_space<vmem>>, vector<32x128xf32>
    %c0_2 = arith.constant 0 : index
    %c0_3 = arith.constant 0 : index
    %4 = vector.load %arg3[%c0_2, %c0_3] : memref<32x512xbf16, #tpu.memory_space<vmem>>, vector<32x512xbf16>
    %c0_4 = arith.constant 0 : index
    %c0_5 = arith.constant 0 : index
    %5 = vector.load %arg4[%c0_4, %c0_5] : memref<512x128xbf16, #tpu.memory_space<vmem>>, vector<512x128xbf16>
    %cst = arith.constant dense<0.000000e+00> : vector<32x128xf32>
    %6 = tpu.matmul %4, %5, %cst {dimension_numbers = #tpu.dot_dimension_numbers<[1], [0], [0], [1], [0, 0, 1, 1], [], []>} : vector<32x512xbf16>, vector<512x128xbf16>, vector<32x128xf32> -> vector<32x128xf32>
    %7 = arith.addf %3, %6 : vector<32x128xf32>
    %c0_6 = arith.constant 0 : index
    %c0_7 = arith.constant 0 : index
    %8 = vector.load %arg9[%c0_6, %c0_7] : memref<32x128xf32, #tpu.memory_space<vmem>>, vector<32x128xf32>
    tpu.vector_store %arg9[%c0_6, %c0_7], %7 {strides = array<i32>} : memref<32x128xf32, #tpu.memory_space<vmem>>, vector<32x128xf32>,
    %c0_i32_8 = arith.constant 0 : i32
    %9 = arith.cmpi eq, %arg2, %c0_i32_8 : i32
    %10 = arith.extui %9 : i1 to i32
    %c0_i32_9 = arith.constant 0 : i32
    %11 = arith.cmpi ne, %10, %c0_i32_9 : i32
    scf.if %11 {
      %c0_10 = arith.constant 0 : index
      %c0_11 = arith.constant 0 : index
      %12 = vector.load %arg9[%c0_10, %c0_11] : memref<32x128xf32, #tpu.memory_space<vmem>>, vector<32x128xf32>
      %c0_12 = arith.constant 0 : index
      %c0_13 = arith.constant 0 : index
      %13 = vector.load %arg5[%c0_12, %c0_13] : memref<1x128xf32, #tpu.memory_space<vmem>>, vector<1x128xf32>
      %14 = vector.broadcast %13 : vector<1x128xf32> to vector<32x128xf32>
      %15 = arith.mulf %12, %14 : vector<32x128xf32>
      %c0_14 = arith.constant 0 : index
      %c0_15 = arith.constant 0 : index
      %16 = vector.load %arg6[%c0_14, %c0_15] : memref<1x128xf32, #tpu.memory_space<vmem>>, vector<1x128xf32>
      %17 = vector.broadcast %16 : vector<1x128xf32> to vector<32x128xf32>
      %18 = arith.addf %15, %17 : vector<32x128xf32>
      %19 = arith.truncf %18 : vector<32x128xf32> to vector<32x128xbf16>
      %c0_16 = arith.constant 0 : index
      %c0_17 = arith.constant 0 : index
      %20 = vector.load %arg7[%c0_16, %c0_17] : memref<32x128xbf16, #tpu.memory_space<vmem>>, vector<32x128xbf16>
      tpu.vector_store %arg7[%c0_16, %c0_17], %19 {strides = array<i32>} : memref<32x128xbf16, #tpu.memory_space<vmem>>, vector<32x128xbf16>,
      %cst_18 = arith.constant dense<0.000000e+00> : vector<128xf32>
      %21 = vector.multi_reduction <add>, %18, %cst_18 [0] : vector<32x128xf32> to vector<128xf32>
      %22 = vector.shape_cast %21 : vector<128xf32> to vector<1x128xf32>
      %23 = arith.mulf %18, %18 : vector<32x128xf32>
      %cst_19 = arith.constant dense<0.000000e+00> : vector<128xf32>
      %24 = vector.multi_reduction <add>, %23, %cst_19 [0] : vector<32x128xf32> to vector<128xf32>
      %25 = vector.shape_cast %24 : vector<128xf32> to vector<1x128xf32>
      %26 = tpu.iota {dimensions = array<i32: 0>} : vector<8x128xi32>
      %c0_i32_20 = arith.constant 0 : i32
      %27 = vector.broadcast %c0_i32_20 : i32 to vector<8x128xi32>
      %28 = arith.cmpi eq, %26, %27 : vector<8x128xi32>
      %cst_21 = arith.constant 0.000000e+00 : f32
      %29 = vector.shape_cast %22 : vector<1x128xf32> to vector<1x128xf32>
      %30 = vector.broadcast %29 : vector<1x128xf32> to vector<8x128xf32>
      %31 = vector.broadcast %cst_21 : f32 to vector<8x128xf32>
      %32 = arith.select %28, %30, %31 : vector<8x128xi1>, vector<8x128xf32>
      %c1_i32 = arith.constant 1 : i32
      %33 = vector.broadcast %c1_i32 : i32 to vector<8x128xi32>
      %34 = arith.cmpi eq, %26, %33 : vector<8x128xi32>
      %cst_22 = arith.constant 0.000000e+00 : f32
      %35 = vector.shape_cast %25 : vector<1x128xf32> to vector<1x128xf32>
      %36 = vector.broadcast %35 : vector<1x128xf32> to vector<8x128xf32>
      %37 = vector.broadcast %cst_22 : f32 to vector<8x128xf32>
      %38 = arith.select %34, %36, %37 : vector<8x128xi1>, vector<8x128xf32>
      %39 = arith.addf %32, %38 : vector<8x128xf32>
      %c0_23 = arith.constant 0 : index
      %c0_24 = arith.constant 0 : index
      %40 = vector.load %arg8[%c0_23, %c0_24] : memref<8x128xf32, #tpu.memory_space<vmem>>, vector<8x128xf32>
      tpu.vector_store %arg8[%c0_23, %c0_24], %39 {strides = array<i32>} : memref<8x128xf32, #tpu.memory_space<vmem>>, vector<8x128xf32>,
    } else {
    }
    return
  }
  func.func @transform_0(%arg0: i32, %arg1: i32, %arg2: i32) -> (i32, i32) {
    %c0_i32 = arith.constant 0 : i32
    return %arg0, %arg2 : i32, i32
  }
  func.func @transform_1(%arg0: i32, %arg1: i32, %arg2: i32) -> (i32, i32) {
    %c0_i32 = arith.constant 0 : i32
    return %arg2, %arg1 : i32, i32
  }
  func.func @transform_2(%arg0: i32, %arg1: i32, %arg2: i32) -> (i32, i32) {
    %c0_i32 = arith.constant 0 : i32
    %c0_i32_0 = arith.constant 0 : i32
    return %c0_i32, %arg1 : i32, i32
  }
  func.func @transform_3(%arg0: i32, %arg1: i32, %arg2: i32) -> (i32, i32) {
    %c0_i32 = arith.constant 0 : i32
    %c0_i32_0 = arith.constant 0 : i32
    return %c0_i32, %arg1 : i32, i32
  }
  func.func @transform_4(%arg0: i32, %arg1: i32, %arg2: i32) -> (i32, i32) {
    %c0_i32 = arith.constant 0 : i32
    return %arg0, %arg1 : i32, i32
  }
  func.func @transform_5(%arg0: i32, %arg1: i32, %arg2: i32) -> (i32, i32) {
    %c0_i32 = arith.constant 0 : i32
    return %arg0, %arg1 : i32, i32
  }
}

</mosaic_0001>

<bundles_post_ra>
// kernel: discriminator_forward.5
= control target key start
LH: loop header
LB: loop body
LE: loop exit
PB: predicated region body
PF: predicated region fallthrough
CT: control target
= control target key end

     0   :  { %s2457_s1 = inlined_call_operand.vmem [shape: bf16[128,128], index: 1, kind: input, shape index: {}]   ;;  %s2458_s2 = inlined_call_operand.vmem [shape: f32[1,128], index: 2, kind: input, shape index: {}]   ;;  %s2459_s3 = inlined_call_operand.vmem [shape: f32[1,128], index: 3, kind: input, shape index: {}]   ;;  %s2460_s0 = inlined_call_operand.vmem [shape: bf16[512,128], index: 0, kind: input, shape index: {}]   ;;  %s2461_s4 = inlined_call_operand.vmem [shape: bf16[512,128], index: 4, kind: output, shape index: {0}]   ;;  %s2462_s5 = inlined_call_operand.vmem [shape: f32[8,128], index: 5, kind: output, shape index: {1}]  }
   0x1   :  { %v1516_v0 = vld [vmem:[%s2457_s1 + $0x38] sm:$0xff]  ;;  %v1515_v1 = vld [vmem:[%s2457_s1 + $0x30] sm:$0xff]  ;;  %v1514_v2 = vld [vmem:[%s2457_s1 + $0x28] sm:$0xff] }
   0x2   :  { %471 = vmatpush.bf16.msra.mxu0 %v1516_v0  ;;  %1708 = vmatpush.bf16.msra.mxu1 %v1516_v0  ;;  %v1513_v3 = vld [vmem:[%s2457_s1 + $0x20] sm:$0xff]  ;;  %v1512_v4 = vld [vmem:[%s2457_s1 + $0x18] sm:$0xff]  ;;  %v1511_v5 = vld [vmem:[%s2457_s1 + $0x10] sm:$0xff] }
   0x3   :  { %1709 = vmatpush.bf16.msra.mxu2 %v1516_v0  ;;  %1710 = vmatpush.bf16.msra.mxu3 %v1516_v0  ;;  %v1510_v6 = vld [vmem:[%s2457_s1 + $0x8] sm:$0xff]  ;;  %v1509_v7 = vld [vmem:[%s2457_s1] sm:$0xff]  ;;  %v1479_v13 = vld [vmem:[%s2460_s0 + $0x10] sm:$0xff] }
   0x4   :  { %v1477_v8 = vld [vmem:[%s2460_s0] sm:$0xff]  ;;  %v1478_v10 = vld [vmem:[%s2460_s0 + $0x8] sm:$0xff]  ;;  %v1487_v14 = vld [vmem:[%s2460_s0 + $0x50] sm:$0xff] }
   0x5   :  { %v1485_v9 = vld [vmem:[%s2460_s0 + $0x40] sm:$0xff]  ;;  %v1486_v11 = vld [vmem:[%s2460_s0 + $0x48] sm:$0xff]  ;;  %v1480_v16 = vld [vmem:[%s2460_s0 + $0x18] sm:$0xff] }
   0x6   :  { %472 = vmatpush.bf16.msra.mxu0 %v1515_v1  ;;  %1711 = vmatpush.bf16.msra.mxu1 %v1515_v1  ;;  %v1493_v12 = vld [vmem:[%s2460_s0 + $0x80] sm:$0xff]  ;;  %v1494_v15 = vld [vmem:[%s2460_s0 + $0x88] sm:$0xff]  ;;  %v1488_v17 = vld [vmem:[%s2460_s0 + $0x58] sm:$0xff] }
   0x7   :  { %1712 = vmatpush.bf16.msra.mxu2 %v1515_v1  ;;  %1713 = vmatpush.bf16.msra.mxu3 %v1515_v1  ;;  %v1495_v18 = vld [vmem:[%s2460_s0 + $0x90] sm:$0xff]  ;;  %v1501_v19 = vld [vmem:[%s2460_s0 + $0xc0] sm:$0xff]  ;;  %v1496_v22 = vld [vmem:[%s2460_s0 + $0x98] sm:$0xff] }
   0x8   :  { %v1481_v20 = vld [vmem:[%s2460_s0 + $0x20] sm:$0xff]  ;;  %v1502_v23 = vld [vmem:[%s2460_s0 + $0xc8] sm:$0xff]  ;;  %v1503_v27 = vld [vmem:[%s2460_s0 + $0xd0] sm:$0xff] }
   0x9   :  { %v1489_v21 = vld [vmem:[%s2460_s0 + $0x60] sm:$0xff]  ;;  %v1482_v24 = vld [vmem:[%s2460_s0 + $0x28] sm:$0xff]  ;;  %v1483_v28 = vld [vmem:[%s2460_s0 + $0x30] sm:$0xff] }
   0xa   :  { %473 = vmatpush.bf16.msra.mxu0 %v1514_v2  ;;  %1714 = vmatpush.bf16.msra.mxu1 %v1514_v2  ;;  %v1490_v25 = vld [vmem:[%s2460_s0 + $0x68] sm:$0xff]  ;;  %v1497_v26 = vld [vmem:[%s2460_s0 + $0xa0] sm:$0xff]  ;;  %v1491_v29 = vld [vmem:[%s2460_s0 + $0x70] sm:$0xff] }
   0xb   :  { %1715 = vmatpush.bf16.msra.mxu2 %v1514_v2  ;;  %1716 = vmatpush.bf16.msra.mxu3 %v1514_v2  ;;  %v1498_v30 = vld [vmem:[%s2460_s0 + $0xa8] sm:$0xff]  ;;  %v1504_v31 = vld [vmem:[%s2460_s0 + $0xd8] sm:$0xff]  ;;  %v1499_v34 = vld [vmem:[%s2460_s0 + $0xb0] sm:$0xff] }
   0xc   :  { %v1484_v32 = vld [vmem:[%s2460_s0 + $0x38] sm:$0xff]  ;;  %v1505_v35 = vld [vmem:[%s2460_s0 + $0xe0] sm:$0xff]  ;;  %v1506_v40 = vld [vmem:[%s2460_s0 + $0xe8] sm:$0xff] }
   0xd   :  { %v1492_v33 = vld [vmem:[%s2460_s0 + $0x78] sm:$0xff]  ;;  %v1875_v37 = vld [vmem:[%s2458_s2] ss:$0 sm:$0xff]  ;;  %v1507_v62 = vld [vmem:[%s2460_s0 + $0xf0] sm:$0xff] }
   0xe   :  { %474 = vmatpush.bf16.msra.mxu0 %v1513_v3  ;;  %1717 = vmatpush.bf16.msra.mxu1 %v1513_v3  ;;  %v1500_v39 = vld [vmem:[%s2460_s0 + $0xb8] sm:$0xff]  ;;  %v1887_v42 = vld [vmem:[%s2459_s3] ss:$0 sm:$0xff] }
   0xf   :  { %1718 = vmatpush.bf16.msra.mxu2 %v1513_v3  ;;  %1719 = vmatpush.bf16.msra.mxu3 %v1513_v3 }
  0x12   :  { %475 = vmatpush.bf16.msra.mxu0 %v1512_v4  ;;  %1720 = vmatpush.bf16.msra.mxu1 %v1512_v4 }
  0x13   :  { %1721 = vmatpush.bf16.msra.mxu2 %v1512_v4  ;;  %1722 = vmatpush.bf16.msra.mxu3 %v1512_v4 }
  0x16   :  { %476 = vmatpush.bf16.msra.mxu0 %v1511_v5  ;;  %1723 = vmatpush.bf16.msra.mxu1 %v1511_v5 }
  0x17   :  { %1724 = vmatpush.bf16.msra.mxu2 %v1511_v5  ;;  %1725 = vmatpush.bf16.msra.mxu3 %v1511_v5 }
  0x1a   :  { %477 = vmatpush.bf16.msra.mxu0 %v1510_v6  ;;  %1726 = vmatpush.bf16.msra.mxu1 %v1510_v6 }
  0x1b   :  { %1727 = vmatpush.bf16.msra.mxu2 %v1510_v6  ;;  %1728 = vmatpush.bf16.msra.mxu3 %v1510_v6 }
  0x1e   :  { %478 = vmatpush.bf16.msra.mxu0 %v1509_v7  ;;  %1729 = vmatpush.bf16.msra.mxu1 %v1509_v7 }
  0x1f   :  { %1730 = vmatpush.bf16.msra.mxu2 %v1509_v7  ;;  %1731 = vmatpush.bf16.msra.mxu3 %v1509_v7 }
  0x21   :  { %479 = vmatmul.bf16.vlgmr.msra.gmra.mxu0 %v1477_v8  ;;  %519 = vmatmul.bf16.vlgmr.msra.gmra.mxu1 %v1485_v9 }
  0x22   :  { %559 = vmatmul.bf16.vlgmr.msra.gmra.mxu2 %v1493_v12  ;;  %599 = vmatmul.bf16.vlgmr.msra.gmra.mxu3 %v1501_v19 }
  0x31   :  { %484 = vmatmul.bf16.gmra.mxu0 %v1478_v10  ;;  %524 = vmatmul.bf16.gmra.mxu1 %v1486_v11 }
  0x32   :  { %564 = vmatmul.bf16.gmra.mxu2 %v1494_v15  ;;  %604 = vmatmul.bf16.gmra.mxu3 %v1502_v23 }
  0x41   :  { %489 = vmatmul.bf16.gmra.mxu0 %v1479_v13  ;;  %529 = vmatmul.bf16.gmra.mxu1 %v1487_v14 }
  0x42   :  { %569 = vmatmul.bf16.gmra.mxu2 %v1495_v18  ;;  %609 = vmatmul.bf16.gmra.mxu3 %v1503_v27 }
  0x51   :  { %494 = vmatmul.bf16.gmra.mxu0 %v1480_v16  ;;  %534 = vmatmul.bf16.gmra.mxu1 %v1488_v17 }
  0x52   :  { %574 = vmatmul.bf16.gmra.mxu2 %v1496_v22  ;;  %614 = vmatmul.bf16.gmra.mxu3 %v1504_v31  ;;  %v1508_v22 = vld [vmem:[%s2460_s0 + $0xf8] sm:$0xff] }
  0x61   :  { %499 = vmatmul.bf16.gmra.mxu0 %v1481_v20  ;;  %539 = vmatmul.bf16.gmra.mxu1 %v1489_v21 }
  0x62   :  { %579 = vmatmul.bf16.gmra.mxu2 %v1497_v26  ;;  %619 = vmatmul.bf16.gmra.mxu3 %v1505_v35 }
  0x71   :  { %504 = vmatmul.bf16.gmra.mxu0 %v1482_v24  ;;  %544 = vmatmul.bf16.gmra.mxu1 %v1490_v25 }
  0x72   :  { %584 = vmatmul.bf16.gmra.mxu2 %v1498_v30  ;;  %624 = vmatmul.bf16.gmra.mxu3 %v1506_v40 }
  0x81   :  { %509 = vmatmul.bf16.gmra.mxu0 %v1483_v28  ;;  %549 = vmatmul.bf16.gmra.mxu1 %v1491_v29 }
  0x82   :  { %589 = vmatmul.bf16.gmra.mxu2 %v1499_v34  ;;  %629 = vmatmul.bf16.gmra.mxu3 %v1507_v62 }
  0x91   :  { %514 = vmatmul.bf16.gmra.mxu0 %v1484_v32  ;;  %554 = vmatmul.bf16.gmra.mxu1 %v1492_v33 }
  0x92   :  { %594 = vmatmul.bf16.gmra.mxu2 %v1500_v39  ;;  %634 = vmatmul.bf16.gmra.mxu3 %v1508_v22 }
  0x9e   :  { %v480_v36 = vpop.f32.mrf.mxu0  ;;  %v520_v38 = vpop.f32.mrf.mxu1 }
  0x9f   :  { %v839_v41 = vmul.f32 %v1875_v37, %v480_v36  ;;  %v855_v43 = vmul.f32 %v1875_v37, %v520_v38 }
  0xa1   :  { %v907_v44 = vadd.f32 %v1887_v42, %v839_v41  ;;  %v1893_v48 = vadd.f32 %v1887_v42, %v855_v43 }
  0xa3   :  { %v1168_v52 = vmul.f32 %v907_v44, %v907_v44 }
  0xa5   :  { %v560_v8 = vpop.f32.mrf.mxu2 }
  0xa6   :  { %v482_v45 = vpop.f32.mrf.mxu0  ;;  %v522_v46 = vpop.f32.mrf.mxu1  ;;  %v871_v16 = vmul.f32 %v1875_v37, %v560_v8 }
  0xa7   :  { %v840_v47 = vmul.f32 %v1875_v37, %v482_v45  ;;  %v856_v49 = vmul.f32 %v1875_v37, %v522_v46 }
  0xa8   :  { %v1937_v20 = vadd.f32 %v1887_v42, %v871_v16 }
  0xa9   :  { %v908_v50 = vadd.f32 %v1887_v42, %v840_v47  ;;  %v1898_v51 = vadd.f32 %v1887_v42, %v856_v49 }
  0xab   :  { %v1520_v53 = vpack.c.bf16 %v908_v50, %v907_v44  ;;  %v1099_v54 = vadd.f32 %v908_v50, %v907_v44  ;;  %v1169_v55 = vmul.f32 %v908_v50, %v908_v50  ;;  %v1560_v56 = vpack.c.bf16 %v1898_v51, %v1893_v48 }
  0xad   :  { %1521 = vst [vmem:[%s2461_s4] sm:$0xff] %v1520_v53   ;;  %v1232_v57 = vadd.f32 %v1169_v55, %v1168_v52  ;;  %v562_v19 = vpop.f32.mrf.mxu2 }
  0xae   :  { %v485_v58 = vpop.f32.mrf.mxu0  ;;  %1684 = vst [vmem:[%s2461_s4 + $0x40] sm:$0xff] %v1560_v56   ;;  %v525_v59 = vpop.f32.mrf.mxu1  ;;  %v872_v21 = vmul.f32 %v1875_v37, %v562_v19 }
  0xaf   :  { %v841_v60 = vmul.f32 %v1875_v37, %v485_v58  ;;  %v857_v1 = vmul.f32 %v1875_v37, %v525_v59  ;;  %v600_v58 = vpop.f32.mrf.mxu3 }
  0xb0   :  { %v1944_v23 = vadd.f32 %v1887_v42, %v872_v21 }
  0xb1   :  { %v909_v61 = vadd.f32 %v1887_v42, %v841_v60  ;;  %v1916_v6 = vadd.f32 %v1887_v42, %v857_v1  ;;  %v887_v1 = vmul.f32 %v1875_v37, %v600_v58 }
  0xb2   :  { %v1600_v25 = vpack.c.bf16 %v1944_v23, %v1937_v20 }
  0xb3   :  { %v1100_v63 = vadd.f32 %v1099_v54, %v909_v61  ;;  %v1170_v0 = vmul.f32 %v909_v61, %v909_v61  ;;  %v2022_v8 = vadd.f32 %v1887_v42, %v887_v1 }
  0xb4   :  { %1692 = vst [vmem:[%s2461_s4 + $0x80] sm:$0xff] %v1600_v25  }
  0xb5   :  { %v1233_v2 = vadd.f32 %v1232_v57, %v1170_v0  ;;  %v565_v32 = vpop.f32.mrf.mxu2 }
  0xb6   :  { %v487_v3 = vpop.f32.mrf.mxu0  ;;  %v527_v4 = vpop.f32.mrf.mxu1  ;;  %v873_v39 = vmul.f32 %v1875_v37, %v565_v32 }
  0xb7   :  { %v842_v5 = vmul.f32 %v1875_v37, %v487_v3  ;;  %v858_v7 = vmul.f32 %v1875_v37, %v527_v4 }
  0xb8   :  { %v1979_v44 = vadd.f32 %v1887_v42, %v873_v39 }
  0xb9   :  { %v910_v9 = vadd.f32 %v1887_v42, %v842_v5  ;;  %v1921_v10 = vadd.f32 %v1887_v42, %v858_v7  ;;  %v602_v5 = vpop.f32.mrf.mxu3 }
  0xbb   :  { %v1525_v11 = vpack.c.bf16 %v910_v9, %v909_v61  ;;  %v1923_v12 = vadd.f32 %v1100_v63, %v910_v9  ;;  %v1171_v13 = vmul.f32 %v910_v9, %v910_v9  ;;  %v1565_v14 = vpack.c.bf16 %v1921_v10, %v1916_v6 }
  0xbd   :  { %1677 = vst [vmem:[%s2461_s4 + $0x8] sm:$0xff] %v1525_v11   ;;  %v1930_v15 = vadd.f32 %v1233_v2, %v1171_v13  ;;  %v567_v43 = vpop.f32.mrf.mxu2  ;;  %v888_v11 = vmul.f32 %v1875_v37, %v602_v5 }
  0xbe   :  { %v490_v17 = vpop.f32.mrf.mxu0  ;;  %1685 = vst [vmem:[%s2461_s4 + $0x48] sm:$0xff] %v1565_v14   ;;  %v530_v18 = vpop.f32.mrf.mxu1  ;;  %v874_v45 = vmul.f32 %v1875_v37, %v567_v43 }
  0xbf   :  { %v859_v24 = vmul.f32 %v1875_v37, %v530_v18  ;;  %v843_v26 = vmul.f32 %v1875_v37, %v490_v17  ;;  %v2030_v14 = vadd.f32 %v1887_v42, %v888_v11 }
  0xc0   :  { %v1983_v46 = vadd.f32 %v1887_v42, %v874_v45 }
  0xc1   :  { %v1955_v30 = vadd.f32 %v1887_v42, %v859_v24  ;;  %v1959_v33 = vadd.f32 %v1887_v42, %v843_v26  ;;  %v1640_v18 = vpack.c.bf16 %v2030_v14, %v2022_v8 }
  0xc2   :  { %v1605_v49 = vpack.c.bf16 %v1983_v46, %v1979_v44 }
  0xc3   :  { %1700 = vst [vmem:[%s2461_s4 + $0xc0] sm:$0xff] %v1640_v18  }
  0xc4   :  { %1693 = vst [vmem:[%s2461_s4 + $0x88] sm:$0xff] %v1605_v49  }
  0xc5   :  { %v570_v57 = vpop.f32.mrf.mxu2 }
  0xc6   :  { %v492_v27 = vpop.f32.mrf.mxu0  ;;  %v532_v28 = vpop.f32.mrf.mxu1  ;;  %v875_v0 = vmul.f32 %v1875_v37, %v570_v57 }
  0xc7   :  { %v844_v29 = vmul.f32 %v1875_v37, %v492_v27  ;;  %v860_v31 = vmul.f32 %v1875_v37, %v532_v28  ;;  %v605_v28 = vpop.f32.mrf.mxu3 }
  0xc8   :  { %v2019_v7 = vadd.f32 %v1887_v42, %v875_v0 }
  0xc9   :  { %v1962_v34 = vadd.f32 %v1887_v42, %v844_v29  ;;  %v1965_v35 = vadd.f32 %v1887_v42, %v860_v31 }
  0xcb   :  { %v1530_v36 = vpack.c.bf16 %v1962_v34, %v1959_v33  ;;  %v1570_v38 = vpack.c.bf16 %v1965_v35, %v1955_v30 }
  0xcd   :  { %1678 = vst [vmem:[%s2461_s4 + $0x10] sm:$0xff] %v1530_v36   ;;  %v572_v4 = vpop.f32.mrf.mxu2 }
  0xce   :  { %v495_v40 = vpop.f32.mrf.mxu0  ;;  %1686 = vst [vmem:[%s2461_s4 + $0x50] sm:$0xff] %v1570_v38   ;;  %v535_v41 = vpop.f32.mrf.mxu1  ;;  %v876_v9 = vmul.f32 %v1875_v37, %v572_v4 }
  0xcf   :  { %v861_v47 = vmul.f32 %v1875_v37, %v535_v41  ;;  %v845_v50 = vmul.f32 %v1875_v37, %v495_v40  ;;  %v889_v40 = vmul.f32 %v1875_v37, %v605_v28 }
  0xd0   :  { %v2027_v13 = vadd.f32 %v1887_v42, %v876_v9 }
  0xd1   :  { %v1994_v55 = vadd.f32 %v1887_v42, %v861_v47  ;;  %v1998_v59 = vadd.f32 %v1887_v42, %v845_v50  ;;  %v607_v47 = vpop.f32.mrf.mxu3  ;;  %v2074_v50 = vadd.f32 %v1887_v42, %v889_v40 }
  0xd2   :  { %v1610_v17 = vpack.c.bf16 %v2027_v13, %v2019_v7 }
  0xd4   :  { %1694 = vst [vmem:[%s2461_s4 + $0x90] sm:$0xff] %v1610_v17  }
  0xd5   :  { %v575_v27 = vpop.f32.mrf.mxu2 }
  0xd6   :  { %v497_v52 = vpop.f32.mrf.mxu0  ;;  %v537_v53 = vpop.f32.mrf.mxu1  ;;  %v877_v39 = vmul.f32 %v1875_v37, %v575_v27 }
  0xd7   :  { %v846_v54 = vmul.f32 %v1875_v37, %v497_v52  ;;  %v862_v56 = vmul.f32 %v1875_v37, %v537_v53  ;;  %v890_v53 = vmul.f32 %v1875_v37, %v607_v47 }
  0xd8   :  { %v2071_v49 = vadd.f32 %v1887_v42, %v877_v39 }
  0xd9   :  { %v2001_v60 = vadd.f32 %v1887_v42, %v846_v54  ;;  %v2004_v61 = vadd.f32 %v1887_v42, %v862_v56  ;;  %v2082_v56 = vadd.f32 %v1887_v42, %v890_v53  ;;  %v610_v9 = vpop.f32.mrf.mxu3 }
  0xdb   :  { %v1535_v62 = vpack.c.bf16 %v2001_v60, %v1998_v59  ;;  %v1575_v63 = vpack.c.bf16 %v2004_v61, %v1994_v55 }
  0xdd   :  { %1679 = vst [vmem:[%s2461_s4 + $0x18] sm:$0xff] %v1535_v62   ;;  %v577_v45 = vpop.f32.mrf.mxu2  ;;  %v1645_v62 = vpack.c.bf16 %v2082_v56, %v2074_v50 }
  0xde   :  { %v500_v2 = vpop.f32.mrf.mxu0  ;;  %1687 = vst [vmem:[%s2461_s4 + $0x58] sm:$0xff] %v1575_v63   ;;  %v540_v3 = vpop.f32.mrf.mxu1  ;;  %v878_v52 = vmul.f32 %v1875_v37, %v577_v45 }
  0xdf   :  { %v863_v16 = vmul.f32 %v1875_v37, %v540_v3  ;;  %v847_v19 = vmul.f32 %v1875_v37, %v500_v2  ;;  %1701 = vst [vmem:[%s2461_s4 + $0xc8] sm:$0xff] %v1645_v62  }
  0xe0   :  { %v2079_v54 = vadd.f32 %v1887_v42, %v878_v52  ;;  %v1102_v52 = vadd.f32 %v1923_v12, %v1959_v33 }
  0xe1   :  { %v2043_v25 = vadd.f32 %v1887_v42, %v863_v16  ;;  %v2050_v29 = vadd.f32 %v1887_v42, %v847_v19  ;;  %v612_v28 = vpop.f32.mrf.mxu3 }
  0xe2   :  { %v1615_v58 = vpack.c.bf16 %v2079_v54, %v2071_v49  ;;  %v892_v39 = vmul.f32 %v1875_v37, %v612_v28 }
  0xe4   :  { %1695 = vst [vmem:[%s2461_s4 + $0x98] sm:$0xff] %v1615_v58   ;;  %v2138_v47 = vadd.f32 %v1887_v42, %v892_v39  ;;  %v1174_v58 = vmul.f32 %v1998_v59, %v1998_v59 }
  0xe5   :  { %v580_v5 = vpop.f32.mrf.mxu2 }
  0xe6   :  { %v502_v21 = vpop.f32.mrf.mxu0  ;;  %v542_v22 = vpop.f32.mrf.mxu1 }
  0xe7   :  { %v848_v24 = vmul.f32 %v1875_v37, %v502_v21  ;;  %v864_v26 = vmul.f32 %v1875_v37, %v542_v22 }
  0xe9   :  { %v2053_v31 = vadd.f32 %v1887_v42, %v848_v24  ;;  %v2056_v32 = vadd.f32 %v1887_v42, %v864_v26  ;;  %v879_v24 = vmul.f32 %v1875_v37, %v580_v5  ;;  %v891_v26 = vmul.f32 %v1875_v37, %v610_v9 }
  0xeb   :  { %v1540_v36 = vpack.c.bf16 %v2053_v31, %v2050_v29  ;;  %v1580_v38 = vpack.c.bf16 %v2056_v32, %v2043_v25  ;;  %v2127_v40 = vadd.f32 %v1887_v42, %v879_v24 }
  0xed   :  { %1680 = vst [vmem:[%s2461_s4 + $0x20] sm:$0xff] %v1540_v36   ;;  %v582_v27 = vpop.f32.mrf.mxu2  ;;  %v1172_v36 = vmul.f32 %v1959_v33, %v1959_v33 }
  0xee   :  { %v505_v41 = vpop.f32.mrf.mxu0  ;;  %1688 = vst [vmem:[%s2461_s4 + $0x60] sm:$0xff] %v1580_v38   ;;  %v545_v43 = vpop.f32.mrf.mxu1  ;;  %v880_v38 = vmul.f32 %v1875_v37, %v582_v27 }
  0xef   :  { %v865_v57 = vmul.f32 %v1875_v37, %v545_v43  ;;  %v849_v63 = vmul.f32 %v1875_v37, %v505_v41  ;;  %v2130_v41 = vadd.f32 %v1887_v42, %v891_v26  ;;  %v1173_v43 = vmul.f32 %v1962_v34, %v1962_v34 }
  0xf0   :  { %v2135_v45 = vadd.f32 %v1887_v42, %v880_v38  ;;  %v1177_v38 = vmul.f32 %v2053_v31, %v2053_v31 }
  0xf1   :  { %v2095_v3 = vadd.f32 %v1887_v42, %v865_v57  ;;  %v2102_v11 = vadd.f32 %v1887_v42, %v849_v63  ;;  %v1235_v57 = vadd.f32 %v1930_v15, %v1172_v36  ;;  %v1650_v63 = vpack.c.bf16 %v2138_v47, %v2130_v41 }
  0xf2   :  { %v1620_v62 = vpack.c.bf16 %v2135_v45, %v2127_v40  ;;  %v1175_v15 = vmul.f32 %v2001_v60, %v2001_v60 }
  0xf3   :  { %1702 = vst [vmem:[%s2461_s4 + $0xd0] sm:$0xff] %v1650_v63  }
  0xf4   :  { %1696 = vst [vmem:[%s2461_s4 + $0xa0] sm:$0xff] %v1620_v62  }
  0xf6   :  { %v507_v0 = vpop.f32.mrf.mxu0  ;;  %v547_v1 = vpop.f32.mrf.mxu1 }
  0xf7   :  { %v850_v2 = vmul.f32 %v1875_v37, %v507_v0  ;;  %v866_v4 = vmul.f32 %v1875_v37, %v547_v1  ;;  %v1103_v1 = vadd.f32 %v1102_v52, %v1962_v34  ;;  %v585_v34 = vpop.f32.mrf.mxu2 }
  0xf9   :  { %v2105_v16 = vadd.f32 %v1887_v42, %v850_v2  ;;  %v2108_v17 = vadd.f32 %v1887_v42, %v866_v4  ;;  %v1236_v2 = vadd.f32 %v1235_v57, %v1173_v43 }
  0xfb   :  { %v1545_v18 = vpack.c.bf16 %v2105_v16, %v2102_v11  ;;  %v1585_v19 = vpack.c.bf16 %v2108_v17, %v2095_v3 }
  0xfd   :  { %1681 = vst [vmem:[%s2461_s4 + $0x28] sm:$0xff] %v1545_v18   ;;  %v615_v18 = vpop.f32.mrf.mxu3 }
  0xfe   :  { %v510_v21 = vpop.f32.mrf.mxu0  ;;  %1689 = vst [vmem:[%s2461_s4 + $0x68] sm:$0xff] %v1585_v19   ;;  %v550_v22 = vpop.f32.mrf.mxu1  ;;  %v1104_v19 = vadd.f32 %v1103_v1, %v1998_v59 }
  0xff   :  { %v867_v53 = vmul.f32 %v1875_v37, %v550_v22  ;;  %v851_v0 = vmul.f32 %v1875_v37, %v510_v21  ;;  %v1237_v21 = vadd.f32 %v1236_v2, %v1174_v58  ;;  %v1176_v22 = vmul.f32 %v2050_v29, %v2050_v29  ;;  %v587_v1 = vpop.f32.mrf.mxu2 }
 0x100   :  { %v1105_v28 = vadd.f32 %v1104_v19, %v2001_v60 }
 0x101   :  { %v2159_v5 = vadd.f32 %v1887_v42, %v867_v53  ;;  %v919_v24 = vadd.f32 %v1887_v42, %v851_v0  ;;  %v1238_v36 = vadd.f32 %v1237_v21, %v1175_v15  ;;  %v1178_v53 = vmul.f32 %v2102_v11, %v2102_v11 }
 0x102   :  { %v1106_v43 = vadd.f32 %v1105_v28, %v2050_v29  ;;  %v881_v29 = vmul.f32 %v1875_v37, %v585_v34  ;;  %v893_v0 = vmul.f32 %v1875_v37, %v615_v18 }
 0x103   :  { %v1239_v52 = vadd.f32 %v1238_v36, %v1176_v22  ;;  %v1180_v34 = vmul.f32 %v919_v24, %v919_v24 }
 0x104   :  { %v1107_v60 = vadd.f32 %v1106_v43, %v2053_v31  ;;  %v882_v31 = vmul.f32 %v1875_v37, %v587_v1  ;;  %v2200_v19 = vadd.f32 %v1887_v42, %v893_v0 }
 0x105   :  { %v1240_v62 = vadd.f32 %v1239_v52, %v1177_v38  ;;  %v617_v2 = vpop.f32.mrf.mxu3 }
 0x106   :  { %v512_v4 = vpop.f32.mrf.mxu0  ;;  %v552_v12 = vpop.f32.mrf.mxu1  ;;  %v1108_v15 = vadd.f32 %v1107_v60, %v2102_v11  ;;  %v2204_v21 = vadd.f32 %v1887_v42, %v882_v31 }
 0x107   :  { %v852_v33 = vmul.f32 %v1875_v37, %v512_v4  ;;  %v868_v9 = vmul.f32 %v1875_v37, %v552_v12  ;;  %v1179_v4 = vmul.f32 %v2105_v16, %v2105_v16  ;;  %v894_v12 = vmul.f32 %v1875_v37, %v617_v2 }
 0x108   :  { %v1109_v28 = vadd.f32 %v1108_v15, %v2105_v16 }
 0x109   :  { %v920_v26 = vadd.f32 %v1887_v42, %v852_v33  ;;  %v2171_v27 = vadd.f32 %v1887_v42, %v868_v9  ;;  %v1241_v33 = vadd.f32 %v1240_v62, %v1178_v53  ;;  %v2197_v9 = vadd.f32 %v1887_v42, %v881_v29 }
 0x10a   :  { %v2207_v22 = vadd.f32 %v1887_v42, %v894_v12  ;;  %v1110_v43 = vadd.f32 %v1109_v28, %v919_v24 }
 0x10b   :  { %v1550_v39 = vpack.c.bf16 %v920_v26, %v919_v24  ;;  %v1590_v59 = vpack.c.bf16 %v2171_v27, %v2159_v5  ;;  %v1242_v36 = vadd.f32 %v1241_v33, %v1179_v4  ;;  %v1181_v38 = vmul.f32 %v920_v26, %v920_v26  ;;  %v590_v24 = vpop.f32.mrf.mxu2 }
 0x10c   :  { %v1111_v16 = vadd.f32 %v1110_v43, %v920_v26 }
 0x10d   :  { %1682 = vst [vmem:[%s2461_s4 + $0x30] sm:$0xff] %v1550_v39   ;;  %v1625_v39 = vpack.c.bf16 %v2204_v21, %v2197_v9  ;;  %v1243_v52 = vadd.f32 %v1242_v36, %v1180_v34  ;;  %v620_v29 = vpop.f32.mrf.mxu3  ;;  %v1184_v34 = vmul.f32 %v1893_v48, %v1893_v48  ;;  %v1185_v36 = vmul.f32 %v1898_v51, %v1898_v51 }
 0x10e   :  { %v515_v57 = vpop.f32.mrf.mxu0  ;;  %1690 = vst [vmem:[%s2461_s4 + $0x70] sm:$0xff] %v1590_v59   ;;  %v555_v58 = vpop.f32.mrf.mxu1  ;;  %v1655_v59 = vpack.c.bf16 %v2207_v22, %v2200_v19 }
 0x10f   :  { %v853_v63 = vmul.f32 %v1875_v37, %v515_v57  ;;  %v869_v11 = vmul.f32 %v1875_v37, %v555_v58  ;;  %1697 = vst [vmem:[%s2461_s4 + $0xa8] sm:$0xff] %v1625_v39   ;;  %v1244_v0 = vadd.f32 %v1243_v52, %v1181_v38  ;;  %v883_v39 = vmul.f32 %v1875_v37, %v590_v24 }
 0x110   :  { %1703 = vst [vmem:[%s2461_s4 + $0xd8] sm:$0xff] %v1655_v59   ;;  %v895_v59 = vmul.f32 %v1875_v37, %v620_v29  ;;  %v1187_v29 = vmul.f32 %v1921_v10, %v1921_v10 }
 0x111   :  { %v921_v18 = vadd.f32 %v1887_v42, %v853_v63  ;;  %v2220_v62 = vadd.f32 %v1887_v42, %v869_v11 }
 0x113   :  { %v1182_v53 = vmul.f32 %v921_v18, %v921_v18  ;;  %v1112_v1 = vadd.f32 %v1111_v16, %v921_v18  ;;  %v592_v43 = vpop.f32.mrf.mxu2 }
 0x115   :  { %v1245_v26 = vadd.f32 %v1244_v0, %v1182_v53  ;;  %v622_v52 = vpop.f32.mrf.mxu3  ;;  %v884_v53 = vmul.f32 %v1875_v37, %v592_v43 }
 0x116   :  { %v517_v60 = vpop.f32.mrf.mxu0  ;;  %v557_v57 = vpop.f32.mrf.mxu1 }
 0x117   :  { %v854_v58 = vmul.f32 %v1875_v37, %v517_v60  ;;  %v870_v63 = vmul.f32 %v1875_v37, %v557_v57  ;;  %v896_v60 = vmul.f32 %v1875_v37, %v622_v52  ;;  %v1193_v52 = vmul.f32 %v2056_v32, %v2056_v32 }
 0x119   :  { %v922_v2 = vadd.f32 %v1887_v42, %v854_v58  ;;  %v2228_v4 = vadd.f32 %v1887_v42, %v870_v63  ;;  %v2252_v58 = vadd.f32 %v1887_v42, %v883_v39  ;;  %v2258_v63 = vadd.f32 %v1887_v42, %v884_v53 }
 0x11a   :  { %v2261_v24 = vadd.f32 %v1887_v42, %v896_v60 }
 0x11b   :  { %v1555_v31 = vpack.c.bf16 %v922_v2, %v921_v18  ;;  %v1113_v12 = vadd.f32 %v1112_v1, %v922_v2  ;;  %v1183_v15 = vmul.f32 %v922_v2, %v922_v2  ;;  %v1595_v33 = vpack.c.bf16 %v2228_v4, %v2220_v62 }
 0x11d   :  { %1683 = vst [vmem:[%s2461_s4 + $0x38] sm:$0xff] %v1555_v31   ;;  %v1114_v28 = vadd.f32 %v1113_v12, %v1893_v48  ;;  %v1246_v11 = vadd.f32 %v1245_v26, %v1183_v15  ;;  %v1186_v48 = vmul.f32 %v1916_v6, %v1916_v6  ;;  %v1188_v26 = vmul.f32 %v1955_v30, %v1955_v30 }
 0x11e   :  { %1691 = vst [vmem:[%s2461_s4 + $0x78] sm:$0xff] %v1595_v33  }
 0x11f   :  { %v1115_v18 = vadd.f32 %v1114_v28, %v1898_v51  ;;  %v1247_v38 = vadd.f32 %v1246_v11, %v1184_v34  ;;  %v2255_v51 = vadd.f32 %v1887_v42, %v895_v59  ;;  %v595_v34 = vpop.f32.mrf.mxu2  ;;  %v625_v28 = vpop.f32.mrf.mxu3 }
 0x120   :  { %v897_v60 = vmul.f32 %v1875_v37, %v625_v28 }
 0x121   :  { %v1116_v57 = vadd.f32 %v1115_v18, %v1916_v6  ;;  %v1248_v16 = vadd.f32 %v1247_v38, %v1185_v36  ;;  %v1630_v6 = vpack.c.bf16 %v2258_v63, %v2252_v58  ;;  %v1660_v2 = vpack.c.bf16 %v2261_v24, %v2255_v51 }
 0x122   :  { %v1191_v18 = vmul.f32 %v2004_v61, %v2004_v61 }
 0x123   :  { %v1117_v0 = vadd.f32 %v1116_v57, %v1921_v10  ;;  %v1249_v1 = vadd.f32 %v1248_v16, %v1186_v48  ;;  %1698 = vst [vmem:[%s2461_s4 + $0xb0] sm:$0xff] %v1630_v6   ;;  %v1189_v10 = vmul.f32 %v1965_v35, %v1965_v35 }
 0x124   :  { %1704 = vst [vmem:[%s2461_s4 + $0xe0] sm:$0xff] %v1660_v2  }
 0x125   :  { %v1118_v31 = vadd.f32 %v1117_v0, %v1955_v30  ;;  %v1250_v12 = vadd.f32 %v1249_v1, %v1187_v29  ;;  %v1190_v30 = vmul.f32 %v1994_v55, %v1994_v55 }
 0x127   :  { %v1119_v15 = vadd.f32 %v1118_v31, %v1965_v35  ;;  %v1251_v33 = vadd.f32 %v1250_v12, %v1188_v26  ;;  %v1192_v35 = vmul.f32 %v2043_v25, %v2043_v25  ;;  %v597_v57 = vpop.f32.mrf.mxu2  ;;  %v627_v16 = vpop.f32.mrf.mxu3  ;;  %v1195_v31 = vmul.f32 %v2108_v17, %v2108_v17 }
 0x128   :  { %v886_v29 = vmul.f32 %v1875_v37, %v597_v57 }
 0x129   :  { %v1252_v11 = vadd.f32 %v1251_v33, %v1189_v10  ;;  %v1120_v36 = vadd.f32 %v1119_v15, %v1994_v55  ;;  %v885_v55 = vmul.f32 %v1875_v37, %v595_v34  ;;  %v1196_v34 = vmul.f32 %v2159_v5, %v2159_v5 }
 0x12a   :  { %v2308_v2 = vadd.f32 %v1887_v42, %v886_v29 }
 0x12b   :  { %v1121_v38 = vadd.f32 %v1120_v36, %v2004_v61  ;;  %v1253_v39 = vadd.f32 %v1252_v11, %v1190_v30  ;;  %v1194_v61 = vmul.f32 %v2095_v3, %v2095_v3  ;;  %v2302_v6 = vadd.f32 %v1887_v42, %v885_v55 }
 0x12c   :  { %v1197_v11 = vmul.f32 %v2171_v27, %v2171_v27 }
 0x12d   :  { %v1122_v59 = vadd.f32 %v1121_v38, %v2043_v25  ;;  %v1254_v43 = vadd.f32 %v1253_v39, %v1191_v18  ;;  %v898_v25 = vmul.f32 %v1875_v37, %v627_v16 }
 0x12f   :  { %v1123_v48 = vadd.f32 %v1122_v59, %v2056_v32  ;;  %v1255_v53 = vadd.f32 %v1254_v43, %v1192_v35  ;;  %v2305_v32 = vadd.f32 %v1887_v42, %v897_v60  ;;  %v2311_v26 = vadd.f32 %v1887_v42, %v898_v25  ;;  %v630_v36 = vpop.f32.mrf.mxu3 }
 0x130   :  { %v1199_v59 = vmul.f32 %v2228_v4, %v2228_v4 }
 0x131   :  { %v1124_v0 = vadd.f32 %v1123_v48, %v2095_v3  ;;  %v1256_v1 = vadd.f32 %v1255_v53, %v1193_v52  ;;  %v1635_v3 = vpack.c.bf16 %v2308_v2, %v2302_v6  ;;  %v1665_v15 = vpack.c.bf16 %v2311_v26, %v2305_v32 }
 0x132   :  { %v1201_v48 = vmul.f32 %v1944_v23, %v1944_v23 }
 0x133   :  { %v1125_v12 = vadd.f32 %v1124_v0, %v2108_v17  ;;  %v1257_v10 = vadd.f32 %v1256_v1, %v1194_v61  ;;  %1699 = vst [vmem:[%s2461_s4 + $0xb8] sm:$0xff] %v1635_v3  }
 0x134   :  { %1705 = vst [vmem:[%s2461_s4 + $0xe8] sm:$0xff] %v1665_v15  }
 0x135   :  { %v1126_v33 = vadd.f32 %v1125_v12, %v2159_v5  ;;  %v1258_v28 = vadd.f32 %v1257_v10, %v1195_v31  ;;  %v1198_v5 = vmul.f32 %v2220_v62, %v2220_v62  ;;  %v1204_v31 = vmul.f32 %v2019_v7, %v2019_v7 }
 0x136   :  { %v1205_v10 = vmul.f32 %v2027_v13, %v2027_v13 }
 0x137   :  { %v1259_v30 = vadd.f32 %v1258_v28, %v1196_v34  ;;  %v1127_v17 = vadd.f32 %v1126_v33, %v2171_v27  ;;  %v1200_v27 = vmul.f32 %v1937_v20, %v1937_v20  ;;  %v632_v60 = vpop.f32.mrf.mxu3  ;;  %v1206_v33 = vmul.f32 %v2071_v49, %v2071_v49 }
 0x138   :  { %v900_v57 = vmul.f32 %v1875_v37, %v632_v60  ;;  %v1213_v60 = vmul.f32 %v2258_v63, %v2258_v63 }
 0x139   :  { %v1260_v18 = vadd.f32 %v1259_v30, %v1197_v11  ;;  %v1128_v38 = vadd.f32 %v1127_v17, %v2220_v62  ;;  %v899_v62 = vmul.f32 %v1875_v37, %v630_v36  ;;  %v1208_v11 = vmul.f32 %v2127_v40, %v2127_v40 }
 0x13a   :  { %v2353_v29 = vadd.f32 %v1887_v42, %v900_v57 }
 0x13b   :  { %v1261_v39 = vadd.f32 %v1260_v18, %v1198_v5  ;;  %v1129_v35 = vadd.f32 %v1128_v38, %v2228_v4  ;;  %v1202_v4 = vmul.f32 %v1979_v44, %v1979_v44 }
 0x13d   :  { %v1130_v43 = vadd.f32 %v1129_v35, %v1937_v20  ;;  %v1262_v52 = vadd.f32 %v1261_v39, %v1199_v59  ;;  %v2350_v20 = vadd.f32 %v1887_v42, %v899_v62 }
 0x13f   :  { %v1131_v53 = vadd.f32 %v1130_v43, %v1944_v23  ;;  %v1263_v55 = vadd.f32 %v1262_v52, %v1200_v27  ;;  %v1203_v23 = vmul.f32 %v1983_v46, %v1983_v46  ;;  %v1670_v1 = vpack.c.bf16 %v2353_v29, %v2350_v20  ;;  %v635_v15 = vpop.f32.mrf.mxu3 }
 0x141   :  { %v1132_v16 = vadd.f32 %v1131_v53, %v1979_v44  ;;  %v1264_v61 = vadd.f32 %v1263_v55, %v1201_v48  ;;  %1706 = vst [vmem:[%s2461_s4 + $0xf0] sm:$0xff] %v1670_v1  }
 0x143   :  { %v1133_v25 = vadd.f32 %v1132_v16, %v1983_v46  ;;  %v1265_v0 = vadd.f32 %v1264_v61, %v1202_v4  ;;  %v1214_v4 = vmul.f32 %v2302_v6, %v2302_v6 }
 0x145   :  { %v1134_v44 = vadd.f32 %v1133_v25, %v2019_v7  ;;  %v1266_v12 = vadd.f32 %v1265_v0, %v1203_v23  ;;  %v1207_v7 = vmul.f32 %v2079_v54, %v2079_v54  ;;  %v1216_v23 = vmul.f32 %v2022_v8, %v2022_v8 }
 0x147   :  { %v1267_v3 = vadd.f32 %v1266_v12, %v1204_v31  ;;  %v1135_v46 = vadd.f32 %v1134_v44, %v2027_v13  ;;  %v1209_v13 = vmul.f32 %v2135_v45, %v2135_v45  ;;  %v637_v39 = vpop.f32.mrf.mxu3 }
 0x148   :  { %v902_v35 = vmul.f32 %v1875_v37, %v637_v39 }
 0x149   :  { %v1136_v34 = vadd.f32 %v1135_v46, %v2071_v49  ;;  %v1268_v28 = vadd.f32 %v1267_v3, %v1205_v10  ;;  %v901_v49 = vmul.f32 %v1875_v37, %v635_v15 }
 0x14a   :  { %v2388_v43 = vadd.f32 %v1887_v42, %v902_v35 }
 0x14b   :  { %v1137_v30 = vadd.f32 %v1136_v34, %v2079_v54  ;;  %v1269_v17 = vadd.f32 %v1268_v28, %v1206_v33  ;;  %v1210_v54 = vmul.f32 %v2197_v9, %v2197_v9 }
 0x14d   :  { %v1138_v36 = vadd.f32 %v1137_v30, %v2127_v40  ;;  %v1270_v18 = vadd.f32 %v1269_v17, %v1207_v7  ;;  %v969_v40 = vadd.f32 %v1887_v42, %v901_v49  ;;  %v1227_v49 = vmul.f32 %v2311_v26, %v2311_v26 }
 0x14f   :  { %v1139_v38 = vadd.f32 %v1138_v36, %v2135_v45  ;;  %v1271_v5 = vadd.f32 %v1270_v18, %v1208_v11  ;;  %v1211_v45 = vmul.f32 %v2204_v21, %v2204_v21  ;;  %v1675_v53 = vpack.c.bf16 %v2388_v43, %v969_v40 }
 0x151   :  { %v1140_v59 = vadd.f32 %v1139_v38, %v2197_v9  ;;  %v1272_v27 = vadd.f32 %v1271_v5, %v1209_v13  ;;  %v1212_v9 = vmul.f32 %v2252_v58, %v2252_v58  ;;  %1707 = vst [vmem:[%s2461_s4 + $0xf8] sm:$0xff] %v1675_v53  }
 0x153   :  { %v1141_v52 = vadd.f32 %v1140_v59, %v2204_v21  ;;  %v1273_v48 = vadd.f32 %v1272_v27, %v1210_v54  ;;  %v1228_v54 = vmul.f32 %v2350_v20, %v2350_v20  ;;  %v1229_v27 = vmul.f32 %v2353_v29, %v2353_v29 }
 0x155   :  { %v1274_v37 = vadd.f32 %v1273_v48, %v1211_v45  ;;  %v1142_v55 = vadd.f32 %v1141_v52, %v2252_v58  ;;  %v1215_v58 = vmul.f32 %v2308_v2, %v2308_v2  ;;  %v1230_v45 = vmul.f32 %v969_v40, %v969_v40 }
 0x157   :  { %v1275_v42 = vadd.f32 %v1274_v37, %v1212_v9  ;;  %v1143_v62 = vadd.f32 %v1142_v55, %v2258_v63  ;;  %v1217_v63 = vmul.f32 %v2030_v14, %v2030_v14 }
 0x159   :  { %v1276_v21 = vadd.f32 %v1275_v42, %v1213_v60  ;;  %v1144_v57 = vadd.f32 %v1143_v62, %v2302_v6  ;;  %v1218_v6 = vmul.f32 %v2074_v50, %v2074_v50 }
 0x15b   :  { %v1277_v16 = vadd.f32 %v1276_v21, %v1214_v4  ;;  %v1145_v61 = vadd.f32 %v1144_v57, %v2308_v2  ;;  %v1219_v2 = vmul.f32 %v2082_v56, %v2082_v56 }
 0x15d   :  { %v1146_v25 = vadd.f32 %v1145_v61, %v2022_v8  ;;  %v1278_v0 = vadd.f32 %v1277_v16, %v1215_v58  ;;  %v1220_v8 = vmul.f32 %v2130_v41, %v2130_v41 }
 0x15f   :  { %v1147_v1 = vadd.f32 %v1146_v25, %v2030_v14  ;;  %v1279_v31 = vadd.f32 %v1278_v0, %v1216_v23  ;;  %v1221_v14 = vmul.f32 %v2138_v47, %v2138_v47 }
 0x161   :  { %v1148_v44 = vadd.f32 %v1147_v1, %v2074_v50  ;;  %v1280_v12 = vadd.f32 %v1279_v31, %v1217_v63  ;;  %v1222_v50 = vmul.f32 %v2200_v19, %v2200_v19 }
 0x163   :  { %v1149_v10 = vadd.f32 %v1148_v44, %v2082_v56  ;;  %v1281_v3 = vadd.f32 %v1280_v12, %v1218_v6  ;;  %v1223_v56 = vmul.f32 %v2207_v22, %v2207_v22 }
 0x165   :  { %v1150_v46 = vadd.f32 %v1149_v10, %v2130_v41  ;;  %v1282_v15 = vadd.f32 %v1281_v3, %v1219_v2  ;;  %v1224_v41 = vmul.f32 %v2255_v51, %v2255_v51 }
 0x167   :  { %v1283_v33 = vadd.f32 %v1282_v15, %v1220_v8  ;;  %v1151_v34 = vadd.f32 %v1150_v46, %v2138_v47  ;;  %v1225_v47 = vmul.f32 %v2261_v24, %v2261_v24 }
 0x169   :  { %v1152_v28 = vadd.f32 %v1151_v34, %v2200_v19  ;;  %v1284_v7 = vadd.f32 %v1283_v33, %v1221_v14  ;;  %v1226_v19 = vmul.f32 %v2305_v32, %v2305_v32 }
 0x16b   :  { %v1153_v30 = vadd.f32 %v1152_v28, %v2207_v22  ;;  %v1285_v17 = vadd.f32 %v1284_v7, %v1222_v50 }
 0x16d   :  { %v1154_v11 = vadd.f32 %v1153_v30, %v2255_v51  ;;  %v1286_v36 = vadd.f32 %v1285_v17, %v1223_v56 }
 0x16f   :  { %v1155_v18 = vadd.f32 %v1154_v11, %v2261_v24  ;;  %v1287_v13 = vadd.f32 %v1286_v36, %v1224_v41 }
 0x171   :  { %v1156_v38 = vadd.f32 %v1155_v18, %v2305_v32  ;;  %v1288_v5 = vadd.f32 %v1287_v13, %v1225_v47 }
 0x173   :  { %v1157_v22 = vadd.f32 %v1156_v38, %v2311_v26  ;;  %v1289_v39 = vadd.f32 %v1288_v5, %v1226_v19  ;;  %v1231_v26 = vmul.f32 %v2388_v43, %v2388_v43 }
 0x175   :  { %v1290_v51 = vadd.f32 %v1289_v39, %v1227_v49  ;;  %v1158_v35 = vadd.f32 %v1157_v22, %v2350_v20  ;;  %v1301_v20 = vlaneseq }
 0x177   :  { %v1291_v24 = vadd.f32 %v1290_v51, %v1228_v54  ;;  %v1159_v59 = vadd.f32 %v1158_v35, %v2353_v29  ;;  %v1302_v4 = vshrl.u32 %v1301_v20, 7 }
 0x179   :  { %v1292_v32 = vadd.f32 %v1291_v24, %v1229_v27  ;;  %v1160_v52 = vadd.f32 %v1159_v59, %v969_v40  ;;  %vm1303_vm0 = vcmp.eq.s32.totalorder %v1302_v4, 0  ;;  %vm1305_vm1 = vcmp.eq.s32.totalorder %v1302_v4, 1 }
 0x17b   :  { %v1293_v48 = vadd.f32 %v1292_v32, %v1230_v45  ;;  %v1161_v53 = vadd.f32 %v1160_v52, %v2388_v43 }
 0x17d   :  { %v1162_v37 = vrot.slane %v1161_v53, 4  ;;  %v1294_v55 = vadd.f32 %v1293_v48, %v1231_v26 }
 0x17f   :  { %v1163_v9 = vadd.f32 %v1162_v37, %v1161_v53  ;;  %v1295_v42 = vrot.slane %v1294_v55, 4 }
 0x181   :  { %v1164_v62 = vrot.slane %v1163_v9, 2  ;;  %v1296_v60 = vadd.f32 %v1295_v42, %v1294_v55 }
 0x183   :  { %v1165_v21 = vadd.f32 %v1164_v62, %v1163_v9  ;;  %v1297_v57 = vrot.slane %v1296_v60, 2 }
 0x185   :  { %v1166_v29 = vrot.slane %v1165_v21, 1  ;;  %v1298_v16 = vadd.f32 %v1297_v57, %v1296_v60 }
 0x187   :  { %v1167_v61 = vadd.f32 %v1166_v29, %v1165_v21  ;;  %v1299_v40 = vrot.slane %v1298_v16, 1 }
 0x189   :  { %v1300_v58 = vadd.f32 %v1299_v40, %v1298_v16  ;;  %v1304_v23 = vsel %vm1303_vm0, %v1167_v61, 0.0 }
 0x18b   :  { %v1306_v25 = vsel %vm1305_vm1, %v1300_v58, 0.0 }
 0x18c   :  { %v1307_v43 = vadd.f32 %v1306_v25, %v1304_v23 }
 0x18e   :  { %1308 = vst [vmem:[%s2462_s5] sm:$0xff] %v1307_v43 }

// kernel: discriminator_forward.4
= control target key start
LH: loop header
LB: loop body
LE: loop exit
PB: predicated region body
PF: predicated region fallthrough
CT: control target
= control target key end

     0   :  { %vm1438_vm0 = vcmask 130048   ;;  %s8074_s1 = inlined_call_operand.vmem [shape: bf16[16,128], index: 1, kind: input, shape index: {}]   ;;  %s8075_s0 = inlined_call_operand.vmem [shape: bf16[2048,16], index: 0, kind: input, shape index: {}]   ;;  %s8076_s2 = inlined_call_operand.vmem [shape: f32[1,128], index: 2, kind: input, shape index: {}]   ;;  %s8077_s3 = inlined_call_operand.vmem [shape: f32[1,128], index: 3, kind: input, shape index: {}]   ;;  %s8078_s4 = inlined_call_operand.vmem [shape: bf16[2048,128], index: 4, kind: output, shape index: {}]  }
   0x1   :  { %v5819_v0 = vld [vmem:[%s8074_s1] sm:$0xff]  ;;  %v5692_v5 = vld [vmem:[%s8075_s0 + $0x8] sm:$0xff]  ;;  %v5693_v9 = vld [vmem:[%s8075_s0 + $0x10] sm:$0xff] }
   0x2   :  { %v5691_v1 = vld [vmem:[%s8075_s0] sm:$0xff]  ;;  %1830 = vmatpush.bf16.msra.mxu0 %v5819_v0  ;;  %6587 = vmatpush.bf16.msra.mxu1 %v5819_v0  ;;  %v5724_v6 = vld [vmem:[%s8075_s0 + $0x108] sm:$0xff]  ;;  %v5725_v10 = vld [vmem:[%s8075_s0 + $0x110] sm:$0xff] }
   0x3   :  { %v5723_v2 = vld [vmem:[%s8075_s0 + $0x100] sm:$0xff]  ;;  %6588 = vmatpush.bf16.msra.mxu2 %v5819_v0  ;;  %6589 = vmatpush.bf16.msra.mxu3 %v5819_v0  ;;  %v5756_v7 = vld [vmem:[%s8075_s0 + $0x208] sm:$0xff]  ;;  %v5757_v11 = vld [vmem:[%s8075_s0 + $0x210] sm:$0xff] }
   0x4   :  { %v5755_v3 = vld [vmem:[%s8075_s0 + $0x200] sm:$0xff]  ;;  %v5788_v8 = vld [vmem:[%s8075_s0 + $0x308] sm:$0xff]  ;;  %v5789_v12 = vld [vmem:[%s8075_s0 + $0x310] sm:$0xff] }
   0x5   :  { %v5787_v4 = vld [vmem:[%s8075_s0 + $0x300] sm:$0xff]  ;;  %5563 = vmatmul.msk.bf16.vlgmr.msra.gmra.mxu0 %vm1438_vm0, %v5691_v1  ;;  %5595 = vmatmul.msk.bf16.vlgmr.msra.gmra.mxu1 %vm1438_vm0, %v5723_v2  ;;  %v5694_v13 = vld [vmem:[%s8075_s0 + $0x18] sm:$0xff]  ;;  %v5696_v21 = vld [vmem:[%s8075_s0 + $0x28] sm:$0xff] }
   0x6   :  { %5627 = vmatmul.msk.bf16.vlgmr.msra.gmra.mxu2 %vm1438_vm0, %v5755_v3  ;;  %5659 = vmatmul.msk.bf16.vlgmr.msra.gmra.mxu3 %vm1438_vm0, %v5787_v4  ;;  %v5726_v14 = vld [vmem:[%s8075_s0 + $0x118] sm:$0xff]  ;;  %v5695_v17 = vld [vmem:[%s8075_s0 + $0x20] sm:$0xff]  ;;  %v5728_v22 = vld [vmem:[%s8075_s0 + $0x128] sm:$0xff] }
   0x7   :  { %v5758_v15 = vld [vmem:[%s8075_s0 + $0x218] sm:$0xff]  ;;  %v5727_v18 = vld [vmem:[%s8075_s0 + $0x120] sm:$0xff]  ;;  %v5760_v23 = vld [vmem:[%s8075_s0 + $0x228] sm:$0xff] }
   0x8   :  { %v5790_v16 = vld [vmem:[%s8075_s0 + $0x318] sm:$0xff]  ;;  %v5759_v19 = vld [vmem:[%s8075_s0 + $0x220] sm:$0xff]  ;;  %v5792_v24 = vld [vmem:[%s8075_s0 + $0x328] sm:$0xff] }
   0x9   :  { %v5791_v20 = vld [vmem:[%s8075_s0 + $0x320] sm:$0xff]  ;;  %v5697_v25 = vld [vmem:[%s8075_s0 + $0x30] sm:$0xff]  ;;  %v5698_v29 = vld [vmem:[%s8075_s0 + $0x38] sm:$0xff] }
   0xa   :  { %v5729_v26 = vld [vmem:[%s8075_s0 + $0x130] sm:$0xff]  ;;  %v5730_v30 = vld [vmem:[%s8075_s0 + $0x138] sm:$0xff]  ;;  %v6757_v33 = vld [vmem:[%s8076_s2] ss:$0 sm:$0xff] }
   0xb   :  { %v5761_v27 = vld [vmem:[%s8075_s0 + $0x230] sm:$0xff]  ;;  %v5762_v31 = vld [vmem:[%s8075_s0 + $0x238] sm:$0xff]  ;;  %v5699_v34 = vld [vmem:[%s8075_s0 + $0x40] sm:$0xff] }
   0xc   :  { %v5793_v28 = vld [vmem:[%s8075_s0 + $0x330] sm:$0xff]  ;;  %v5794_v32 = vld [vmem:[%s8075_s0 + $0x338] sm:$0xff]  ;;  %v5731_v35 = vld [vmem:[%s8075_s0 + $0x140] sm:$0xff] }
   0xd   :  { %v5763_v38 = vld [vmem:[%s8075_s0 + $0x240] sm:$0xff]  ;;  %v5700_v3 = vld [vmem:[%s8075_s0 + $0x48] sm:$0xff] }
   0xe   :  { %v5795_v39 = vld [vmem:[%s8075_s0 + $0x340] sm:$0xff]  ;;  %v5732_v4 = vld [vmem:[%s8075_s0 + $0x148] sm:$0xff] }
   0xf   :  { %v6775_v41 = vld [vmem:[%s8077_s3] ss:$0 sm:$0xff] }
  0x15   :  { %5564 = vmatmul.msk.bf16.gmra.mxu0 %vm1438_vm0, %v5692_v5  ;;  %5596 = vmatmul.msk.bf16.gmra.mxu1 %vm1438_vm0, %v5724_v6 }
  0x16   :  { %5628 = vmatmul.msk.bf16.gmra.mxu2 %vm1438_vm0, %v5756_v7  ;;  %5660 = vmatmul.msk.bf16.gmra.mxu3 %vm1438_vm0, %v5788_v8 }
  0x25   :  { %5565 = vmatmul.msk.bf16.gmra.mxu0 %vm1438_vm0, %v5693_v9  ;;  %5597 = vmatmul.msk.bf16.gmra.mxu1 %vm1438_vm0, %v5725_v10 }
  0x26   :  { %5629 = vmatmul.msk.bf16.gmra.mxu2 %vm1438_vm0, %v5757_v11  ;;  %5661 = vmatmul.msk.bf16.gmra.mxu3 %vm1438_vm0, %v5789_v12  ;;  %v5764_v11 = vld [vmem:[%s8075_s0 + $0x248] sm:$0xff] }
  0x27   :  { %v5796_v12 = vld [vmem:[%s8075_s0 + $0x348] sm:$0xff] }
  0x35   :  { %5566 = vmatmul.msk.bf16.gmra.mxu0 %vm1438_vm0, %v5694_v13  ;;  %5598 = vmatmul.msk.bf16.gmra.mxu1 %vm1438_vm0, %v5726_v14 }
  0x36   :  { %5630 = vmatmul.msk.bf16.gmra.mxu2 %vm1438_vm0, %v5758_v15  ;;  %5662 = vmatmul.msk.bf16.gmra.mxu3 %vm1438_vm0, %v5790_v16 }
  0x45   :  { %5567 = vmatmul.msk.bf16.gmra.mxu0 %vm1438_vm0, %v5695_v17  ;;  %5599 = vmatmul.msk.bf16.gmra.mxu1 %vm1438_vm0, %v5727_v18 }
  0x46   :  { %5631 = vmatmul.msk.bf16.gmra.mxu2 %vm1438_vm0, %v5759_v19  ;;  %5663 = vmatmul.msk.bf16.gmra.mxu3 %vm1438_vm0, %v5791_v20 }
  0x55   :  { %5568 = vmatmul.msk.bf16.gmra.mxu0 %vm1438_vm0, %v5696_v21  ;;  %5600 = vmatmul.msk.bf16.gmra.mxu1 %vm1438_vm0, %v5728_v22 }
  0x56   :  { %5632 = vmatmul.msk.bf16.gmra.mxu2 %vm1438_vm0, %v5760_v23  ;;  %5664 = vmatmul.msk.bf16.gmra.mxu3 %vm1438_vm0, %v5792_v24 }
  0x65   :  { %5569 = vmatmul.msk.bf16.gmra.mxu0 %vm1438_vm0, %v5697_v25  ;;  %5601 = vmatmul.msk.bf16.gmra.mxu1 %vm1438_vm0, %v5729_v26 }
  0x66   :  { %5633 = vmatmul.msk.bf16.gmra.mxu2 %vm1438_vm0, %v5761_v27  ;;  %5665 = vmatmul.msk.bf16.gmra.mxu3 %vm1438_vm0, %v5793_v28 }
  0x75   :  { %5570 = vmatmul.msk.bf16.gmra.mxu0 %vm1438_vm0, %v5698_v29  ;;  %5602 = vmatmul.msk.bf16.gmra.mxu1 %vm1438_vm0, %v5730_v30 }
  0x76   :  { %5634 = vmatmul.msk.bf16.gmra.mxu2 %vm1438_vm0, %v5762_v31  ;;  %5666 = vmatmul.msk.bf16.gmra.mxu3 %vm1438_vm0, %v5794_v32 }
  0x82   :  { %v1832_v36 = vpop.f32.mrf.mxu0  ;;  %v1992_v37 = vpop.f32.mrf.mxu1 }
  0x83   :  { %v3247_v40 = vmul.f32 %v6757_v33, %v1832_v36  ;;  %v3311_v42 = vmul.f32 %v6757_v33, %v1992_v37 }
  0x85   :  { %5571 = vmatmul.msk.bf16.gmra.mxu0 %vm1438_vm0, %v5699_v34  ;;  %5603 = vmatmul.msk.bf16.gmra.mxu1 %vm1438_vm0, %v5731_v35  ;;  %v3507_v43 = vadd.f32 %v6775_v41, %v3247_v40  ;;  %v3571_v44 = vadd.f32 %v6775_v41, %v3311_v42 }
  0x86   :  { %5635 = vmatmul.msk.bf16.gmra.mxu2 %vm1438_vm0, %v5763_v38  ;;  %5667 = vmatmul.msk.bf16.gmra.mxu3 %vm1438_vm0, %v5795_v39 }
  0x87   :  { %v4019_v53 = vmul.f32 0.2, %v3507_v43  ;;  %v4083_v54 = vmul.f32 0.2, %v3571_v44  ;;  %vm3763_vm1 = vcmp.gt.f32.partialorder %v3507_v43, 0.0  ;;  %vm3827_vm2 = vcmp.gt.f32.partialorder %v3571_v44, 0.0 }
  0x89   :  { %v2152_v45 = vpop.f32.mrf.mxu2  ;;  %v2312_v46 = vpop.f32.mrf.mxu3  ;;  %v4275_v61 = vsel %vm3763_vm1, %v3507_v43, %v4019_v53  ;;  %v4339_v62 = vsel %vm3827_vm2, %v3571_v44, %v4083_v54  ;;  %v5701_v53 = vld [vmem:[%s8075_s0 + $0x50] sm:$0xff] }
  0x8a   :  { %v1834_v47 = vpop.f32.mrf.mxu0  ;;  %v1994_v48 = vpop.f32.mrf.mxu1  ;;  %v3375_v51 = vmul.f32 %v6757_v33, %v2152_v45  ;;  %v3439_v52 = vmul.f32 %v6757_v33, %v2312_v46  ;;  %v5733_v54 = vld [vmem:[%s8075_s0 + $0x150] sm:$0xff] }
  0x8b   :  { %v3248_v49 = vmul.f32 %v6757_v33, %v1834_v47  ;;  %v3312_v50 = vmul.f32 %v6757_v33, %v1994_v48 }
  0x8c   :  { %v3635_v59 = vadd.f32 %v6775_v41, %v3375_v51  ;;  %v3699_v60 = vadd.f32 %v6775_v41, %v3439_v52 }
  0x8d   :  { %v3508_v55 = vadd.f32 %v6775_v41, %v3248_v49  ;;  %v3572_v56 = vadd.f32 %v6775_v41, %v3312_v50 }
  0x8e   :  { %v4147_v13 = vmul.f32 0.2, %v3635_v59  ;;  %v4211_v14 = vmul.f32 0.2, %v3699_v60  ;;  %vm3891_vm5 = vcmp.gt.f32.partialorder %v3635_v59, 0.0  ;;  %vm3955_vm6 = vcmp.gt.f32.partialorder %v3699_v60, 0.0 }
  0x8f   :  { %vm3764_vm3 = vcmp.gt.f32.partialorder %v3508_v55, 0.0  ;;  %v4020_v57 = vmul.f32 0.2, %v3508_v55  ;;  %vm3828_vm4 = vcmp.gt.f32.partialorder %v3572_v56, 0.0  ;;  %v4084_v58 = vmul.f32 0.2, %v3572_v56 }
  0x90   :  { %v4403_v21 = vsel %vm3891_vm5, %v3635_v59, %v4147_v13  ;;  %v4467_v22 = vsel %vm3955_vm6, %v3699_v60, %v4211_v14 }
  0x91   :  { %v4276_v63 = vsel %vm3764_vm3, %v3508_v55, %v4020_v57  ;;  %v4340_v0 = vsel %vm3828_vm4, %v3572_v56, %v4084_v58  ;;  %v2154_v1 = vpop.f32.mrf.mxu2  ;;  %v2314_v2 = vpop.f32.mrf.mxu3 }
  0x92   :  { %v5823_v5 = vpack.c.bf16 %v4276_v63, %v4275_v61  ;;  %v5983_v6 = vpack.c.bf16 %v4340_v0, %v4339_v62  ;;  %v3376_v7 = vmul.f32 %v6757_v33, %v2154_v1  ;;  %v3440_v8 = vmul.f32 %v6757_v33, %v2314_v2  ;;  %v1837_v9 = vpop.f32.mrf.mxu0  ;;  %v1997_v10 = vpop.f32.mrf.mxu1  ;;  %v5765_v61 = vld [vmem:[%s8075_s0 + $0x250] sm:$0xff] }
  0x93   :  { %v3249_v17 = vmul.f32 %v6757_v33, %v1837_v9  ;;  %v3313_v18 = vmul.f32 %v6757_v33, %v1997_v10  ;;  %v5797_v62 = vld [vmem:[%s8075_s0 + $0x350] sm:$0xff] }
  0x94   :  { %5824 = vst [vmem:[%s8078_s4] sm:$0xff] %v5823_v5   ;;  %v3636_v15 = vadd.f32 %v6775_v41, %v3376_v7  ;;  %v3700_v16 = vadd.f32 %v6775_v41, %v3440_v8 }
  0x95   :  { %6491 = vst [vmem:[%s8078_s4 + $0x100] sm:$0xff] %v5983_v6   ;;  %5572 = vmatmul.msk.bf16.gmra.mxu0 %vm1438_vm0, %v5700_v3  ;;  %5604 = vmatmul.msk.bf16.gmra.mxu1 %vm1438_vm0, %v5732_v4  ;;  %v3509_v27 = vadd.f32 %v6775_v41, %v3249_v17  ;;  %v3573_v28 = vadd.f32 %v6775_v41, %v3313_v18 }
  0x96   :  { %vm3892_vm7 = vcmp.gt.f32.partialorder %v3636_v15, 0.0  ;;  %v4148_v19 = vmul.f32 0.2, %v3636_v15  ;;  %vm3956_vm8 = vcmp.gt.f32.partialorder %v3700_v16, 0.0  ;;  %v4212_v20 = vmul.f32 0.2, %v3700_v16  ;;  %5636 = vmatmul.msk.bf16.gmra.mxu2 %vm1438_vm0, %v5764_v11  ;;  %5668 = vmatmul.msk.bf16.gmra.mxu3 %vm1438_vm0, %v5796_v12 }
  0x97   :  { %v4021_v38 = vmul.f32 0.2, %v3509_v27  ;;  %v4085_v39 = vmul.f32 0.2, %v3573_v28  ;;  %vm3765_vm9 = vcmp.gt.f32.partialorder %v3509_v27, 0.0  ;;  %vm3829_vm10 = vcmp.gt.f32.partialorder %v3573_v28, 0.0 }
  0x98   :  { %v4404_v23 = vsel %vm3892_vm7, %v3636_v15, %v4148_v19  ;;  %v4468_v24 = vsel %vm3956_vm8, %v3700_v16, %v4212_v20 }
  0x99   :  { %v6143_v25 = vpack.c.bf16 %v4404_v23, %v4403_v21  ;;  %v6303_v26 = vpack.c.bf16 %v4468_v24, %v4467_v22  ;;  %v2157_v29 = vpop.f32.mrf.mxu2  ;;  %v2317_v30 = vpop.f32.mrf.mxu3  ;;  %v4277_v47 = vsel %vm3765_vm9, %v3509_v27, %v4021_v38  ;;  %v4341_v48 = vsel %vm3829_vm10, %v3573_v28, %v4085_v39  ;;  %v5702_v38 = vld [vmem:[%s8075_s0 + $0x58] sm:$0xff] }
  0x9a   :  { %v1839_v31 = vpop.f32.mrf.mxu0  ;;  %v1999_v32 = vpop.f32.mrf.mxu1  ;;  %v3377_v36 = vmul.f32 %v6757_v33, %v2157_v29  ;;  %v3441_v37 = vmul.f32 %v6757_v33, %v2317_v30  ;;  %v5734_v39 = vld [vmem:[%s8075_s0 + $0x158] sm:$0xff] }
  0x9b   :  { %6523 = vst [vmem:[%s8078_s4 + $0x200] sm:$0xff] %v6143_v25   ;;  %v3250_v34 = vmul.f32 %v6757_v33, %v1839_v31  ;;  %v3314_v35 = vmul.f32 %v6757_v33, %v1999_v32 }
  0x9c   :  { %6555 = vst [vmem:[%s8078_s4 + $0x300] sm:$0xff] %v6303_v26   ;;  %v3637_v45 = vadd.f32 %v6775_v41, %v3377_v36  ;;  %v3701_v46 = vadd.f32 %v6775_v41, %v3441_v37 }
  0x9d   :  { %v3510_v40 = vadd.f32 %v6775_v41, %v3250_v34  ;;  %v3574_v42 = vadd.f32 %v6775_v41, %v3314_v35 }
  0x9e   :  { %v4149_v63 = vmul.f32 0.2, %v3637_v45  ;;  %v4213_v0 = vmul.f32 0.2, %v3701_v46  ;;  %vm3893_vm13 = vcmp.gt.f32.partialorder %v3637_v45, 0.0  ;;  %vm3957_vm14 = vcmp.gt.f32.partialorder %v3701_v46, 0.0 }
  0x9f   :  { %vm3766_vm11 = vcmp.gt.f32.partialorder %v3510_v40, 0.0  ;;  %v4022_v43 = vmul.f32 0.2, %v3510_v40  ;;  %vm3830_vm12 = vcmp.gt.f32.partialorder %v3574_v42, 0.0  ;;  %v4086_v44 = vmul.f32 0.2, %v3574_v42 }
  0xa0   :  { %v4405_v7 = vsel %vm3893_vm13, %v3637_v45, %v4149_v63  ;;  %v4469_v8 = vsel %vm3957_vm14, %v3701_v46, %v4213_v0 }
  0xa1   :  { %v4278_v49 = vsel %vm3766_vm11, %v3510_v40, %v4022_v43  ;;  %v4342_v50 = vsel %vm3830_vm12, %v3574_v42, %v4086_v44  ;;  %v2159_v51 = vpop.f32.mrf.mxu2  ;;  %v2319_v52 = vpop.f32.mrf.mxu3 }
  0xa2   :  { %v5828_v55 = vpack.c.bf16 %v4278_v49, %v4277_v47  ;;  %v5988_v56 = vpack.c.bf16 %v4342_v50, %v4341_v48  ;;  %v3378_v57 = vmul.f32 %v6757_v33, %v2159_v51  ;;  %v3442_v58 = vmul.f32 %v6757_v33, %v2319_v52  ;;  %v1842_v59 = vpop.f32.mrf.mxu0  ;;  %v2002_v60 = vpop.f32.mrf.mxu1  ;;  %v5766_v47 = vld [vmem:[%s8075_s0 + $0x258] sm:$0xff] }
  0xa3   :  { %v3251_v3 = vmul.f32 %v6757_v33, %v1842_v59  ;;  %v3315_v4 = vmul.f32 %v6757_v33, %v2002_v60  ;;  %v5798_v48 = vld [vmem:[%s8075_s0 + $0x358] sm:$0xff] }
  0xa4   :  { %6460 = vst [vmem:[%s8078_s4 + $0x8] sm:$0xff] %v5828_v55   ;;  %v3638_v1 = vadd.f32 %v6775_v41, %v3378_v57  ;;  %v3702_v2 = vadd.f32 %v6775_v41, %v3442_v58 }
  0xa5   :  { %6492 = vst [vmem:[%s8078_s4 + $0x108] sm:$0xff] %v5988_v56   ;;  %5573 = vmatmul.msk.bf16.gmra.mxu0 %vm1438_vm0, %v5701_v53  ;;  %5605 = vmatmul.msk.bf16.gmra.mxu1 %vm1438_vm0, %v5733_v54  ;;  %v3511_v13 = vadd.f32 %v6775_v41, %v3251_v3  ;;  %v3575_v14 = vadd.f32 %v6775_v41, %v3315_v4 }
  0xa6   :  { %vm3894_vm15 = vcmp.gt.f32.partialorder %v3638_v1, 0.0  ;;  %v4150_v5 = vmul.f32 0.2, %v3638_v1  ;;  %vm3958_vm1 = vcmp.gt.f32.partialorder %v3702_v2, 0.0  ;;  %v4214_v6 = vmul.f32 0.2, %v3702_v2  ;;  %5637 = vmatmul.msk.bf16.gmra.mxu2 %vm1438_vm0, %v5765_v61  ;;  %5669 = vmatmul.msk.bf16.gmra.mxu3 %vm1438_vm0, %v5797_v62 }
  0xa7   :  { %v4023_v23 = vmul.f32 0.2, %v3511_v13  ;;  %v4087_v24 = vmul.f32 0.2, %v3575_v14  ;;  %vm3767_vm2 = vcmp.gt.f32.partialorder %v3511_v13, 0.0  ;;  %vm3831_vm3 = vcmp.gt.f32.partialorder %v3575_v14, 0.0 }
  0xa8   :  { %v4406_v9 = vsel %vm3894_vm15, %v3638_v1, %v4150_v5  ;;  %v4470_v10 = vsel %vm3958_vm1, %v3702_v2, %v4214_v6 }
  0xa9   :  { %v6148_v11 = vpack.c.bf16 %v4406_v9, %v4405_v7  ;;  %v6308_v12 = vpack.c.bf16 %v4470_v10, %v4469_v8  ;;  %v2162_v15 = vpop.f32.mrf.mxu2  ;;  %v2322_v16 = vpop.f32.mrf.mxu3  ;;  %v4279_v31 = vsel %vm3767_vm2, %v3511_v13, %v4023_v23  ;;  %v4343_v32 = vsel %vm3831_vm3, %v3575_v14, %v4087_v24  ;;  %v5703_v23 = vld [vmem:[%s8075_s0 + $0x60] sm:$0xff] }
  0xaa   :  { %v1844_v17 = vpop.f32.mrf.mxu0  ;;  %v2004_v18 = vpop.f32.mrf.mxu1  ;;  %v3379_v21 = vmul.f32 %v6757_v33, %v2162_v15  ;;  %v3443_v22 = vmul.f32 %v6757_v33, %v2322_v16  ;;  %v5735_v24 = vld [vmem:[%s8075_s0 + $0x160] sm:$0xff] }
  0xab   :  { %6524 = vst [vmem:[%s8078_s4 + $0x208] sm:$0xff] %v6148_v11   ;;  %v3252_v19 = vmul.f32 %v6757_v33, %v1844_v17  ;;  %v3316_v20 = vmul.f32 %v6757_v33, %v2004_v18 }
  0xac   :  { %6556 = vst [vmem:[%s8078_s4 + $0x308] sm:$0xff] %v6308_v12   ;;  %v3639_v29 = vadd.f32 %v6775_v41, %v3379_v21  ;;  %v3703_v30 = vadd.f32 %v6775_v41, %v3443_v22 }
  0xad   :  { %v3512_v25 = vadd.f32 %v6775_v41, %v3252_v19  ;;  %v3576_v26 = vadd.f32 %v6775_v41, %v3316_v20 }
  0xae   :  { %v4151_v49 = vmul.f32 0.2, %v3639_v29  ;;  %v4215_v50 = vmul.f32 0.2, %v3703_v30  ;;  %vm3895_vm6 = vcmp.gt.f32.partialorder %v3639_v29, 0.0  ;;  %vm3959_vm7 = vcmp.gt.f32.partialorder %v3703_v30, 0.0 }
  0xaf   :  { %vm3768_vm4 = vcmp.gt.f32.partialorder %v3512_v25, 0.0  ;;  %v4024_v27 = vmul.f32 0.2, %v3512_v25  ;;  %vm3832_vm5 = vcmp.gt.f32.partialorder %v3576_v26, 0.0  ;;  %v4088_v28 = vmul.f32 0.2, %v3576_v26 }
  0xb0   :  { %v4407_v57 = vsel %vm3895_vm6, %v3639_v29, %v4151_v49  ;;  %v4471_v58 = vsel %vm3959_vm7, %v3703_v30, %v4215_v50 }
  0xb1   :  { %v4280_v34 = vsel %vm3768_vm4, %v3512_v25, %v4024_v27  ;;  %v4344_v35 = vsel %vm3832_vm5, %v3576_v26, %v4088_v28  ;;  %v2164_v36 = vpop.f32.mrf.mxu2  ;;  %v2324_v37 = vpop.f32.mrf.mxu3 }
  0xb2   :  { %v5833_v40 = vpack.c.bf16 %v4280_v34, %v4279_v31  ;;  %v5993_v42 = vpack.c.bf16 %v4344_v35, %v4343_v32  ;;  %v3380_v43 = vmul.f32 %v6757_v33, %v2164_v36  ;;  %v3444_v44 = vmul.f32 %v6757_v33, %v2324_v37  ;;  %v1847_v45 = vpop.f32.mrf.mxu0  ;;  %v2007_v46 = vpop.f32.mrf.mxu1  ;;  %v5767_v31 = vld [vmem:[%s8075_s0 + $0x260] sm:$0xff] }
  0xb3   :  { %v3253_v53 = vmul.f32 %v6757_v33, %v1847_v45  ;;  %v3317_v54 = vmul.f32 %v6757_v33, %v2007_v46  ;;  %v5799_v32 = vld [vmem:[%s8075_s0 + $0x360] sm:$0xff] }
  0xb4   :  { %6461 = vst [vmem:[%s8078_s4 + $0x10] sm:$0xff] %v5833_v40   ;;  %v3640_v51 = vadd.f32 %v6775_v41, %v3380_v43  ;;  %v3704_v52 = vadd.f32 %v6775_v41, %v3444_v44 }
  0xb5   :  { %6493 = vst [vmem:[%s8078_s4 + $0x110] sm:$0xff] %v5993_v42   ;;  %5574 = vmatmul.msk.bf16.gmra.mxu0 %vm1438_vm0, %v5702_v38  ;;  %5606 = vmatmul.msk.bf16.gmra.mxu1 %vm1438_vm0, %v5734_v39  ;;  %v3513_v63 = vadd.f32 %v6775_v41, %v3253_v53  ;;  %v3577_v0 = vadd.f32 %v6775_v41, %v3317_v54 }
  0xb6   :  { %vm3896_vm8 = vcmp.gt.f32.partialorder %v3640_v51, 0.0  ;;  %v4152_v55 = vmul.f32 0.2, %v3640_v51  ;;  %vm3960_vm9 = vcmp.gt.f32.partialorder %v3704_v52, 0.0  ;;  %v4216_v56 = vmul.f32 0.2, %v3704_v52  ;;  %5638 = vmatmul.msk.bf16.gmra.mxu2 %vm1438_vm0, %v5766_v47  ;;  %5670 = vmatmul.msk.bf16.gmra.mxu3 %vm1438_vm0, %v5798_v48 }
  0xb7   :  { %v4025_v9 = vmul.f32 0.2, %v3513_v63  ;;  %v4089_v10 = vmul.f32 0.2, %v3577_v0  ;;  %vm3769_vm10 = vcmp.gt.f32.partialorder %v3513_v63, 0.0  ;;  %vm3833_vm11 = vcmp.gt.f32.partialorder %v3577_v0, 0.0 }
  0xb8   :  { %v4408_v59 = vsel %vm3896_vm8, %v3640_v51, %v4152_v55  ;;  %v4472_v60 = vsel %vm3960_vm9, %v3704_v52, %v4216_v56 }
  0xb9   :  { %v6153_v61 = vpack.c.bf16 %v4408_v59, %v4407_v57  ;;  %v6313_v62 = vpack.c.bf16 %v4472_v60, %v4471_v58  ;;  %v2167_v1 = vpop.f32.mrf.mxu2  ;;  %v2327_v2 = vpop.f32.mrf.mxu3  ;;  %v4281_v17 = vsel %vm3769_vm10, %v3513_v63, %v4025_v9  ;;  %v4345_v18 = vsel %vm3833_vm11, %v3577_v0, %v4089_v10  ;;  %v5704_v9 = vld [vmem:[%s8075_s0 + $0x68] sm:$0xff] }
  0xba   :  { %v1849_v3 = vpop.f32.mrf.mxu0  ;;  %v2009_v4 = vpop.f32.mrf.mxu1  ;;  %v3381_v7 = vmul.f32 %v6757_v33, %v2167_v1  ;;  %v3445_v8 = vmul.f32 %v6757_v33, %v2327_v2  ;;  %v5736_v10 = vld [vmem:[%s8075_s0 + $0x168] sm:$0xff] }
  0xbb   :  { %6525 = vst [vmem:[%s8078_s4 + $0x210] sm:$0xff] %v6153_v61   ;;  %v3254_v5 = vmul.f32 %v6757_v33, %v1849_v3  ;;  %v3318_v6 = vmul.f32 %v6757_v33, %v2009_v4 }
  0xbc   :  { %6557 = vst [vmem:[%s8078_s4 + $0x310] sm:$0xff] %v6313_v62   ;;  %v3641_v15 = vadd.f32 %v6775_v41, %v3381_v7  ;;  %v3705_v16 = vadd.f32 %v6775_v41, %v3445_v8 }
  0xbd   :  { %v3514_v11 = vadd.f32 %v6775_v41, %v3254_v5  ;;  %v3578_v12 = vadd.f32 %v6775_v41, %v3318_v6 }
  0xbe   :  { %v4153_v34 = vmul.f32 0.2, %v3641_v15  ;;  %v4217_v35 = vmul.f32 0.2, %v3705_v16  ;;  %vm3897_vm14 = vcmp.gt.f32.partialorder %v3641_v15, 0.0  ;;  %vm3961_vm15 = vcmp.gt.f32.partialorder %v3705_v16, 0.0 }
  0xbf   :  { %vm3770_vm12 = vcmp.gt.f32.partialorder %v3514_v11, 0.0  ;;  %v4026_v13 = vmul.f32 0.2, %v3514_v11  ;;  %vm3834_vm13 = vcmp.gt.f32.partialorder %v3578_v12, 0.0  ;;  %v4090_v14 = vmul.f32 0.2, %v3578_v12 }
  0xc0   :  { %v4409_v43 = vsel %vm3897_vm14, %v3641_v15, %v4153_v34  ;;  %v4473_v44 = vsel %vm3961_vm15, %v3705_v16, %v4217_v35 }
  0xc1   :  { %v4282_v19 = vsel %vm3770_vm12, %v3514_v11, %v4026_v13  ;;  %v4346_v20 = vsel %vm3834_vm13, %v3578_v12, %v4090_v14  ;;  %v2169_v21 = vpop.f32.mrf.mxu2  ;;  %v2329_v22 = vpop.f32.mrf.mxu3 }
  0xc2   :  { %v5838_v25 = vpack.c.bf16 %v4282_v19, %v4281_v17  ;;  %v5998_v26 = vpack.c.bf16 %v4346_v20, %v4345_v18  ;;  %v3382_v27 = vmul.f32 %v6757_v33, %v2169_v21  ;;  %v3446_v28 = vmul.f32 %v6757_v33, %v2329_v22  ;;  %v1852_v29 = vpop.f32.mrf.mxu0  ;;  %v2012_v30 = vpop.f32.mrf.mxu1  ;;  %v5768_v17 = vld [vmem:[%s8075_s0 + $0x268] sm:$0xff] }
  0xc3   :  { %v3255_v38 = vmul.f32 %v6757_v33, %v1852_v29  ;;  %v3319_v39 = vmul.f32 %v6757_v33, %v2012_v30  ;;  %v5800_v18 = vld [vmem:[%s8075_s0 + $0x368] sm:$0xff] }
  0xc4   :  { %6462 = vst [vmem:[%s8078_s4 + $0x18] sm:$0xff] %v5838_v25   ;;  %v3642_v36 = vadd.f32 %v6775_v41, %v3382_v27  ;;  %v3706_v37 = vadd.f32 %v6775_v41, %v3446_v28 }
  0xc5   :  { %6494 = vst [vmem:[%s8078_s4 + $0x118] sm:$0xff] %v5998_v26   ;;  %5575 = vmatmul.msk.bf16.gmra.mxu0 %vm1438_vm0, %v5703_v23  ;;  %5607 = vmatmul.msk.bf16.gmra.mxu1 %vm1438_vm0, %v5735_v24  ;;  %v3515_v49 = vadd.f32 %v6775_v41, %v3255_v38  ;;  %v3579_v50 = vadd.f32 %v6775_v41, %v3319_v39 }
  0xc6   :  { %vm3898_vm1 = vcmp.gt.f32.partialorder %v3642_v36, 0.0  ;;  %v4154_v40 = vmul.f32 0.2, %v3642_v36  ;;  %vm3962_vm2 = vcmp.gt.f32.partialorder %v3706_v37, 0.0  ;;  %v4218_v42 = vmul.f32 0.2, %v3706_v37  ;;  %5639 = vmatmul.msk.bf16.gmra.mxu2 %vm1438_vm0, %v5767_v31  ;;  %5671 = vmatmul.msk.bf16.gmra.mxu3 %vm1438_vm0, %v5799_v32 }
  0xc7   :  { %v4027_v59 = vmul.f32 0.2, %v3515_v49  ;;  %v4091_v60 = vmul.f32 0.2, %v3579_v50  ;;  %vm3771_vm3 = vcmp.gt.f32.partialorder %v3515_v49, 0.0  ;;  %vm3835_vm4 = vcmp.gt.f32.partialorder %v3579_v50, 0.0 }
  0xc8   :  { %v4410_v45 = vsel %vm3898_vm1, %v3642_v36, %v4154_v40  ;;  %v4474_v46 = vsel %vm3962_vm2, %v3706_v37, %v4218_v42 }
  0xc9   :  { %v6158_v47 = vpack.c.bf16 %v4410_v45, %v4409_v43  ;;  %v6318_v48 = vpack.c.bf16 %v4474_v46, %v4473_v44  ;;  %v2172_v51 = vpop.f32.mrf.mxu2  ;;  %v2332_v52 = vpop.f32.mrf.mxu3  ;;  %v4283_v3 = vsel %vm3771_vm3, %v3515_v49, %v4027_v59  ;;  %v4347_v4 = vsel %vm3835_vm4, %v3579_v50, %v4091_v60  ;;  %v5705_v59 = vld [vmem:[%s8075_s0 + $0x70] sm:$0xff] }
  0xca   :  { %v1854_v53 = vpop.f32.mrf.mxu0  ;;  %v2014_v54 = vpop.f32.mrf.mxu1  ;;  %v3383_v57 = vmul.f32 %v6757_v33, %v2172_v51  ;;  %v3447_v58 = vmul.f32 %v6757_v33, %v2332_v52  ;;  %v5737_v60 = vld [vmem:[%s8075_s0 + $0x170] sm:$0xff] }
  0xcb   :  { %6526 = vst [vmem:[%s8078_s4 + $0x218] sm:$0xff] %v6158_v47   ;;  %v3256_v55 = vmul.f32 %v6757_v33, %v1854_v53  ;;  %v3320_v56 = vmul.f32 %v6757_v33, %v2014_v54 }
  0xcc   :  { %6558 = vst [vmem:[%s8078_s4 + $0x318] sm:$0xff] %v6318_v48   ;;  %v3643_v1 = vadd.f32 %v6775_v41, %v3383_v57  ;;  %v3707_v2 = vadd.f32 %v6775_v41, %v3447_v58 }
  0xcd   :  { %v3516_v61 = vadd.f32 %v6775_v41, %v3256_v55  ;;  %v3580_v62 = vadd.f32 %v6775_v41, %v3320_v56 }
  0xce   :  { %v4155_v19 = vmul.f32 0.2, %v3643_v1  ;;  %v4219_v20 = vmul.f32 0.2, %v3707_v2  ;;  %vm3899_vm7 = vcmp.gt.f32.partialorder %v3643_v1, 0.0  ;;  %vm3963_vm8 = vcmp.gt.f32.partialorder %v3707_v2, 0.0 }
  0xcf   :  { %vm3772_vm5 = vcmp.gt.f32.partialorder %v3516_v61, 0.0  ;;  %v4028_v63 = vmul.f32 0.2, %v3516_v61  ;;  %vm3836_vm6 = vcmp.gt.f32.partialorder %v3580_v62, 0.0  ;;  %v4092_v0 = vmul.f32 0.2, %v3580_v62 }
  0xd0   :  { %v4411_v27 = vsel %vm3899_vm7, %v3643_v1, %v4155_v19  ;;  %v4475_v28 = vsel %vm3963_vm8, %v3707_v2, %v4219_v20 }
  0xd1   :  { %v4284_v5 = vsel %vm3772_vm5, %v3516_v61, %v4028_v63  ;;  %v4348_v6 = vsel %vm3836_vm6, %v3580_v62, %v4092_v0  ;;  %v2174_v7 = vpop.f32.mrf.mxu2  ;;  %v2334_v8 = vpop.f32.mrf.mxu3 }
  0xd2   :  { %v5843_v11 = vpack.c.bf16 %v4284_v5, %v4283_v3  ;;  %v6003_v12 = vpack.c.bf16 %v4348_v6, %v4347_v4  ;;  %v3384_v13 = vmul.f32 %v6757_v33, %v2174_v7  ;;  %v3448_v14 = vmul.f32 %v6757_v33, %v2334_v8  ;;  %v1857_v15 = vpop.f32.mrf.mxu0  ;;  %v2017_v16 = vpop.f32.mrf.mxu1  ;;  %v5769_v3 = vld [vmem:[%s8075_s0 + $0x270] sm:$0xff] }
  0xd3   :  { %v3257_v23 = vmul.f32 %v6757_v33, %v1857_v15  ;;  %v3321_v24 = vmul.f32 %v6757_v33, %v2017_v16  ;;  %v5801_v4 = vld [vmem:[%s8075_s0 + $0x370] sm:$0xff] }
  0xd4   :  { %6463 = vst [vmem:[%s8078_s4 + $0x20] sm:$0xff] %v5843_v11   ;;  %v3644_v21 = vadd.f32 %v6775_v41, %v3384_v13  ;;  %v3708_v22 = vadd.f32 %v6775_v41, %v3448_v14 }
  0xd5   :  { %6495 = vst [vmem:[%s8078_s4 + $0x120] sm:$0xff] %v6003_v12   ;;  %5576 = vmatmul.msk.bf16.gmra.mxu0 %vm1438_vm0, %v5704_v9  ;;  %5608 = vmatmul.msk.bf16.gmra.mxu1 %vm1438_vm0, %v5736_v10  ;;  %v3517_v34 = vadd.f32 %v6775_v41, %v3257_v23  ;;  %v3581_v35 = vadd.f32 %v6775_v41, %v3321_v24 }
  0xd6   :  { %vm3900_vm9 = vcmp.gt.f32.partialorder %v3644_v21, 0.0  ;;  %v4156_v25 = vmul.f32 0.2, %v3644_v21  ;;  %vm3964_vm10 = vcmp.gt.f32.partialorder %v3708_v22, 0.0  ;;  %v4220_v26 = vmul.f32 0.2, %v3708_v22  ;;  %5640 = vmatmul.msk.bf16.gmra.mxu2 %vm1438_vm0, %v5768_v17  ;;  %5672 = vmatmul.msk.bf16.gmra.mxu3 %vm1438_vm0, %v5800_v18 }
  0xd7   :  { %v4029_v45 = vmul.f32 0.2, %v3517_v34  ;;  %v4093_v46 = vmul.f32 0.2, %v3581_v35  ;;  %vm3773_vm11 = vcmp.gt.f32.partialorder %v3517_v34, 0.0  ;;  %vm3837_vm12 = vcmp.gt.f32.partialorder %v3581_v35, 0.0 }
  0xd8   :  { %v4412_v29 = vsel %vm3900_vm9, %v3644_v21, %v4156_v25  ;;  %v4476_v30 = vsel %vm3964_vm10, %v3708_v22, %v4220_v26 }
  0xd9   :  { %v6163_v31 = vpack.c.bf16 %v4412_v29, %v4411_v27  ;;  %v6323_v32 = vpack.c.bf16 %v4476_v30, %v4475_v28  ;;  %v2177_v36 = vpop.f32.mrf.mxu2  ;;  %v2337_v37 = vpop.f32.mrf.mxu3  ;;  %v4285_v53 = vsel %vm3773_vm11, %v3517_v34, %v4029_v45  ;;  %v4349_v54 = vsel %vm3837_vm12, %v3581_v35, %v4093_v46  ;;  %v5706_v45 = vld [vmem:[%s8075_s0 + $0x78] sm:$0xff] }
  0xda   :  { %v1859_v38 = vpop.f32.mrf.mxu0  ;;  %v2019_v39 = vpop.f32.mrf.mxu1  ;;  %v3385_v43 = vmul.f32 %v6757_v33, %v2177_v36  ;;  %v3449_v44 = vmul.f32 %v6757_v33, %v2337_v37  ;;  %v5738_v46 = vld [vmem:[%s8075_s0 + $0x178] sm:$0xff] }
  0xdb   :  { %6527 = vst [vmem:[%s8078_s4 + $0x220] sm:$0xff] %v6163_v31   ;;  %v3258_v40 = vmul.f32 %v6757_v33, %v1859_v38  ;;  %v3322_v42 = vmul.f32 %v6757_v33, %v2019_v39 }
  0xdc   :  { %6559 = vst [vmem:[%s8078_s4 + $0x320] sm:$0xff] %v6323_v32   ;;  %v3645_v51 = vadd.f32 %v6775_v41, %v3385_v43  ;;  %v3709_v52 = vadd.f32 %v6775_v41, %v3449_v44 }
  0xdd   :  { %v3518_v47 = vadd.f32 %v6775_v41, %v3258_v40  ;;  %v3582_v48 = vadd.f32 %v6775_v41, %v3322_v42 }
  0xde   :  { %v4157_v5 = vmul.f32 0.2, %v3645_v51  ;;  %v4221_v6 = vmul.f32 0.2, %v3709_v52  ;;  %vm3901_vm15 = vcmp.gt.f32.partialorder %v3645_v51, 0.0  ;;  %vm3965_vm1 = vcmp.gt.f32.partialorder %v3709_v52, 0.0 }
  0xdf   :  { %vm3774_vm13 = vcmp.gt.f32.partialorder %v3518_v47, 0.0  ;;  %v4030_v49 = vmul.f32 0.2, %v3518_v47  ;;  %vm3838_vm14 = vcmp.gt.f32.partialorder %v3582_v48, 0.0  ;;  %v4094_v50 = vmul.f32 0.2, %v3582_v48 }
  0xe0   :  { %v4413_v13 = vsel %vm3901_vm15, %v3645_v51, %v4157_v5  ;;  %v4477_v14 = vsel %vm3965_vm1, %v3709_v52, %v4221_v6 }
  0xe1   :  { %v4286_v55 = vsel %vm3774_vm13, %v3518_v47, %v4030_v49  ;;  %v4350_v56 = vsel %vm3838_vm14, %v3582_v48, %v4094_v50  ;;  %v2179_v57 = vpop.f32.mrf.mxu2  ;;  %v2339_v58 = vpop.f32.mrf.mxu3 }
  0xe2   :  { %v5848_v61 = vpack.c.bf16 %v4286_v55, %v4285_v53  ;;  %v6008_v62 = vpack.c.bf16 %v4350_v56, %v4349_v54  ;;  %v3386_v63 = vmul.f32 %v6757_v33, %v2179_v57  ;;  %v3450_v0 = vmul.f32 %v6757_v33, %v2339_v58  ;;  %v1862_v1 = vpop.f32.mrf.mxu0  ;;  %v2022_v2 = vpop.f32.mrf.mxu1  ;;  %v5770_v53 = vld [vmem:[%s8075_s0 + $0x278] sm:$0xff] }
  0xe3   :  { %v3259_v9 = vmul.f32 %v6757_v33, %v1862_v1  ;;  %v3323_v10 = vmul.f32 %v6757_v33, %v2022_v2  ;;  %v5802_v54 = vld [vmem:[%s8075_s0 + $0x378] sm:$0xff] }
  0xe4   :  { %6464 = vst [vmem:[%s8078_s4 + $0x28] sm:$0xff] %v5848_v61   ;;  %v3646_v7 = vadd.f32 %v6775_v41, %v3386_v63  ;;  %v3710_v8 = vadd.f32 %v6775_v41, %v3450_v0 }
  0xe5   :  { %6496 = vst [vmem:[%s8078_s4 + $0x128] sm:$0xff] %v6008_v62   ;;  %5577 = vmatmul.msk.bf16.gmra.mxu0 %vm1438_vm0, %v5705_v59  ;;  %5609 = vmatmul.msk.bf16.gmra.mxu1 %vm1438_vm0, %v5737_v60  ;;  %v3519_v19 = vadd.f32 %v6775_v41, %v3259_v9  ;;  %v3583_v20 = vadd.f32 %v6775_v41, %v3323_v10 }
  0xe6   :  { %vm3902_vm2 = vcmp.gt.f32.partialorder %v3646_v7, 0.0  ;;  %v4158_v11 = vmul.f32 0.2, %v3646_v7  ;;  %vm3966_vm3 = vcmp.gt.f32.partialorder %v3710_v8, 0.0  ;;  %v4222_v12 = vmul.f32 0.2, %v3710_v8  ;;  %5641 = vmatmul.msk.bf16.gmra.mxu2 %vm1438_vm0, %v5769_v3  ;;  %5673 = vmatmul.msk.bf16.gmra.mxu3 %vm1438_vm0, %v5801_v4 }
  0xe7   :  { %v4031_v29 = vmul.f32 0.2, %v3519_v19  ;;  %v4095_v30 = vmul.f32 0.2, %v3583_v20  ;;  %vm3775_vm4 = vcmp.gt.f32.partialorder %v3519_v19, 0.0  ;;  %vm3839_vm5 = vcmp.gt.f32.partialorder %v3583_v20, 0.0 }
  0xe8   :  { %v4414_v15 = vsel %vm3902_vm2, %v3646_v7, %v4158_v11  ;;  %v4478_v16 = vsel %vm3966_vm3, %v3710_v8, %v4222_v12 }
  0xe9   :  { %v6168_v17 = vpack.c.bf16 %v4414_v15, %v4413_v13  ;;  %v6328_v18 = vpack.c.bf16 %v4478_v16, %v4477_v14  ;;  %v2182_v21 = vpop.f32.mrf.mxu2  ;;  %v2342_v22 = vpop.f32.mrf.mxu3  ;;  %v4287_v38 = vsel %vm3775_vm4, %v3519_v19, %v4031_v29  ;;  %v4351_v39 = vsel %vm3839_vm5, %v3583_v20, %v4095_v30  ;;  %v5707_v29 = vld [vmem:[%s8075_s0 + $0x80] sm:$0xff] }
  0xea   :  { %v1864_v23 = vpop.f32.mrf.mxu0  ;;  %v2024_v24 = vpop.f32.mrf.mxu1  ;;  %v3387_v27 = vmul.f32 %v6757_v33, %v2182_v21  ;;  %v3451_v28 = vmul.f32 %v6757_v33, %v2342_v22  ;;  %v5739_v30 = vld [vmem:[%s8075_s0 + $0x180] sm:$0xff] }
  0xeb   :  { %6528 = vst [vmem:[%s8078_s4 + $0x228] sm:$0xff] %v6168_v17   ;;  %v3260_v25 = vmul.f32 %v6757_v33, %v1864_v23  ;;  %v3324_v26 = vmul.f32 %v6757_v33, %v2024_v24 }
  0xec   :  { %6560 = vst [vmem:[%s8078_s4 + $0x328] sm:$0xff] %v6328_v18   ;;  %v3647_v36 = vadd.f32 %v6775_v41, %v3387_v27  ;;  %v3711_v37 = vadd.f32 %v6775_v41, %v3451_v28 }
  0xed   :  { %v3520_v31 = vadd.f32 %v6775_v41, %v3260_v25  ;;  %v3584_v32 = vadd.f32 %v6775_v41, %v3324_v26 }
  0xee   :  { %v4159_v55 = vmul.f32 0.2, %v3647_v36  ;;  %v4223_v56 = vmul.f32 0.2, %v3711_v37  ;;  %vm3903_vm8 = vcmp.gt.f32.partialorder %v3647_v36, 0.0  ;;  %vm3967_vm9 = vcmp.gt.f32.partialorder %v3711_v37, 0.0 }
  0xef   :  { %vm3776_vm6 = vcmp.gt.f32.partialorder %v3520_v31, 0.0  ;;  %v4032_v34 = vmul.f32 0.2, %v3520_v31  ;;  %vm3840_vm7 = vcmp.gt.f32.partialorder %v3584_v32, 0.0  ;;  %v4096_v35 = vmul.f32 0.2, %v3584_v32 }
  0xf0   :  { %v4415_v63 = vsel %vm3903_vm8, %v3647_v36, %v4159_v55  ;;  %v4479_v0 = vsel %vm3967_vm9, %v3711_v37, %v4223_v56 }
  0xf1   :  { %v4288_v40 = vsel %vm3776_vm6, %v3520_v31, %v4032_v34  ;;  %v4352_v42 = vsel %vm3840_vm7, %v3584_v32, %v4096_v35  ;;  %v2184_v43 = vpop.f32.mrf.mxu2  ;;  %v2344_v44 = vpop.f32.mrf.mxu3 }
  0xf2   :  { %v5853_v47 = vpack.c.bf16 %v4288_v40, %v4287_v38  ;;  %v6013_v48 = vpack.c.bf16 %v4352_v42, %v4351_v39  ;;  %v3388_v49 = vmul.f32 %v6757_v33, %v2184_v43  ;;  %v3452_v50 = vmul.f32 %v6757_v33, %v2344_v44  ;;  %v1867_v51 = vpop.f32.mrf.mxu0  ;;  %v2027_v52 = vpop.f32.mrf.mxu1  ;;  %v5771_v38 = vld [vmem:[%s8075_s0 + $0x280] sm:$0xff] }
  0xf3   :  { %v3261_v59 = vmul.f32 %v6757_v33, %v1867_v51  ;;  %v3325_v60 = vmul.f32 %v6757_v33, %v2027_v52  ;;  %v5803_v39 = vld [vmem:[%s8075_s0 + $0x380] sm:$0xff] }
  0xf4   :  { %6465 = vst [vmem:[%s8078_s4 + $0x30] sm:$0xff] %v5853_v47   ;;  %v3648_v57 = vadd.f32 %v6775_v41, %v3388_v49  ;;  %v3712_v58 = vadd.f32 %v6775_v41, %v3452_v50 }
  0xf5   :  { %6497 = vst [vmem:[%s8078_s4 + $0x130] sm:$0xff] %v6013_v48   ;;  %5578 = vmatmul.msk.bf16.gmra.mxu0 %vm1438_vm0, %v5706_v45  ;;  %5610 = vmatmul.msk.bf16.gmra.mxu1 %vm1438_vm0, %v5738_v46  ;;  %v3521_v5 = vadd.f32 %v6775_v41, %v3261_v59  ;;  %v3585_v6 = vadd.f32 %v6775_v41, %v3325_v60  ;;  %v7141_v60 = vld [vmem:[%s8076_s2] ss:$0 sm:$0xff] }
  0xf6   :  { %vm3904_vm10 = vcmp.gt.f32.partialorder %v3648_v57, 0.0  ;;  %v4160_v61 = vmul.f32 0.2, %v3648_v57  ;;  %vm3968_vm11 = vcmp.gt.f32.partialorder %v3712_v58, 0.0  ;;  %v4224_v62 = vmul.f32 0.2, %v3712_v58  ;;  %5642 = vmatmul.msk.bf16.gmra.mxu2 %vm1438_vm0, %v5770_v53  ;;  %5674 = vmatmul.msk.bf16.gmra.mxu3 %vm1438_vm0, %v5802_v54 }
  0xf7   :  { %v4033_v15 = vmul.f32 0.2, %v3521_v5  ;;  %v4097_v16 = vmul.f32 0.2, %v3585_v6  ;;  %vm3777_vm12 = vcmp.gt.f32.partialorder %v3521_v5, 0.0  ;;  %vm3841_vm13 = vcmp.gt.f32.partialorder %v3585_v6, 0.0 }
  0xf8   :  { %v4416_v1 = vsel %vm3904_vm10, %v3648_v57, %v4160_v61  ;;  %v4480_v2 = vsel %vm3968_vm11, %v3712_v58, %v4224_v62 }
  0xf9   :  { %v6173_v3 = vpack.c.bf16 %v4416_v1, %v4415_v63  ;;  %v6333_v4 = vpack.c.bf16 %v4480_v2, %v4479_v0  ;;  %v2187_v7 = vpop.f32.mrf.mxu2  ;;  %v2347_v8 = vpop.f32.mrf.mxu3  ;;  %v4289_v23 = vsel %vm3777_vm12, %v3521_v5, %v4033_v15  ;;  %v4353_v24 = vsel %vm3841_vm13, %v3585_v6, %v4097_v16  ;;  %v5708_v15 = vld [vmem:[%s8075_s0 + $0x88] sm:$0xff] }
  0xfa   :  { %v1869_v9 = vpop.f32.mrf.mxu0  ;;  %v2029_v10 = vpop.f32.mrf.mxu1  ;;  %v3389_v13 = vmul.f32 %v6757_v33, %v2187_v7  ;;  %v3453_v14 = vmul.f32 %v6757_v33, %v2347_v8  ;;  %v5740_v16 = vld [vmem:[%s8075_s0 + $0x188] sm:$0xff] }
  0xfb   :  { %6529 = vst [vmem:[%s8078_s4 + $0x230] sm:$0xff] %v6173_v3   ;;  %v3262_v11 = vmul.f32 %v6757_v33, %v1869_v9  ;;  %v3326_v12 = vmul.f32 %v6757_v33, %v2029_v10 }
  0xfc   :  { %6561 = vst [vmem:[%s8078_s4 + $0x330] sm:$0xff] %v6333_v4   ;;  %v3649_v21 = vadd.f32 %v6775_v41, %v3389_v13  ;;  %v3713_v22 = vadd.f32 %v6775_v41, %v3453_v14 }
  0xfd   :  { %v3522_v17 = vadd.f32 %v6775_v41, %v3262_v11  ;;  %v3586_v18 = vadd.f32 %v6775_v41, %v3326_v12 }
  0xfe   :  { %v4161_v40 = vmul.f32 0.2, %v3649_v21  ;;  %v4225_v42 = vmul.f32 0.2, %v3713_v22  ;;  %vm3905_vm1 = vcmp.gt.f32.partialorder %v3649_v21, 0.0  ;;  %vm3969_vm2 = vcmp.gt.f32.partialorder %v3713_v22, 0.0 }
  0xff   :  { %vm3778_vm14 = vcmp.gt.f32.partialorder %v3522_v17, 0.0  ;;  %v4034_v19 = vmul.f32 0.2, %v3522_v17  ;;  %vm3842_vm15 = vcmp.gt.f32.partialorder %v3586_v18, 0.0  ;;  %v4098_v20 = vmul.f32 0.2, %v3586_v18 }
 0x100   :  { %v4481_v49 = vsel %vm3969_vm2, %v3713_v22, %v4225_v42 }
 0x101   :  { %v4290_v25 = vsel %vm3778_vm14, %v3522_v17, %v4034_v19  ;;  %v4354_v26 = vsel %vm3842_vm15, %v3586_v18, %v4098_v20  ;;  %v2189_v27 = vpop.f32.mrf.mxu2  ;;  %v2349_v28 = vpop.f32.mrf.mxu3 }
 0x102   :  { %v5858_v31 = vpack.c.bf16 %v4290_v25, %v4289_v23  ;;  %v6018_v32 = vpack.c.bf16 %v4354_v26, %v4353_v24  ;;  %v3390_v34 = vmul.f32 %v6757_v33, %v2189_v27  ;;  %v3454_v35 = vmul.f32 %v6757_v33, %v2349_v28  ;;  %v1872_v36 = vpop.f32.mrf.mxu0  ;;  %v2032_v37 = vpop.f32.mrf.mxu1  ;;  %v5772_v23 = vld [vmem:[%s8075_s0 + $0x288] sm:$0xff] }
 0x103   :  { %v3263_v45 = vmul.f32 %v6757_v33, %v1872_v36  ;;  %v3327_v46 = vmul.f32 %v6757_v33, %v2032_v37  ;;  %v7131_v33 = vld [vmem:[%s8077_s3] ss:$0 sm:$0xff]  ;;  %v5804_v24 = vld [vmem:[%s8075_s0 + $0x388] sm:$0xff] }
 0x104   :  { %6466 = vst [vmem:[%s8078_s4 + $0x38] sm:$0xff] %v5858_v31   ;;  %v3650_v43 = vadd.f32 %v6775_v41, %v3390_v34  ;;  %v3714_v44 = vadd.f32 %v6775_v41, %v3454_v35  ;;  %v4417_v41 = vsel %vm3905_vm1, %v3649_v21, %v4161_v40 }
 0x105   :  { %6498 = vst [vmem:[%s8078_s4 + $0x138] sm:$0xff] %v6018_v32   ;;  %5579 = vmatmul.msk.bf16.gmra.mxu0 %vm1438_vm0, %v5707_v29  ;;  %5611 = vmatmul.msk.bf16.gmra.mxu1 %vm1438_vm0, %v5739_v30  ;;  %v3523_v54 = vadd.f32 %v7131_v33, %v3263_v45  ;;  %v3587_v55 = vadd.f32 %v7131_v33, %v3327_v46 }
 0x106   :  { %vm3906_vm3 = vcmp.gt.f32.partialorder %v3650_v43, 0.0  ;;  %v4162_v47 = vmul.f32 0.2, %v3650_v43  ;;  %vm3970_vm4 = vcmp.gt.f32.partialorder %v3714_v44, 0.0  ;;  %v4226_v48 = vmul.f32 0.2, %v3714_v44  ;;  %5643 = vmatmul.msk.bf16.gmra.mxu2 %vm1438_vm0, %v5771_v38  ;;  %5675 = vmatmul.msk.bf16.gmra.mxu3 %vm1438_vm0, %v5803_v39 }
 0x107   :  { %v4035_v1 = vmul.f32 0.2, %v3523_v54  ;;  %v4099_v2 = vmul.f32 0.2, %v3587_v55  ;;  %vm3779_vm5 = vcmp.gt.f32.partialorder %v3523_v54, 0.0  ;;  %vm3843_vm6 = vcmp.gt.f32.partialorder %v3587_v55, 0.0 }
 0x108   :  { %v4418_v50 = vsel %vm3906_vm3, %v3650_v43, %v4162_v47  ;;  %v4482_v51 = vsel %vm3970_vm4, %v3714_v44, %v4226_v48 }
 0x109   :  { %v6178_v52 = vpack.c.bf16 %v4418_v50, %v4417_v41  ;;  %v6338_v53 = vpack.c.bf16 %v4482_v51, %v4481_v49  ;;  %v2192_v56 = vpop.f32.mrf.mxu2  ;;  %v2352_v57 = vpop.f32.mrf.mxu3  ;;  %v4291_v9 = vsel %vm3779_vm5, %v3523_v54, %v4035_v1  ;;  %v4355_v10 = vsel %vm3843_vm6, %v3587_v55, %v4099_v2  ;;  %v5709_v1 = vld [vmem:[%s8075_s0 + $0x90] sm:$0xff] }
 0x10a   :  { %v1874_v58 = vpop.f32.mrf.mxu0  ;;  %v2034_v59 = vpop.f32.mrf.mxu1  ;;  %v3391_v63 = vmul.f32 %v7141_v60, %v2192_v56  ;;  %v3455_v0 = vmul.f32 %v7141_v60, %v2352_v57  ;;  %v5741_v2 = vld [vmem:[%s8075_s0 + $0x190] sm:$0xff] }
 0x10b   :  { %6530 = vst [vmem:[%s8078_s4 + $0x238] sm:$0xff] %v6178_v52   ;;  %v3264_v61 = vmul.f32 %v7141_v60, %v1874_v58  ;;  %v3328_v62 = vmul.f32 %v7141_v60, %v2034_v59 }
 0x10c   :  { %6562 = vst [vmem:[%s8078_s4 + $0x338] sm:$0xff] %v6338_v53   ;;  %v3651_v7 = vadd.f32 %v7131_v33, %v3391_v63  ;;  %v3715_v8 = vadd.f32 %v7131_v33, %v3455_v0 }
 0x10d   :  { %v3524_v3 = vadd.f32 %v7131_v33, %v3264_v61  ;;  %v3588_v4 = vadd.f32 %v7131_v33, %v3328_v62 }
 0x10e   :  { %v4163_v25 = vmul.f32 0.2, %v3651_v7  ;;  %v4227_v26 = vmul.f32 0.2, %v3715_v8  ;;  %vm3907_vm9 = vcmp.gt.f32.partialorder %v3651_v7, 0.0  ;;  %vm3971_vm10 = vcmp.gt.f32.partialorder %v3715_v8, 0.0 }
 0x10f   :  { %vm3780_vm7 = vcmp.gt.f32.partialorder %v3524_v3, 0.0  ;;  %v4036_v5 = vmul.f32 0.2, %v3524_v3  ;;  %vm3844_vm8 = vcmp.gt.f32.partialorder %v3588_v4, 0.0  ;;  %v4100_v6 = vmul.f32 0.2, %v3588_v4 }
 0x110   :  { %v4419_v34 = vsel %vm3907_vm9, %v3651_v7, %v4163_v25  ;;  %v4483_v35 = vsel %vm3971_vm10, %v3715_v8, %v4227_v26 }
 0x111   :  { %v4292_v11 = vsel %vm3780_vm7, %v3524_v3, %v4036_v5  ;;  %v4356_v12 = vsel %vm3844_vm8, %v3588_v4, %v4100_v6  ;;  %v2194_v13 = vpop.f32.mrf.mxu2  ;;  %v2354_v14 = vpop.f32.mrf.mxu3 }
 0x112   :  { %v5863_v17 = vpack.c.bf16 %v4292_v11, %v4291_v9  ;;  %v6023_v18 = vpack.c.bf16 %v4356_v12, %v4355_v10  ;;  %v3392_v19 = vmul.f32 %v7141_v60, %v2194_v13  ;;  %v3456_v20 = vmul.f32 %v7141_v60, %v2354_v14  ;;  %v1877_v21 = vpop.f32.mrf.mxu0  ;;  %v2037_v22 = vpop.f32.mrf.mxu1  ;;  %v5773_v9 = vld [vmem:[%s8075_s0 + $0x290] sm:$0xff] }
 0x113   :  { %v3265_v29 = vmul.f32 %v7141_v60, %v1877_v21  ;;  %v3329_v30 = vmul.f32 %v7141_v60, %v2037_v22  ;;  %v5805_v10 = vld [vmem:[%s8075_s0 + $0x390] sm:$0xff] }
 0x114   :  { %6467 = vst [vmem:[%s8078_s4 + $0x40] sm:$0xff] %v5863_v17   ;;  %v3652_v27 = vadd.f32 %v7131_v33, %v3392_v19  ;;  %v3716_v28 = vadd.f32 %v7131_v33, %v3456_v20 }
 0x115   :  { %6499 = vst [vmem:[%s8078_s4 + $0x140] sm:$0xff] %v6023_v18   ;;  %5580 = vmatmul.msk.bf16.gmra.mxu0 %vm1438_vm0, %v5708_v15  ;;  %5612 = vmatmul.msk.bf16.gmra.mxu1 %vm1438_vm0, %v5740_v16  ;;  %v3525_v40 = vadd.f32 %v7131_v33, %v3265_v29  ;;  %v3589_v42 = vadd.f32 %v7131_v33, %v3329_v30 }
 0x116   :  { %vm3908_vm11 = vcmp.gt.f32.partialorder %v3652_v27, 0.0  ;;  %v4164_v31 = vmul.f32 0.2, %v3652_v27  ;;  %vm3972_vm12 = vcmp.gt.f32.partialorder %v3716_v28, 0.0  ;;  %v4228_v32 = vmul.f32 0.2, %v3716_v28  ;;  %5644 = vmatmul.msk.bf16.gmra.mxu2 %vm1438_vm0, %v5772_v23  ;;  %5676 = vmatmul.msk.bf16.gmra.mxu3 %vm1438_vm0, %v5804_v24 }
 0x117   :  { %v4037_v50 = vmul.f32 0.2, %v3525_v40  ;;  %v4101_v51 = vmul.f32 0.2, %v3589_v42  ;;  %vm3781_vm13 = vcmp.gt.f32.partialorder %v3525_v40, 0.0  ;;  %vm3845_vm14 = vcmp.gt.f32.partialorder %v3589_v42, 0.0 }
 0x118   :  { %v4420_v36 = vsel %vm3908_vm11, %v3652_v27, %v4164_v31  ;;  %v4484_v37 = vsel %vm3972_vm12, %v3716_v28, %v4228_v32 }
 0x119   :  { %v6183_v38 = vpack.c.bf16 %v4420_v36, %v4419_v34  ;;  %v6343_v39 = vpack.c.bf16 %v4484_v37, %v4483_v35  ;;  %v2197_v43 = vpop.f32.mrf.mxu2  ;;  %v2357_v44 = vpop.f32.mrf.mxu3  ;;  %v4293_v58 = vsel %vm3781_vm13, %v3525_v40, %v4037_v50  ;;  %v4357_v59 = vsel %vm3845_vm14, %v3589_v42, %v4101_v51  ;;  %v5710_v50 = vld [vmem:[%s8075_s0 + $0x98] sm:$0xff] }
 0x11a   :  { %v1879_v45 = vpop.f32.mrf.mxu0  ;;  %v2039_v46 = vpop.f32.mrf.mxu1  ;;  %v3393_v41 = vmul.f32 %v7141_v60, %v2197_v43  ;;  %v3457_v49 = vmul.f32 %v7141_v60, %v2357_v44  ;;  %v5742_v51 = vld [vmem:[%s8075_s0 + $0x198] sm:$0xff] }
 0x11b   :  { %6531 = vst [vmem:[%s8078_s4 + $0x240] sm:$0xff] %v6183_v38   ;;  %v3266_v47 = vmul.f32 %v7141_v60, %v1879_v45  ;;  %v3330_v48 = vmul.f32 %v7141_v60, %v2039_v46 }
 0x11c   :  { %6563 = vst [vmem:[%s8078_s4 + $0x340] sm:$0xff] %v6343_v39   ;;  %v3653_v56 = vadd.f32 %v7131_v33, %v3393_v41  ;;  %v3717_v57 = vadd.f32 %v7131_v33, %v3457_v49 }
 0x11d   :  { %v3526_v52 = vadd.f32 %v7131_v33, %v3266_v47  ;;  %v3590_v53 = vadd.f32 %v7131_v33, %v3330_v48 }
 0x11e   :  { %v4165_v11 = vmul.f32 0.2, %v3653_v56  ;;  %v4229_v12 = vmul.f32 0.2, %v3717_v57  ;;  %vm3909_vm2 = vcmp.gt.f32.partialorder %v3653_v56, 0.0  ;;  %vm3973_vm3 = vcmp.gt.f32.partialorder %v3717_v57, 0.0 }
 0x11f   :  { %vm3782_vm15 = vcmp.gt.f32.partialorder %v3526_v52, 0.0  ;;  %v4038_v54 = vmul.f32 0.2, %v3526_v52  ;;  %vm3846_vm1 = vcmp.gt.f32.partialorder %v3590_v53, 0.0  ;;  %v4102_v55 = vmul.f32 0.2, %v3590_v53 }
 0x120   :  { %v4421_v19 = vsel %vm3909_vm2, %v3653_v56, %v4165_v11  ;;  %v4485_v20 = vsel %vm3973_vm3, %v3717_v57, %v4229_v12 }
 0x121   :  { %v4294_v61 = vsel %vm3782_vm15, %v3526_v52, %v4038_v54  ;;  %v4358_v62 = vsel %vm3846_vm1, %v3590_v53, %v4102_v55  ;;  %v2199_v63 = vpop.f32.mrf.mxu2  ;;  %v2359_v0 = vpop.f32.mrf.mxu3 }
 0x122   :  { %v5868_v3 = vpack.c.bf16 %v4294_v61, %v4293_v58  ;;  %v6028_v4 = vpack.c.bf16 %v4358_v62, %v4357_v59  ;;  %v3394_v5 = vmul.f32 %v7141_v60, %v2199_v63  ;;  %v3458_v6 = vmul.f32 %v7141_v60, %v2359_v0  ;;  %v1882_v7 = vpop.f32.mrf.mxu0  ;;  %v2042_v8 = vpop.f32.mrf.mxu1  ;;  %v5774_v58 = vld [vmem:[%s8075_s0 + $0x298] sm:$0xff] }
 0x123   :  { %v3267_v15 = vmul.f32 %v7141_v60, %v1882_v7  ;;  %v3331_v16 = vmul.f32 %v7141_v60, %v2042_v8  ;;  %v5806_v59 = vld [vmem:[%s8075_s0 + $0x398] sm:$0xff] }
 0x124   :  { %6468 = vst [vmem:[%s8078_s4 + $0x48] sm:$0xff] %v5868_v3   ;;  %v3654_v13 = vadd.f32 %v7131_v33, %v3394_v5  ;;  %v3718_v14 = vadd.f32 %v7131_v33, %v3458_v6 }
 0x125   :  { %6500 = vst [vmem:[%s8078_s4 + $0x148] sm:$0xff] %v6028_v4   ;;  %5581 = vmatmul.msk.bf16.gmra.mxu0 %vm1438_vm0, %v5709_v1  ;;  %5613 = vmatmul.msk.bf16.gmra.mxu1 %vm1438_vm0, %v5741_v2  ;;  %v3527_v25 = vadd.f32 %v7131_v33, %v3267_v15  ;;  %v3591_v26 = vadd.f32 %v7131_v33, %v3331_v16 }
 0x126   :  { %vm3910_vm4 = vcmp.gt.f32.partialorder %v3654_v13, 0.0  ;;  %v4166_v17 = vmul.f32 0.2, %v3654_v13  ;;  %vm3974_vm5 = vcmp.gt.f32.partialorder %v3718_v14, 0.0  ;;  %v4230_v18 = vmul.f32 0.2, %v3718_v14  ;;  %5645 = vmatmul.msk.bf16.gmra.mxu2 %vm1438_vm0, %v5773_v9  ;;  %5677 = vmatmul.msk.bf16.gmra.mxu3 %vm1438_vm0, %v5805_v10 }
 0x127   :  { %v4039_v36 = vmul.f32 0.2, %v3527_v25  ;;  %v4103_v37 = vmul.f32 0.2, %v3591_v26  ;;  %vm3783_vm6 = vcmp.gt.f32.partialorder %v3527_v25, 0.0  ;;  %vm3847_vm7 = vcmp.gt.f32.partialorder %v3591_v26, 0.0 }
 0x128   :  { %v4422_v21 = vsel %vm3910_vm4, %v3654_v13, %v4166_v17  ;;  %v4486_v22 = vsel %vm3974_vm5, %v3718_v14, %v4230_v18 }
 0x129   :  { %v6188_v23 = vpack.c.bf16 %v4422_v21, %v4421_v19  ;;  %v6348_v24 = vpack.c.bf16 %v4486_v22, %v4485_v20  ;;  %v2202_v27 = vpop.f32.mrf.mxu2  ;;  %v2362_v28 = vpop.f32.mrf.mxu3  ;;  %v4295_v45 = vsel %vm3783_vm6, %v3527_v25, %v4039_v36  ;;  %v4359_v46 = vsel %vm3847_vm7, %v3591_v26, %v4103_v37  ;;  %v5711_v36 = vld [vmem:[%s8075_s0 + $0xa0] sm:$0xff] }
 0x12a   :  { %v1884_v29 = vpop.f32.mrf.mxu0  ;;  %v2044_v30 = vpop.f32.mrf.mxu1  ;;  %v3395_v34 = vmul.f32 %v7141_v60, %v2202_v27  ;;  %v3459_v35 = vmul.f32 %v7141_v60, %v2362_v28  ;;  %v5743_v37 = vld [vmem:[%s8075_s0 + $0x1a0] sm:$0xff] }
 0x12b   :  { %6532 = vst [vmem:[%s8078_s4 + $0x248] sm:$0xff] %v6188_v23   ;;  %v3268_v31 = vmul.f32 %v7141_v60, %v1884_v29  ;;  %v3332_v32 = vmul.f32 %v7141_v60, %v2044_v30 }
 0x12c   :  { %6564 = vst [vmem:[%s8078_s4 + $0x348] sm:$0xff] %v6348_v24   ;;  %v3655_v43 = vadd.f32 %v7131_v33, %v3395_v34  ;;  %v3719_v44 = vadd.f32 %v7131_v33, %v3459_v35 }
 0x12d   :  { %v3528_v38 = vadd.f32 %v7131_v33, %v3268_v31  ;;  %v3592_v39 = vadd.f32 %v7131_v33, %v3332_v32 }
 0x12e   :  { %v4167_v61 = vmul.f32 0.2, %v3655_v43  ;;  %v4231_v62 = vmul.f32 0.2, %v3719_v44  ;;  %vm3911_vm10 = vcmp.gt.f32.partialorder %v3655_v43, 0.0  ;;  %vm3975_vm11 = vcmp.gt.f32.partialorder %v3719_v44, 0.0 }
 0x12f   :  { %vm3784_vm8 = vcmp.gt.f32.partialorder %v3528_v38, 0.0  ;;  %v4040_v40 = vmul.f32 0.2, %v3528_v38  ;;  %vm3848_vm9 = vcmp.gt.f32.partialorder %v3592_v39, 0.0  ;;  %v4104_v42 = vmul.f32 0.2, %v3592_v39 }
 0x130   :  { %v4423_v5 = vsel %vm3911_vm10, %v3655_v43, %v4167_v61  ;;  %v4487_v6 = vsel %vm3975_vm11, %v3719_v44, %v4231_v62 }
 0x131   :  { %v4296_v47 = vsel %vm3784_vm8, %v3528_v38, %v4040_v40  ;;  %v4360_v48 = vsel %vm3848_vm9, %v3592_v39, %v4104_v42  ;;  %v2204_v41 = vpop.f32.mrf.mxu2  ;;  %v2364_v49 = vpop.f32.mrf.mxu3 }
 0x132   :  { %v5873_v52 = vpack.c.bf16 %v4296_v47, %v4295_v45  ;;  %v6033_v53 = vpack.c.bf16 %v4360_v48, %v4359_v46  ;;  %v3396_v54 = vmul.f32 %v7141_v60, %v2204_v41  ;;  %v3460_v55 = vmul.f32 %v7141_v60, %v2364_v49  ;;  %v1887_v56 = vpop.f32.mrf.mxu0  ;;  %v2047_v57 = vpop.f32.mrf.mxu1  ;;  %v5775_v45 = vld [vmem:[%s8075_s0 + $0x2a0] sm:$0xff] }
 0x133   :  { %v3269_v1 = vmul.f32 %v7141_v60, %v1887_v56  ;;  %v3333_v2 = vmul.f32 %v7141_v60, %v2047_v57  ;;  %v5807_v46 = vld [vmem:[%s8075_s0 + $0x3a0] sm:$0xff] }
 0x134   :  { %6469 = vst [vmem:[%s8078_s4 + $0x50] sm:$0xff] %v5873_v52   ;;  %v3656_v63 = vadd.f32 %v7131_v33, %v3396_v54  ;;  %v3720_v0 = vadd.f32 %v7131_v33, %v3460_v55 }
 0x135   :  { %6501 = vst [vmem:[%s8078_s4 + $0x150] sm:$0xff] %v6033_v53   ;;  %5582 = vmatmul.msk.bf16.gmra.mxu0 %vm1438_vm0, %v5710_v50  ;;  %5614 = vmatmul.msk.bf16.gmra.mxu1 %vm1438_vm0, %v5742_v51  ;;  %v3529_v11 = vadd.f32 %v7131_v33, %v3269_v1  ;;  %v3593_v12 = vadd.f32 %v7131_v33, %v3333_v2 }
 0x136   :  { %vm3912_vm12 = vcmp.gt.f32.partialorder %v3656_v63, 0.0  ;;  %v4168_v3 = vmul.f32 0.2, %v3656_v63  ;;  %vm3976_vm13 = vcmp.gt.f32.partialorder %v3720_v0, 0.0  ;;  %v4232_v4 = vmul.f32 0.2, %v3720_v0  ;;  %5646 = vmatmul.msk.bf16.gmra.mxu2 %vm1438_vm0, %v5774_v58  ;;  %5678 = vmatmul.msk.bf16.gmra.mxu3 %vm1438_vm0, %v5806_v59 }
 0x137   :  { %v4041_v21 = vmul.f32 0.2, %v3529_v11  ;;  %v4105_v22 = vmul.f32 0.2, %v3593_v12  ;;  %vm3785_vm14 = vcmp.gt.f32.partialorder %v3529_v11, 0.0  ;;  %vm3849_vm15 = vcmp.gt.f32.partialorder %v3593_v12, 0.0 }
 0x138   :  { %v4424_v7 = vsel %vm3912_vm12, %v3656_v63, %v4168_v3  ;;  %v4488_v8 = vsel %vm3976_vm13, %v3720_v0, %v4232_v4 }
 0x139   :  { %v6193_v9 = vpack.c.bf16 %v4424_v7, %v4423_v5  ;;  %v6353_v10 = vpack.c.bf16 %v4488_v8, %v4487_v6  ;;  %v2207_v13 = vpop.f32.mrf.mxu2  ;;  %v2367_v14 = vpop.f32.mrf.mxu3  ;;  %v4297_v29 = vsel %vm3785_vm14, %v3529_v11, %v4041_v21  ;;  %v4361_v30 = vsel %vm3849_vm15, %v3593_v12, %v4105_v22  ;;  %v5712_v21 = vld [vmem:[%s8075_s0 + $0xa8] sm:$0xff] }
 0x13a   :  { %v1889_v15 = vpop.f32.mrf.mxu0  ;;  %v2049_v16 = vpop.f32.mrf.mxu1  ;;  %v3397_v19 = vmul.f32 %v7141_v60, %v2207_v13  ;;  %v3461_v20 = vmul.f32 %v7141_v60, %v2367_v14  ;;  %v5744_v22 = vld [vmem:[%s8075_s0 + $0x1a8] sm:$0xff] }
 0x13b   :  { %6533 = vst [vmem:[%s8078_s4 + $0x250] sm:$0xff] %v6193_v9   ;;  %v3270_v17 = vmul.f32 %v7141_v60, %v1889_v15  ;;  %v3334_v18 = vmul.f32 %v7141_v60, %v2049_v16 }
 0x13c   :  { %6565 = vst [vmem:[%s8078_s4 + $0x350] sm:$0xff] %v6353_v10   ;;  %v3657_v27 = vadd.f32 %v7131_v33, %v3397_v19  ;;  %v3721_v28 = vadd.f32 %v7131_v33, %v3461_v20 }
 0x13d   :  { %v3530_v23 = vadd.f32 %v7131_v33, %v3270_v17  ;;  %v3594_v24 = vadd.f32 %v7131_v33, %v3334_v18 }
 0x13e   :  { %v4169_v47 = vmul.f32 0.2, %v3657_v27  ;;  %v4233_v48 = vmul.f32 0.2, %v3721_v28  ;;  %vm3913_vm3 = vcmp.gt.f32.partialorder %v3657_v27, 0.0  ;;  %vm3977_vm4 = vcmp.gt.f32.partialorder %v3721_v28, 0.0 }
 0x13f   :  { %vm3786_vm1 = vcmp.gt.f32.partialorder %v3530_v23, 0.0  ;;  %v4042_v25 = vmul.f32 0.2, %v3530_v23  ;;  %vm3850_vm2 = vcmp.gt.f32.partialorder %v3594_v24, 0.0  ;;  %v4106_v26 = vmul.f32 0.2, %v3594_v24 }
 0x140   :  { %v4425_v54 = vsel %vm3913_vm3, %v3657_v27, %v4169_v47  ;;  %v4489_v55 = vsel %vm3977_vm4, %v3721_v28, %v4233_v48 }
 0x141   :  { %v4298_v31 = vsel %vm3786_vm1, %v3530_v23, %v4042_v25  ;;  %v4362_v32 = vsel %vm3850_vm2, %v3594_v24, %v4106_v26  ;;  %v2209_v34 = vpop.f32.mrf.mxu2  ;;  %v2369_v35 = vpop.f32.mrf.mxu3 }
 0x142   :  { %v5878_v38 = vpack.c.bf16 %v4298_v31, %v4297_v29  ;;  %v6038_v39 = vpack.c.bf16 %v4362_v32, %v4361_v30  ;;  %v3398_v40 = vmul.f32 %v7141_v60, %v2209_v34  ;;  %v3462_v42 = vmul.f32 %v7141_v60, %v2369_v35  ;;  %v1892_v43 = vpop.f32.mrf.mxu0  ;;  %v2052_v44 = vpop.f32.mrf.mxu1  ;;  %v5776_v29 = vld [vmem:[%s8075_s0 + $0x2a8] sm:$0xff] }
 0x143   :  { %v3271_v50 = vmul.f32 %v7141_v60, %v1892_v43  ;;  %v3335_v51 = vmul.f32 %v7141_v60, %v2052_v44  ;;  %v5808_v30 = vld [vmem:[%s8075_s0 + $0x3a8] sm:$0xff] }
 0x144   :  { %6470 = vst [vmem:[%s8078_s4 + $0x58] sm:$0xff] %v5878_v38   ;;  %v3658_v41 = vadd.f32 %v7131_v33, %v3398_v40  ;;  %v3722_v49 = vadd.f32 %v7131_v33, %v3462_v42 }
 0x145   :  { %6502 = vst [vmem:[%s8078_s4 + $0x158] sm:$0xff] %v6038_v39   ;;  %5583 = vmatmul.msk.bf16.gmra.mxu0 %vm1438_vm0, %v5711_v36  ;;  %5615 = vmatmul.msk.bf16.gmra.mxu1 %vm1438_vm0, %v5743_v37  ;;  %v3531_v61 = vadd.f32 %v7131_v33, %v3271_v50  ;;  %v3595_v62 = vadd.f32 %v7131_v33, %v3335_v51 }
 0x146   :  { %vm3914_vm5 = vcmp.gt.f32.partialorder %v3658_v41, 0.0  ;;  %v4170_v52 = vmul.f32 0.2, %v3658_v41  ;;  %vm3978_vm6 = vcmp.gt.f32.partialorder %v3722_v49, 0.0  ;;  %v4234_v53 = vmul.f32 0.2, %v3722_v49  ;;  %5647 = vmatmul.msk.bf16.gmra.mxu2 %vm1438_vm0, %v5775_v45  ;;  %5679 = vmatmul.msk.bf16.gmra.mxu3 %vm1438_vm0, %v5807_v46 }
 0x147   :  { %v4043_v7 = vmul.f32 0.2, %v3531_v61  ;;  %v4107_v8 = vmul.f32 0.2, %v3595_v62  ;;  %vm3787_vm7 = vcmp.gt.f32.partialorder %v3531_v61, 0.0  ;;  %vm3851_vm8 = vcmp.gt.f32.partialorder %v3595_v62, 0.0 }
 0x148   :  { %v4426_v56 = vsel %vm3914_vm5, %v3658_v41, %v4170_v52  ;;  %v4490_v57 = vsel %vm3978_vm6, %v3722_v49, %v4234_v53 }
 0x149   :  { %v6198_v58 = vpack.c.bf16 %v4426_v56, %v4425_v54  ;;  %v6358_v59 = vpack.c.bf16 %v4490_v57, %v4489_v55  ;;  %v2212_v63 = vpop.f32.mrf.mxu2  ;;  %v2372_v0 = vpop.f32.mrf.mxu3  ;;  %v4299_v15 = vsel %vm3787_vm7, %v3531_v61, %v4043_v7  ;;  %v4363_v16 = vsel %vm3851_vm8, %v3595_v62, %v4107_v8  ;;  %v5713_v7 = vld [vmem:[%s8075_s0 + $0xb0] sm:$0xff] }
 0x14a   :  { %v1894_v1 = vpop.f32.mrf.mxu0  ;;  %v2054_v2 = vpop.f32.mrf.mxu1  ;;  %v3399_v5 = vmul.f32 %v7141_v60, %v2212_v63  ;;  %v3463_v6 = vmul.f32 %v7141_v60, %v2372_v0  ;;  %v5745_v8 = vld [vmem:[%s8075_s0 + $0x1b0] sm:$0xff] }
 0x14b   :  { %6534 = vst [vmem:[%s8078_s4 + $0x258] sm:$0xff] %v6198_v58   ;;  %v3272_v3 = vmul.f32 %v7141_v60, %v1894_v1  ;;  %v3336_v4 = vmul.f32 %v7141_v60, %v2054_v2 }
 0x14c   :  { %6566 = vst [vmem:[%s8078_s4 + $0x358] sm:$0xff] %v6358_v59   ;;  %v3659_v13 = vadd.f32 %v7131_v33, %v3399_v5  ;;  %v3723_v14 = vadd.f32 %v7131_v33, %v3463_v6 }
 0x14d   :  { %v3532_v9 = vadd.f32 %v7131_v33, %v3272_v3  ;;  %v3596_v10 = vadd.f32 %v7131_v33, %v3336_v4 }
 0x14e   :  { %v4171_v31 = vmul.f32 0.2, %v3659_v13  ;;  %v4235_v32 = vmul.f32 0.2, %v3723_v14  ;;  %vm3915_vm11 = vcmp.gt.f32.partialorder %v3659_v13, 0.0  ;;  %vm3979_vm12 = vcmp.gt.f32.partialorder %v3723_v14, 0.0 }
 0x14f   :  { %vm3788_vm9 = vcmp.gt.f32.partialorder %v3532_v9, 0.0  ;;  %v4044_v11 = vmul.f32 0.2, %v3532_v9  ;;  %vm3852_vm10 = vcmp.gt.f32.partialorder %v3596_v10, 0.0  ;;  %v4108_v12 = vmul.f32 0.2, %v3596_v10 }
 0x150   :  { %v4427_v40 = vsel %vm3915_vm11, %v3659_v13, %v4171_v31  ;;  %v4491_v42 = vsel %vm3979_vm12, %v3723_v14, %v4235_v32 }
 0x151   :  { %v4300_v17 = vsel %vm3788_vm9, %v3532_v9, %v4044_v11  ;;  %v4364_v18 = vsel %vm3852_vm10, %v3596_v10, %v4108_v12  ;;  %v2214_v19 = vpop.f32.mrf.mxu2  ;;  %v2374_v20 = vpop.f32.mrf.mxu3 }
 0x152   :  { %v5883_v23 = vpack.c.bf16 %v4300_v17, %v4299_v15  ;;  %v6043_v24 = vpack.c.bf16 %v4364_v18, %v4363_v16  ;;  %v3400_v25 = vmul.f32 %v7141_v60, %v2214_v19  ;;  %v3464_v26 = vmul.f32 %v7141_v60, %v2374_v20  ;;  %v1897_v27 = vpop.f32.mrf.mxu0  ;;  %v2057_v28 = vpop.f32.mrf.mxu1  ;;  %v5777_v15 = vld [vmem:[%s8075_s0 + $0x2b0] sm:$0xff] }
 0x153   :  { %v3273_v36 = vmul.f32 %v7141_v60, %v1897_v27  ;;  %v3337_v37 = vmul.f32 %v7141_v60, %v2057_v28  ;;  %v5809_v16 = vld [vmem:[%s8075_s0 + $0x3b0] sm:$0xff] }
 0x154   :  { %6471 = vst [vmem:[%s8078_s4 + $0x60] sm:$0xff] %v5883_v23   ;;  %v3660_v34 = vadd.f32 %v7131_v33, %v3400_v25  ;;  %v3724_v35 = vadd.f32 %v7131_v33, %v3464_v26 }
 0x155   :  { %6503 = vst [vmem:[%s8078_s4 + $0x160] sm:$0xff] %v6043_v24   ;;  %5584 = vmatmul.msk.bf16.gmra.mxu0 %vm1438_vm0, %v5712_v21  ;;  %5616 = vmatmul.msk.bf16.gmra.mxu1 %vm1438_vm0, %v5744_v22  ;;  %v3533_v47 = vadd.f32 %v7131_v33, %v3273_v36  ;;  %v3597_v48 = vadd.f32 %v7131_v33, %v3337_v37 }
 0x156   :  { %vm3916_vm13 = vcmp.gt.f32.partialorder %v3660_v34, 0.0  ;;  %v4172_v38 = vmul.f32 0.2, %v3660_v34  ;;  %vm3980_vm14 = vcmp.gt.f32.partialorder %v3724_v35, 0.0  ;;  %v4236_v39 = vmul.f32 0.2, %v3724_v35  ;;  %5648 = vmatmul.msk.bf16.gmra.mxu2 %vm1438_vm0, %v5776_v29  ;;  %5680 = vmatmul.msk.bf16.gmra.mxu3 %vm1438_vm0, %v5808_v30 }
 0x157   :  { %v4045_v56 = vmul.f32 0.2, %v3533_v47  ;;  %v4109_v57 = vmul.f32 0.2, %v3597_v48  ;;  %vm3789_vm15 = vcmp.gt.f32.partialorder %v3533_v47, 0.0  ;;  %vm3853_vm1 = vcmp.gt.f32.partialorder %v3597_v48, 0.0 }
 0x158   :  { %v4428_v43 = vsel %vm3916_vm13, %v3660_v34, %v4172_v38  ;;  %v4492_v44 = vsel %vm3980_vm14, %v3724_v35, %v4236_v39 }
 0x159   :  { %v6203_v45 = vpack.c.bf16 %v4428_v43, %v4427_v40  ;;  %v6363_v46 = vpack.c.bf16 %v4492_v44, %v4491_v42  ;;  %v2217_v41 = vpop.f32.mrf.mxu2  ;;  %v2377_v49 = vpop.f32.mrf.mxu3  ;;  %v4301_v1 = vsel %vm3789_vm15, %v3533_v47, %v4045_v56  ;;  %v4365_v2 = vsel %vm3853_vm1, %v3597_v48, %v4109_v57  ;;  %v5714_v56 = vld [vmem:[%s8075_s0 + $0xb8] sm:$0xff] }
 0x15a   :  { %v1899_v50 = vpop.f32.mrf.mxu0  ;;  %v2059_v51 = vpop.f32.mrf.mxu1  ;;  %v3401_v54 = vmul.f32 %v7141_v60, %v2217_v41  ;;  %v3465_v55 = vmul.f32 %v7141_v60, %v2377_v49  ;;  %v5746_v57 = vld [vmem:[%s8075_s0 + $0x1b8] sm:$0xff] }
 0x15b   :  { %6535 = vst [vmem:[%s8078_s4 + $0x260] sm:$0xff] %v6203_v45   ;;  %v3274_v52 = vmul.f32 %v7141_v60, %v1899_v50  ;;  %v3338_v53 = vmul.f32 %v7141_v60, %v2059_v51 }
 0x15c   :  { %6567 = vst [vmem:[%s8078_s4 + $0x360] sm:$0xff] %v6363_v46   ;;  %v3661_v63 = vadd.f32 %v7131_v33, %v3401_v54  ;;  %v3725_v0 = vadd.f32 %v7131_v33, %v3465_v55 }
 0x15d   :  { %v3534_v58 = vadd.f32 %v7131_v33, %v3274_v52  ;;  %v3598_v59 = vadd.f32 %v7131_v33, %v3338_v53 }
 0x15e   :  { %v4173_v17 = vmul.f32 0.2, %v3661_v63  ;;  %v4237_v18 = vmul.f32 0.2, %v3725_v0  ;;  %vm3917_vm4 = vcmp.gt.f32.partialorder %v3661_v63, 0.0  ;;  %vm3981_vm5 = vcmp.gt.f32.partialorder %v3725_v0, 0.0 }
 0x15f   :  { %vm3790_vm2 = vcmp.gt.f32.partialorder %v3534_v58, 0.0  ;;  %v4046_v61 = vmul.f32 0.2, %v3534_v58  ;;  %vm3854_vm3 = vcmp.gt.f32.partialorder %v3598_v59, 0.0  ;;  %v4110_v62 = vmul.f32 0.2, %v3598_v59 }
 0x160   :  { %v4429_v25 = vsel %vm3917_vm4, %v3661_v63, %v4173_v17  ;;  %v4493_v26 = vsel %vm3981_vm5, %v3725_v0, %v4237_v18 }
 0x161   :  { %v4302_v3 = vsel %vm3790_vm2, %v3534_v58, %v4046_v61  ;;  %v4366_v4 = vsel %vm3854_vm3, %v3598_v59, %v4110_v62  ;;  %v2219_v5 = vpop.f32.mrf.mxu2  ;;  %v2379_v6 = vpop.f32.mrf.mxu3 }
 0x162   :  { %v5888_v9 = vpack.c.bf16 %v4302_v3, %v4301_v1  ;;  %v6048_v10 = vpack.c.bf16 %v4366_v4, %v4365_v2  ;;  %v3402_v11 = vmul.f32 %v7141_v60, %v2219_v5  ;;  %v3466_v12 = vmul.f32 %v7141_v60, %v2379_v6  ;;  %v1902_v13 = vpop.f32.mrf.mxu0  ;;  %v2062_v14 = vpop.f32.mrf.mxu1  ;;  %v5778_v1 = vld [vmem:[%s8075_s0 + $0x2b8] sm:$0xff] }
 0x163   :  { %v3275_v21 = vmul.f32 %v7141_v60, %v1902_v13  ;;  %v3339_v22 = vmul.f32 %v7141_v60, %v2062_v14  ;;  %v5810_v2 = vld [vmem:[%s8075_s0 + $0x3b8] sm:$0xff] }
 0x164   :  { %6472 = vst [vmem:[%s8078_s4 + $0x68] sm:$0xff] %v5888_v9   ;;  %v3662_v19 = vadd.f32 %v7131_v33, %v3402_v11  ;;  %v3726_v20 = vadd.f32 %v7131_v33, %v3466_v12 }
 0x165   :  { %6504 = vst [vmem:[%s8078_s4 + $0x168] sm:$0xff] %v6048_v10   ;;  %5585 = vmatmul.msk.bf16.gmra.mxu0 %vm1438_vm0, %v5713_v7  ;;  %5617 = vmatmul.msk.bf16.gmra.mxu1 %vm1438_vm0, %v5745_v8  ;;  %v3535_v31 = vadd.f32 %v7131_v33, %v3275_v21  ;;  %v3599_v32 = vadd.f32 %v7131_v33, %v3339_v22 }
 0x166   :  { %vm3918_vm6 = vcmp.gt.f32.partialorder %v3662_v19, 0.0  ;;  %v4174_v23 = vmul.f32 0.2, %v3662_v19  ;;  %vm3982_vm7 = vcmp.gt.f32.partialorder %v3726_v20, 0.0  ;;  %v4238_v24 = vmul.f32 0.2, %v3726_v20  ;;  %5649 = vmatmul.msk.bf16.gmra.mxu2 %vm1438_vm0, %v5777_v15  ;;  %5681 = vmatmul.msk.bf16.gmra.mxu3 %vm1438_vm0, %v5809_v16 }
 0x167   :  { %v4047_v43 = vmul.f32 0.2, %v3535_v31  ;;  %v4111_v44 = vmul.f32 0.2, %v3599_v32  ;;  %vm3791_vm8 = vcmp.gt.f32.partialorder %v3535_v31, 0.0  ;;  %vm3855_vm9 = vcmp.gt.f32.partialorder %v3599_v32, 0.0 }
 0x168   :  { %v4430_v27 = vsel %vm3918_vm6, %v3662_v19, %v4174_v23  ;;  %v4494_v28 = vsel %vm3982_vm7, %v3726_v20, %v4238_v24 }
 0x169   :  { %v6208_v29 = vpack.c.bf16 %v4430_v27, %v4429_v25  ;;  %v6368_v30 = vpack.c.bf16 %v4494_v28, %v4493_v26  ;;  %v2222_v34 = vpop.f32.mrf.mxu2  ;;  %v2382_v35 = vpop.f32.mrf.mxu3  ;;  %v4303_v50 = vsel %vm3791_vm8, %v3535_v31, %v4047_v43  ;;  %v4367_v51 = vsel %vm3855_vm9, %v3599_v32, %v4111_v44  ;;  %v5715_v43 = vld [vmem:[%s8075_s0 + $0xc0] sm:$0xff] }
 0x16a   :  { %v1904_v36 = vpop.f32.mrf.mxu0  ;;  %v2064_v37 = vpop.f32.mrf.mxu1  ;;  %v3403_v40 = vmul.f32 %v7141_v60, %v2222_v34  ;;  %v3467_v42 = vmul.f32 %v7141_v60, %v2382_v35  ;;  %v5747_v44 = vld [vmem:[%s8075_s0 + $0x1c0] sm:$0xff] }
 0x16b   :  { %6536 = vst [vmem:[%s8078_s4 + $0x268] sm:$0xff] %v6208_v29   ;;  %v3276_v38 = vmul.f32 %v7141_v60, %v1904_v36  ;;  %v3340_v39 = vmul.f32 %v7141_v60, %v2064_v37 }
 0x16c   :  { %6568 = vst [vmem:[%s8078_s4 + $0x368] sm:$0xff] %v6368_v30   ;;  %v3663_v41 = vadd.f32 %v7131_v33, %v3403_v40  ;;  %v3727_v49 = vadd.f32 %v7131_v33, %v3467_v42 }
 0x16d   :  { %v3536_v45 = vadd.f32 %v7131_v33, %v3276_v38  ;;  %v3600_v46 = vadd.f32 %v7131_v33, %v3340_v39 }
 0x16e   :  { %v4175_v3 = vmul.f32 0.2, %v3663_v41  ;;  %v4239_v4 = vmul.f32 0.2, %v3727_v49  ;;  %vm3919_vm12 = vcmp.gt.f32.partialorder %v3663_v41, 0.0  ;;  %vm3983_vm13 = vcmp.gt.f32.partialorder %v3727_v49, 0.0 }
 0x16f   :  { %vm3792_vm10 = vcmp.gt.f32.partialorder %v3536_v45, 0.0  ;;  %v4048_v47 = vmul.f32 0.2, %v3536_v45  ;;  %vm3856_vm11 = vcmp.gt.f32.partialorder %v3600_v46, 0.0  ;;  %v4112_v48 = vmul.f32 0.2, %v3600_v46 }
 0x170   :  { %v4431_v11 = vsel %vm3919_vm12, %v3663_v41, %v4175_v3  ;;  %v4495_v12 = vsel %vm3983_vm13, %v3727_v49, %v4239_v4 }
 0x171   :  { %v4304_v52 = vsel %vm3792_vm10, %v3536_v45, %v4048_v47  ;;  %v4368_v53 = vsel %vm3856_vm11, %v3600_v46, %v4112_v48  ;;  %v2224_v54 = vpop.f32.mrf.mxu2  ;;  %v2384_v55 = vpop.f32.mrf.mxu3 }
 0x172   :  { %v5893_v58 = vpack.c.bf16 %v4304_v52, %v4303_v50  ;;  %v6053_v59 = vpack.c.bf16 %v4368_v53, %v4367_v51  ;;  %v3404_v61 = vmul.f32 %v7141_v60, %v2224_v54  ;;  %v3468_v62 = vmul.f32 %v7141_v60, %v2384_v55  ;;  %v1907_v63 = vpop.f32.mrf.mxu0  ;;  %v2067_v0 = vpop.f32.mrf.mxu1  ;;  %v5779_v50 = vld [vmem:[%s8075_s0 + $0x2c0] sm:$0xff] }
 0x173   :  { %v3277_v7 = vmul.f32 %v7141_v60, %v1907_v63  ;;  %v3341_v8 = vmul.f32 %v7141_v60, %v2067_v0  ;;  %v5811_v51 = vld [vmem:[%s8075_s0 + $0x3c0] sm:$0xff] }
 0x174   :  { %6473 = vst [vmem:[%s8078_s4 + $0x70] sm:$0xff] %v5893_v58   ;;  %v3664_v5 = vadd.f32 %v7131_v33, %v3404_v61  ;;  %v3728_v6 = vadd.f32 %v7131_v33, %v3468_v62 }
 0x175   :  { %6505 = vst [vmem:[%s8078_s4 + $0x170] sm:$0xff] %v6053_v59   ;;  %5586 = vmatmul.msk.bf16.gmra.mxu0 %vm1438_vm0, %v5714_v56  ;;  %5618 = vmatmul.msk.bf16.gmra.mxu1 %vm1438_vm0, %v5746_v57  ;;  %v3537_v17 = vadd.f32 %v7131_v33, %v3277_v7  ;;  %v3601_v18 = vadd.f32 %v7131_v33, %v3341_v8  ;;  %v7503_v8 = vld [vmem:[%s8076_s2] ss:$0 sm:$0xff] }
 0x176   :  { %vm3920_vm14 = vcmp.gt.f32.partialorder %v3664_v5, 0.0  ;;  %v4176_v9 = vmul.f32 0.2, %v3664_v5  ;;  %vm3984_vm15 = vcmp.gt.f32.partialorder %v3728_v6, 0.0  ;;  %v4240_v10 = vmul.f32 0.2, %v3728_v6  ;;  %5650 = vmatmul.msk.bf16.gmra.mxu2 %vm1438_vm0, %v5778_v1  ;;  %5682 = vmatmul.msk.bf16.gmra.mxu3 %vm1438_vm0, %v5810_v2 }
 0x177   :  { %v4049_v27 = vmul.f32 0.2, %v3537_v17  ;;  %v4113_v28 = vmul.f32 0.2, %v3601_v18  ;;  %vm3793_vm1 = vcmp.gt.f32.partialorder %v3537_v17, 0.0  ;;  %vm3857_vm2 = vcmp.gt.f32.partialorder %v3601_v18, 0.0 }
 0x178   :  { %v4432_v13 = vsel %vm3920_vm14, %v3664_v5, %v4176_v9  ;;  %v4496_v14 = vsel %vm3984_vm15, %v3728_v6, %v4240_v10 }
 0x179   :  { %v6213_v15 = vpack.c.bf16 %v4432_v13, %v4431_v11  ;;  %v6373_v16 = vpack.c.bf16 %v4496_v14, %v4495_v12  ;;  %v2227_v19 = vpop.f32.mrf.mxu2  ;;  %v2387_v20 = vpop.f32.mrf.mxu3  ;;  %v4305_v36 = vsel %vm3793_vm1, %v3537_v17, %v4049_v27  ;;  %v4369_v37 = vsel %vm3857_vm2, %v3601_v18, %v4113_v28  ;;  %v5716_v27 = vld [vmem:[%s8075_s0 + $0xc8] sm:$0xff] }
 0x17a   :  { %v1909_v21 = vpop.f32.mrf.mxu0  ;;  %v2069_v22 = vpop.f32.mrf.mxu1  ;;  %v3405_v25 = vmul.f32 %v7141_v60, %v2227_v19  ;;  %v3469_v26 = vmul.f32 %v7141_v60, %v2387_v20  ;;  %v5748_v28 = vld [vmem:[%s8075_s0 + $0x1c8] sm:$0xff] }
 0x17b   :  { %6537 = vst [vmem:[%s8078_s4 + $0x270] sm:$0xff] %v6213_v15   ;;  %v3278_v23 = vmul.f32 %v7141_v60, %v1909_v21  ;;  %v3342_v24 = vmul.f32 %v7141_v60, %v2069_v22 }
 0x17c   :  { %6569 = vst [vmem:[%s8078_s4 + $0x370] sm:$0xff] %v6373_v16   ;;  %v3665_v34 = vadd.f32 %v7131_v33, %v3405_v25  ;;  %v3729_v35 = vadd.f32 %v7131_v33, %v3469_v26 }
 0x17d   :  { %v3538_v29 = vadd.f32 %v7131_v33, %v3278_v23  ;;  %v3602_v30 = vadd.f32 %v7131_v33, %v3342_v24 }
 0x17e   :  { %v4177_v52 = vmul.f32 0.2, %v3665_v34  ;;  %v4241_v53 = vmul.f32 0.2, %v3729_v35  ;;  %vm3921_vm5 = vcmp.gt.f32.partialorder %v3665_v34, 0.0  ;;  %vm3985_vm6 = vcmp.gt.f32.partialorder %v3729_v35, 0.0 }
 0x17f   :  { %vm3794_vm3 = vcmp.gt.f32.partialorder %v3538_v29, 0.0  ;;  %v4050_v31 = vmul.f32 0.2, %v3538_v29  ;;  %vm3858_vm4 = vcmp.gt.f32.partialorder %v3602_v30, 0.0  ;;  %v4114_v32 = vmul.f32 0.2, %v3602_v30 }
 0x180   :  { %v4497_v61 = vsel %vm3985_vm6, %v3729_v35, %v4241_v53 }
 0x181   :  { %v4306_v38 = vsel %vm3794_vm3, %v3538_v29, %v4050_v31  ;;  %v4370_v39 = vsel %vm3858_vm4, %v3602_v30, %v4114_v32  ;;  %v2229_v40 = vpop.f32.mrf.mxu2  ;;  %v2389_v42 = vpop.f32.mrf.mxu3 }
 0x182   :  { %v5898_v45 = vpack.c.bf16 %v4306_v38, %v4305_v36  ;;  %v6058_v46 = vpack.c.bf16 %v4370_v39, %v4369_v37  ;;  %v3406_v47 = vmul.f32 %v7141_v60, %v2229_v40  ;;  %v3470_v48 = vmul.f32 %v7141_v60, %v2389_v42  ;;  %v1912_v41 = vpop.f32.mrf.mxu0  ;;  %v2072_v49 = vpop.f32.mrf.mxu1  ;;  %v5780_v36 = vld [vmem:[%s8075_s0 + $0x2c8] sm:$0xff] }
 0x183   :  { %v3279_v56 = vmul.f32 %v7141_v60, %v1912_v41  ;;  %v3343_v57 = vmul.f32 %v7141_v60, %v2072_v49  ;;  %v7493_v60 = vld [vmem:[%s8077_s3] ss:$0 sm:$0xff]  ;;  %v5812_v37 = vld [vmem:[%s8075_s0 + $0x3c8] sm:$0xff] }
 0x184   :  { %6474 = vst [vmem:[%s8078_s4 + $0x78] sm:$0xff] %v5898_v45   ;;  %v3666_v54 = vadd.f32 %v7131_v33, %v3406_v47  ;;  %v3730_v55 = vadd.f32 %v7131_v33, %v3470_v48  ;;  %v4433_v33 = vsel %vm3921_vm5, %v3665_v34, %v4177_v52 }
 0x185   :  { %6506 = vst [vmem:[%s8078_s4 + $0x178] sm:$0xff] %v6058_v46   ;;  %5587 = vmatmul.msk.bf16.gmra.mxu0 %vm1438_vm0, %v5715_v43  ;;  %5619 = vmatmul.msk.bf16.gmra.mxu1 %vm1438_vm0, %v5747_v44  ;;  %v3539_v2 = vadd.f32 %v7493_v60, %v3279_v56  ;;  %v3603_v3 = vadd.f32 %v7493_v60, %v3343_v57 }
 0x186   :  { %vm3922_vm7 = vcmp.gt.f32.partialorder %v3666_v54, 0.0  ;;  %v4178_v58 = vmul.f32 0.2, %v3666_v54  ;;  %vm3986_vm8 = vcmp.gt.f32.partialorder %v3730_v55, 0.0  ;;  %v4242_v59 = vmul.f32 0.2, %v3730_v55  ;;  %5651 = vmatmul.msk.bf16.gmra.mxu2 %vm1438_vm0, %v5779_v50  ;;  %5683 = vmatmul.msk.bf16.gmra.mxu3 %vm1438_vm0, %v5811_v51 }
 0x187   :  { %v4051_v13 = vmul.f32 0.2, %v3539_v2  ;;  %v4115_v14 = vmul.f32 0.2, %v3603_v3  ;;  %vm3795_vm9 = vcmp.gt.f32.partialorder %v3539_v2, 0.0  ;;  %vm3859_vm10 = vcmp.gt.f32.partialorder %v3603_v3, 0.0 }
 0x188   :  { %v4434_v62 = vsel %vm3922_vm7, %v3666_v54, %v4178_v58  ;;  %v4498_v63 = vsel %vm3986_vm8, %v3730_v55, %v4242_v59 }
 0x189   :  { %v6218_v0 = vpack.c.bf16 %v4434_v62, %v4433_v33  ;;  %v6378_v1 = vpack.c.bf16 %v4498_v63, %v4497_v61  ;;  %v2232_v4 = vpop.f32.mrf.mxu2  ;;  %v2392_v5 = vpop.f32.mrf.mxu3  ;;  %v4307_v21 = vsel %vm3795_vm9, %v3539_v2, %v4051_v13  ;;  %v4371_v22 = vsel %vm3859_vm10, %v3603_v3, %v4115_v14  ;;  %v5717_v13 = vld [vmem:[%s8075_s0 + $0xd0] sm:$0xff] }
 0x18a   :  { %v1914_v6 = vpop.f32.mrf.mxu0  ;;  %v2074_v7 = vpop.f32.mrf.mxu1  ;;  %v3407_v11 = vmul.f32 %v7503_v8, %v2232_v4  ;;  %v3471_v12 = vmul.f32 %v7503_v8, %v2392_v5  ;;  %v5749_v14 = vld [vmem:[%s8075_s0 + $0x1d0] sm:$0xff] }
 0x18b   :  { %6538 = vst [vmem:[%s8078_s4 + $0x278] sm:$0xff] %v6218_v0   ;;  %v3280_v9 = vmul.f32 %v7503_v8, %v1914_v6  ;;  %v3344_v10 = vmul.f32 %v7503_v8, %v2074_v7 }
 0x18c   :  { %6570 = vst [vmem:[%s8078_s4 + $0x378] sm:$0xff] %v6378_v1   ;;  %v3667_v19 = vadd.f32 %v7493_v60, %v3407_v11  ;;  %v3731_v20 = vadd.f32 %v7493_v60, %v3471_v12 }
 0x18d   :  { %v3540_v15 = vadd.f32 %v7493_v60, %v3280_v9  ;;  %v3604_v16 = vadd.f32 %v7493_v60, %v3344_v10 }
 0x18e   :  { %v4179_v38 = vmul.f32 0.2, %v3667_v19  ;;  %v4243_v39 = vmul.f32 0.2, %v3731_v20  ;;  %vm3923_vm13 = vcmp.gt.f32.partialorder %v3667_v19, 0.0  ;;  %vm3987_vm14 = vcmp.gt.f32.partialorder %v3731_v20, 0.0 }
 0x18f   :  { %vm3796_vm11 = vcmp.gt.f32.partialorder %v3540_v15, 0.0  ;;  %v4052_v17 = vmul.f32 0.2, %v3540_v15  ;;  %vm3860_vm12 = vcmp.gt.f32.partialorder %v3604_v16, 0.0  ;;  %v4116_v18 = vmul.f32 0.2, %v3604_v16 }
 0x190   :  { %v4435_v47 = vsel %vm3923_vm13, %v3667_v19, %v4179_v38  ;;  %v4499_v48 = vsel %vm3987_vm14, %v3731_v20, %v4243_v39 }
 0x191   :  { %v4308_v23 = vsel %vm3796_vm11, %v3540_v15, %v4052_v17  ;;  %v4372_v24 = vsel %vm3860_vm12, %v3604_v16, %v4116_v18  ;;  %v2234_v25 = vpop.f32.mrf.mxu2  ;;  %v2394_v26 = vpop.f32.mrf.mxu3 }
 0x192   :  { %v5903_v29 = vpack.c.bf16 %v4308_v23, %v4307_v21  ;;  %v6063_v30 = vpack.c.bf16 %v4372_v24, %v4371_v22  ;;  %v3408_v31 = vmul.f32 %v7503_v8, %v2234_v25  ;;  %v3472_v32 = vmul.f32 %v7503_v8, %v2394_v26  ;;  %v1917_v34 = vpop.f32.mrf.mxu0  ;;  %v2077_v35 = vpop.f32.mrf.mxu1  ;;  %v5781_v21 = vld [vmem:[%s8075_s0 + $0x2d0] sm:$0xff] }
 0x193   :  { %v3281_v43 = vmul.f32 %v7503_v8, %v1917_v34  ;;  %v3345_v44 = vmul.f32 %v7503_v8, %v2077_v35  ;;  %v5813_v22 = vld [vmem:[%s8075_s0 + $0x3d0] sm:$0xff] }
 0x194   :  { %6475 = vst [vmem:[%s8078_s4 + $0x80] sm:$0xff] %v5903_v29   ;;  %v3668_v40 = vadd.f32 %v7493_v60, %v3408_v31  ;;  %v3732_v42 = vadd.f32 %v7493_v60, %v3472_v32 }
 0x195   :  { %6507 = vst [vmem:[%s8078_s4 + $0x180] sm:$0xff] %v6063_v30   ;;  %5588 = vmatmul.msk.bf16.gmra.mxu0 %vm1438_vm0, %v5716_v27  ;;  %5620 = vmatmul.msk.bf16.gmra.mxu1 %vm1438_vm0, %v5748_v28  ;;  %v3541_v52 = vadd.f32 %v7493_v60, %v3281_v43  ;;  %v3605_v53 = vadd.f32 %v7493_v60, %v3345_v44 }
 0x196   :  { %vm3924_vm15 = vcmp.gt.f32.partialorder %v3668_v40, 0.0  ;;  %v4180_v45 = vmul.f32 0.2, %v3668_v40  ;;  %vm3988_vm1 = vcmp.gt.f32.partialorder %v3732_v42, 0.0  ;;  %v4244_v46 = vmul.f32 0.2, %v3732_v42  ;;  %5652 = vmatmul.msk.bf16.gmra.mxu2 %vm1438_vm0, %v5780_v36  ;;  %5684 = vmatmul.msk.bf16.gmra.mxu3 %vm1438_vm0, %v5812_v37 }
 0x197   :  { %v4053_v62 = vmul.f32 0.2, %v3541_v52  ;;  %v4117_v63 = vmul.f32 0.2, %v3605_v53  ;;  %vm3797_vm2 = vcmp.gt.f32.partialorder %v3541_v52, 0.0  ;;  %vm3861_vm3 = vcmp.gt.f32.partialorder %v3605_v53, 0.0 }
 0x198   :  { %v4436_v41 = vsel %vm3924_vm15, %v3668_v40, %v4180_v45  ;;  %v4500_v49 = vsel %vm3988_vm1, %v3732_v42, %v4244_v46 }
 0x199   :  { %v6223_v50 = vpack.c.bf16 %v4436_v41, %v4435_v47  ;;  %v6383_v51 = vpack.c.bf16 %v4500_v49, %v4499_v48  ;;  %v2237_v54 = vpop.f32.mrf.mxu2  ;;  %v2397_v55 = vpop.f32.mrf.mxu3  ;;  %v4309_v6 = vsel %vm3797_vm2, %v3541_v52, %v4053_v62  ;;  %v4373_v7 = vsel %vm3861_vm3, %v3605_v53, %v4117_v63  ;;  %v5718_v62 = vld [vmem:[%s8075_s0 + $0xd8] sm:$0xff] }
 0x19a   :  { %v1919_v56 = vpop.f32.mrf.mxu0  ;;  %v2079_v57 = vpop.f32.mrf.mxu1  ;;  %v3409_v33 = vmul.f32 %v7503_v8, %v2237_v54  ;;  %v3473_v61 = vmul.f32 %v7503_v8, %v2397_v55  ;;  %v5750_v63 = vld [vmem:[%s8075_s0 + $0x1d8] sm:$0xff] }
 0x19b   :  { %6539 = vst [vmem:[%s8078_s4 + $0x280] sm:$0xff] %v6223_v50   ;;  %v3282_v58 = vmul.f32 %v7503_v8, %v1919_v56  ;;  %v3346_v59 = vmul.f32 %v7503_v8, %v2079_v57 }
 0x19c   :  { %6571 = vst [vmem:[%s8078_s4 + $0x380] sm:$0xff] %v6383_v51   ;;  %v3669_v4 = vadd.f32 %v7493_v60, %v3409_v33  ;;  %v3733_v5 = vadd.f32 %v7493_v60, %v3473_v61 }
 0x19d   :  { %v3542_v0 = vadd.f32 %v7493_v60, %v3282_v58  ;;  %v3606_v1 = vadd.f32 %v7493_v60, %v3346_v59 }
 0x19e   :  { %v4181_v23 = vmul.f32 0.2, %v3669_v4  ;;  %v4245_v24 = vmul.f32 0.2, %v3733_v5  ;;  %vm3925_vm6 = vcmp.gt.f32.partialorder %v3669_v4, 0.0  ;;  %vm3989_vm7 = vcmp.gt.f32.partialorder %v3733_v5, 0.0 }
 0x19f   :  { %vm3798_vm4 = vcmp.gt.f32.partialorder %v3542_v0, 0.0  ;;  %v4054_v2 = vmul.f32 0.2, %v3542_v0  ;;  %vm3862_vm5 = vcmp.gt.f32.partialorder %v3606_v1, 0.0  ;;  %v4118_v3 = vmul.f32 0.2, %v3606_v1 }
 0x1a0   :  { %v4437_v31 = vsel %vm3925_vm6, %v3669_v4, %v4181_v23  ;;  %v4501_v32 = vsel %vm3989_vm7, %v3733_v5, %v4245_v24 }
 0x1a1   :  { %v4310_v9 = vsel %vm3798_vm4, %v3542_v0, %v4054_v2  ;;  %v4374_v10 = vsel %vm3862_vm5, %v3606_v1, %v4118_v3  ;;  %v2239_v11 = vpop.f32.mrf.mxu2  ;;  %v2399_v12 = vpop.f32.mrf.mxu3 }
 0x1a2   :  { %v5908_v15 = vpack.c.bf16 %v4310_v9, %v4309_v6  ;;  %v6068_v16 = vpack.c.bf16 %v4374_v10, %v4373_v7  ;;  %v3410_v17 = vmul.f32 %v7503_v8, %v2239_v11  ;;  %v3474_v18 = vmul.f32 %v7503_v8, %v2399_v12  ;;  %v1922_v19 = vpop.f32.mrf.mxu0  ;;  %v2082_v20 = vpop.f32.mrf.mxu1  ;;  %v5782_v6 = vld [vmem:[%s8075_s0 + $0x2d8] sm:$0xff] }
 0x1a3   :  { %v3283_v27 = vmul.f32 %v7503_v8, %v1922_v19  ;;  %v3347_v28 = vmul.f32 %v7503_v8, %v2082_v20  ;;  %v5814_v7 = vld [vmem:[%s8075_s0 + $0x3d8] sm:$0xff] }
 0x1a4   :  { %6476 = vst [vmem:[%s8078_s4 + $0x88] sm:$0xff] %v5908_v15   ;;  %v3670_v25 = vadd.f32 %v7493_v60, %v3410_v17  ;;  %v3734_v26 = vadd.f32 %v7493_v60, %v3474_v18 }
 0x1a5   :  { %6508 = vst [vmem:[%s8078_s4 + $0x188] sm:$0xff] %v6068_v16   ;;  %5589 = vmatmul.msk.bf16.gmra.mxu0 %vm1438_vm0, %v5717_v13  ;;  %5621 = vmatmul.msk.bf16.gmra.mxu1 %vm1438_vm0, %v5749_v14  ;;  %v3543_v38 = vadd.f32 %v7493_v60, %v3283_v27  ;;  %v3607_v39 = vadd.f32 %v7493_v60, %v3347_v28 }
 0x1a6   :  { %vm3926_vm8 = vcmp.gt.f32.partialorder %v3670_v25, 0.0  ;;  %v4182_v29 = vmul.f32 0.2, %v3670_v25  ;;  %vm3990_vm9 = vcmp.gt.f32.partialorder %v3734_v26, 0.0  ;;  %v4246_v30 = vmul.f32 0.2, %v3734_v26  ;;  %5653 = vmatmul.msk.bf16.gmra.mxu2 %vm1438_vm0, %v5781_v21  ;;  %5685 = vmatmul.msk.bf16.gmra.mxu3 %vm1438_vm0, %v5813_v22 }
 0x1a7   :  { %v4055_v41 = vmul.f32 0.2, %v3543_v38  ;;  %v4119_v49 = vmul.f32 0.2, %v3607_v39  ;;  %vm3799_vm10 = vcmp.gt.f32.partialorder %v3543_v38, 0.0  ;;  %vm3863_vm11 = vcmp.gt.f32.partialorder %v3607_v39, 0.0 }
 0x1a8   :  { %v4438_v34 = vsel %vm3926_vm8, %v3670_v25, %v4182_v29  ;;  %v4502_v35 = vsel %vm3990_vm9, %v3734_v26, %v4246_v30 }
 0x1a9   :  { %v6228_v36 = vpack.c.bf16 %v4438_v34, %v4437_v31  ;;  %v6388_v37 = vpack.c.bf16 %v4502_v35, %v4501_v32  ;;  %v2242_v40 = vpop.f32.mrf.mxu2  ;;  %v2402_v42 = vpop.f32.mrf.mxu3  ;;  %v4311_v56 = vsel %vm3799_vm10, %v3543_v38, %v4055_v41  ;;  %v4375_v57 = vsel %vm3863_vm11, %v3607_v39, %v4119_v49  ;;  %v5719_v41 = vld [vmem:[%s8075_s0 + $0xe0] sm:$0xff] }
 0x1aa   :  { %v1924_v43 = vpop.f32.mrf.mxu0  ;;  %v2084_v44 = vpop.f32.mrf.mxu1  ;;  %v3411_v47 = vmul.f32 %v7503_v8, %v2242_v40  ;;  %v3475_v48 = vmul.f32 %v7503_v8, %v2402_v42  ;;  %v5751_v49 = vld [vmem:[%s8075_s0 + $0x1e0] sm:$0xff] }
 0x1ab   :  { %6540 = vst [vmem:[%s8078_s4 + $0x288] sm:$0xff] %v6228_v36   ;;  %v3284_v45 = vmul.f32 %v7503_v8, %v1924_v43  ;;  %v3348_v46 = vmul.f32 %v7503_v8, %v2084_v44 }
 0x1ac   :  { %6572 = vst [vmem:[%s8078_s4 + $0x388] sm:$0xff] %v6388_v37   ;;  %v3671_v54 = vadd.f32 %v7493_v60, %v3411_v47  ;;  %v3735_v55 = vadd.f32 %v7493_v60, %v3475_v48 }
 0x1ad   :  { %v3544_v50 = vadd.f32 %v7493_v60, %v3284_v45  ;;  %v3608_v51 = vadd.f32 %v7493_v60, %v3348_v46 }
 0x1ae   :  { %v4183_v9 = vmul.f32 0.2, %v3671_v54  ;;  %v4247_v10 = vmul.f32 0.2, %v3735_v55  ;;  %vm3927_vm14 = vcmp.gt.f32.partialorder %v3671_v54, 0.0  ;;  %vm3991_vm15 = vcmp.gt.f32.partialorder %v3735_v55, 0.0 }
 0x1af   :  { %vm3800_vm12 = vcmp.gt.f32.partialorder %v3544_v50, 0.0  ;;  %v4056_v52 = vmul.f32 0.2, %v3544_v50  ;;  %vm3864_vm13 = vcmp.gt.f32.partialorder %v3608_v51, 0.0  ;;  %v4120_v53 = vmul.f32 0.2, %v3608_v51 }
 0x1b0   :  { %v4439_v17 = vsel %vm3927_vm14, %v3671_v54, %v4183_v9  ;;  %v4503_v18 = vsel %vm3991_vm15, %v3735_v55, %v4247_v10 }
 0x1b1   :  { %v4312_v58 = vsel %vm3800_vm12, %v3544_v50, %v4056_v52  ;;  %v4376_v59 = vsel %vm3864_vm13, %v3608_v51, %v4120_v53  ;;  %v2244_v33 = vpop.f32.mrf.mxu2  ;;  %v2404_v61 = vpop.f32.mrf.mxu3 }
 0x1b2   :  { %v5913_v0 = vpack.c.bf16 %v4312_v58, %v4311_v56  ;;  %v6073_v1 = vpack.c.bf16 %v4376_v59, %v4375_v57  ;;  %v3412_v2 = vmul.f32 %v7503_v8, %v2244_v33  ;;  %v3476_v3 = vmul.f32 %v7503_v8, %v2404_v61  ;;  %v1927_v4 = vpop.f32.mrf.mxu0  ;;  %v2087_v5 = vpop.f32.mrf.mxu1  ;;  %v5783_v56 = vld [vmem:[%s8075_s0 + $0x2e0] sm:$0xff] }
 0x1b3   :  { %v3285_v13 = vmul.f32 %v7503_v8, %v1927_v4  ;;  %v3349_v14 = vmul.f32 %v7503_v8, %v2087_v5  ;;  %v5815_v57 = vld [vmem:[%s8075_s0 + $0x3e0] sm:$0xff] }
 0x1b4   :  { %6477 = vst [vmem:[%s8078_s4 + $0x90] sm:$0xff] %v5913_v0   ;;  %v3672_v11 = vadd.f32 %v7493_v60, %v3412_v2  ;;  %v3736_v12 = vadd.f32 %v7493_v60, %v3476_v3 }
 0x1b5   :  { %6509 = vst [vmem:[%s8078_s4 + $0x190] sm:$0xff] %v6073_v1   ;;  %5590 = vmatmul.msk.bf16.gmra.mxu0 %vm1438_vm0, %v5718_v62  ;;  %5622 = vmatmul.msk.bf16.gmra.mxu1 %vm1438_vm0, %v5750_v63  ;;  %v3545_v23 = vadd.f32 %v7493_v60, %v3285_v13  ;;  %v3609_v24 = vadd.f32 %v7493_v60, %v3349_v14 }
 0x1b6   :  { %vm3928_vm1 = vcmp.gt.f32.partialorder %v3672_v11, 0.0  ;;  %v4184_v15 = vmul.f32 0.2, %v3672_v11  ;;  %vm3992_vm2 = vcmp.gt.f32.partialorder %v3736_v12, 0.0  ;;  %v4248_v16 = vmul.f32 0.2, %v3736_v12  ;;  %5654 = vmatmul.msk.bf16.gmra.mxu2 %vm1438_vm0, %v5782_v6  ;;  %5686 = vmatmul.msk.bf16.gmra.mxu3 %vm1438_vm0, %v5814_v7 }
 0x1b7   :  { %v4057_v34 = vmul.f32 0.2, %v3545_v23  ;;  %v4121_v35 = vmul.f32 0.2, %v3609_v24  ;;  %vm3801_vm3 = vcmp.gt.f32.partialorder %v3545_v23, 0.0  ;;  %vm3865_vm4 = vcmp.gt.f32.partialorder %v3609_v24, 0.0 }
 0x1b8   :  { %v4440_v19 = vsel %vm3928_vm1, %v3672_v11, %v4184_v15  ;;  %v4504_v20 = vsel %vm3992_vm2, %v3736_v12, %v4248_v16 }
 0x1b9   :  { %v6233_v21 = vpack.c.bf16 %v4440_v19, %v4439_v17  ;;  %v6393_v22 = vpack.c.bf16 %v4504_v20, %v4503_v18  ;;  %v2247_v25 = vpop.f32.mrf.mxu2  ;;  %v2407_v26 = vpop.f32.mrf.mxu3  ;;  %v4313_v43 = vsel %vm3801_vm3, %v3545_v23, %v4057_v34  ;;  %v4377_v44 = vsel %vm3865_vm4, %v3609_v24, %v4121_v35  ;;  %v5720_v34 = vld [vmem:[%s8075_s0 + $0xe8] sm:$0xff] }
 0x1ba   :  { %v1929_v27 = vpop.f32.mrf.mxu0  ;;  %v2089_v28 = vpop.f32.mrf.mxu1  ;;  %v3413_v31 = vmul.f32 %v7503_v8, %v2247_v25  ;;  %v3477_v32 = vmul.f32 %v7503_v8, %v2407_v26  ;;  %v5752_v35 = vld [vmem:[%s8075_s0 + $0x1e8] sm:$0xff] }
 0x1bb   :  { %6541 = vst [vmem:[%s8078_s4 + $0x290] sm:$0xff] %v6233_v21   ;;  %v3286_v29 = vmul.f32 %v7503_v8, %v1929_v27  ;;  %v3350_v30 = vmul.f32 %v7503_v8, %v2089_v28 }
 0x1bc   :  { %6573 = vst [vmem:[%s8078_s4 + $0x390] sm:$0xff] %v6393_v22   ;;  %v3673_v40 = vadd.f32 %v7493_v60, %v3413_v31  ;;  %v3737_v42 = vadd.f32 %v7493_v60, %v3477_v32 }
 0x1bd   :  { %v3546_v36 = vadd.f32 %v7493_v60, %v3286_v29  ;;  %v3610_v37 = vadd.f32 %v7493_v60, %v3350_v30 }
 0x1be   :  { %v4185_v58 = vmul.f32 0.2, %v3673_v40  ;;  %v4249_v59 = vmul.f32 0.2, %v3737_v42  ;;  %vm3929_vm7 = vcmp.gt.f32.partialorder %v3673_v40, 0.0  ;;  %vm3993_vm8 = vcmp.gt.f32.partialorder %v3737_v42, 0.0 }
 0x1bf   :  { %vm3802_vm5 = vcmp.gt.f32.partialorder %v3546_v36, 0.0  ;;  %v4058_v38 = vmul.f32 0.2, %v3546_v36  ;;  %vm3866_vm6 = vcmp.gt.f32.partialorder %v3610_v37, 0.0  ;;  %v4122_v39 = vmul.f32 0.2, %v3610_v37 }
 0x1c0   :  { %v4441_v2 = vsel %vm3929_vm7, %v3673_v40, %v4185_v58  ;;  %v4505_v3 = vsel %vm3993_vm8, %v3737_v42, %v4249_v59 }
 0x1c1   :  { %v4314_v45 = vsel %vm3802_vm5, %v3546_v36, %v4058_v38  ;;  %v4378_v46 = vsel %vm3866_vm6, %v3610_v37, %v4122_v39  ;;  %v2249_v47 = vpop.f32.mrf.mxu2  ;;  %v2409_v48 = vpop.f32.mrf.mxu3 }
 0x1c2   :  { %v5918_v50 = vpack.c.bf16 %v4314_v45, %v4313_v43  ;;  %v6078_v51 = vpack.c.bf16 %v4378_v46, %v4377_v44  ;;  %v3414_v52 = vmul.f32 %v7503_v8, %v2249_v47  ;;  %v3478_v53 = vmul.f32 %v7503_v8, %v2409_v48  ;;  %v1932_v54 = vpop.f32.mrf.mxu0  ;;  %v2092_v55 = vpop.f32.mrf.mxu1  ;;  %v5784_v43 = vld [vmem:[%s8075_s0 + $0x2e8] sm:$0xff] }
 0x1c3   :  { %v3287_v62 = vmul.f32 %v7503_v8, %v1932_v54  ;;  %v3351_v63 = vmul.f32 %v7503_v8, %v2092_v55  ;;  %v5816_v44 = vld [vmem:[%s8075_s0 + $0x3e8] sm:$0xff] }
 0x1c4   :  { %6478 = vst [vmem:[%s8078_s4 + $0x98] sm:$0xff] %v5918_v50   ;;  %v3674_v33 = vadd.f32 %v7493_v60, %v3414_v52  ;;  %v3738_v61 = vadd.f32 %v7493_v60, %v3478_v53 }
 0x1c5   :  { %6510 = vst [vmem:[%s8078_s4 + $0x198] sm:$0xff] %v6078_v51   ;;  %5591 = vmatmul.msk.bf16.gmra.mxu0 %vm1438_vm0, %v5719_v41  ;;  %5623 = vmatmul.msk.bf16.gmra.mxu1 %vm1438_vm0, %v5751_v49  ;;  %v3547_v9 = vadd.f32 %v7493_v60, %v3287_v62  ;;  %v3611_v10 = vadd.f32 %v7493_v60, %v3351_v63 }
 0x1c6   :  { %vm3930_vm9 = vcmp.gt.f32.partialorder %v3674_v33, 0.0  ;;  %v4186_v0 = vmul.f32 0.2, %v3674_v33  ;;  %vm3994_vm10 = vcmp.gt.f32.partialorder %v3738_v61, 0.0  ;;  %v4250_v1 = vmul.f32 0.2, %v3738_v61  ;;  %5655 = vmatmul.msk.bf16.gmra.mxu2 %vm1438_vm0, %v5783_v56  ;;  %5687 = vmatmul.msk.bf16.gmra.mxu3 %vm1438_vm0, %v5815_v57 }
 0x1c7   :  { %v4059_v19 = vmul.f32 0.2, %v3547_v9  ;;  %v4123_v20 = vmul.f32 0.2, %v3611_v10  ;;  %vm3803_vm11 = vcmp.gt.f32.partialorder %v3547_v9, 0.0  ;;  %vm3867_vm12 = vcmp.gt.f32.partialorder %v3611_v10, 0.0 }
 0x1c8   :  { %v4442_v4 = vsel %vm3930_vm9, %v3674_v33, %v4186_v0  ;;  %v4506_v5 = vsel %vm3994_vm10, %v3738_v61, %v4250_v1 }
 0x1c9   :  { %v6238_v6 = vpack.c.bf16 %v4442_v4, %v4441_v2  ;;  %v6398_v7 = vpack.c.bf16 %v4506_v5, %v4505_v3  ;;  %v2252_v11 = vpop.f32.mrf.mxu2  ;;  %v2412_v12 = vpop.f32.mrf.mxu3  ;;  %v4315_v27 = vsel %vm3803_vm11, %v3547_v9, %v4059_v19  ;;  %v4379_v28 = vsel %vm3867_vm12, %v3611_v10, %v4123_v20  ;;  %v5721_v19 = vld [vmem:[%s8075_s0 + $0xf0] sm:$0xff] }
 0x1ca   :  { %v1934_v13 = vpop.f32.mrf.mxu0  ;;  %v2094_v14 = vpop.f32.mrf.mxu1  ;;  %v3415_v17 = vmul.f32 %v7503_v8, %v2252_v11  ;;  %v3479_v18 = vmul.f32 %v7503_v8, %v2412_v12  ;;  %v5753_v20 = vld [vmem:[%s8075_s0 + $0x1f0] sm:$0xff] }
 0x1cb   :  { %6542 = vst [vmem:[%s8078_s4 + $0x298] sm:$0xff] %v6238_v6   ;;  %v3288_v15 = vmul.f32 %v7503_v8, %v1934_v13  ;;  %v3352_v16 = vmul.f32 %v7503_v8, %v2094_v14 }
 0x1cc   :  { %6574 = vst [vmem:[%s8078_s4 + $0x398] sm:$0xff] %v6398_v7   ;;  %v3675_v25 = vadd.f32 %v7493_v60, %v3415_v17  ;;  %v3739_v26 = vadd.f32 %v7493_v60, %v3479_v18 }
 0x1cd   :  { %v3548_v21 = vadd.f32 %v7493_v60, %v3288_v15  ;;  %v3612_v22 = vadd.f32 %v7493_v60, %v3352_v16 }
 0x1ce   :  { %v4187_v45 = vmul.f32 0.2, %v3675_v25  ;;  %v4251_v46 = vmul.f32 0.2, %v3739_v26  ;;  %vm3931_vm15 = vcmp.gt.f32.partialorder %v3675_v25, 0.0  ;;  %vm3995_vm1 = vcmp.gt.f32.partialorder %v3739_v26, 0.0 }
 0x1cf   :  { %vm3804_vm13 = vcmp.gt.f32.partialorder %v3548_v21, 0.0  ;;  %v4060_v23 = vmul.f32 0.2, %v3548_v21  ;;  %vm3868_vm14 = vcmp.gt.f32.partialorder %v3612_v22, 0.0  ;;  %v4124_v24 = vmul.f32 0.2, %v3612_v22 }
 0x1d0   :  { %v4443_v52 = vsel %vm3931_vm15, %v3675_v25, %v4187_v45  ;;  %v4507_v53 = vsel %vm3995_vm1, %v3739_v26, %v4251_v46 }
 0x1d1   :  { %v4316_v29 = vsel %vm3804_vm13, %v3548_v21, %v4060_v23  ;;  %v4380_v30 = vsel %vm3868_vm14, %v3612_v22, %v4124_v24  ;;  %v2254_v31 = vpop.f32.mrf.mxu2  ;;  %v2414_v32 = vpop.f32.mrf.mxu3 }
 0x1d2   :  { %v5923_v36 = vpack.c.bf16 %v4316_v29, %v4315_v27  ;;  %v6083_v37 = vpack.c.bf16 %v4380_v30, %v4379_v28  ;;  %v3416_v38 = vmul.f32 %v7503_v8, %v2254_v31  ;;  %v3480_v39 = vmul.f32 %v7503_v8, %v2414_v32  ;;  %v1937_v40 = vpop.f32.mrf.mxu0  ;;  %v2097_v42 = vpop.f32.mrf.mxu1  ;;  %v5785_v27 = vld [vmem:[%s8075_s0 + $0x2f0] sm:$0xff] }
 0x1d3   :  { %v3289_v41 = vmul.f32 %v7503_v8, %v1937_v40  ;;  %v3353_v49 = vmul.f32 %v7503_v8, %v2097_v42  ;;  %v5817_v28 = vld [vmem:[%s8075_s0 + $0x3f0] sm:$0xff] }
 0x1d4   :  { %6479 = vst [vmem:[%s8078_s4 + $0xa0] sm:$0xff] %v5923_v36   ;;  %v3676_v47 = vadd.f32 %v7493_v60, %v3416_v38  ;;  %v3740_v48 = vadd.f32 %v7493_v60, %v3480_v39 }
 0x1d5   :  { %6511 = vst [vmem:[%s8078_s4 + $0x1a0] sm:$0xff] %v6083_v37   ;;  %5592 = vmatmul.msk.bf16.gmra.mxu0 %vm1438_vm0, %v5720_v34  ;;  %5624 = vmatmul.msk.bf16.gmra.mxu1 %vm1438_vm0, %v5752_v35  ;;  %v3549_v58 = vadd.f32 %v7493_v60, %v3289_v41  ;;  %v3613_v59 = vadd.f32 %v7493_v60, %v3353_v49 }
 0x1d6   :  { %vm3932_vm2 = vcmp.gt.f32.partialorder %v3676_v47, 0.0  ;;  %v4188_v50 = vmul.f32 0.2, %v3676_v47  ;;  %vm3996_vm3 = vcmp.gt.f32.partialorder %v3740_v48, 0.0  ;;  %v4252_v51 = vmul.f32 0.2, %v3740_v48  ;;  %5656 = vmatmul.msk.bf16.gmra.mxu2 %vm1438_vm0, %v5784_v43  ;;  %5688 = vmatmul.msk.bf16.gmra.mxu3 %vm1438_vm0, %v5816_v44 }
 0x1d7   :  { %v4061_v4 = vmul.f32 0.2, %v3549_v58  ;;  %v4125_v5 = vmul.f32 0.2, %v3613_v59  ;;  %vm3805_vm4 = vcmp.gt.f32.partialorder %v3549_v58, 0.0  ;;  %vm3869_vm5 = vcmp.gt.f32.partialorder %v3613_v59, 0.0 }
 0x1d8   :  { %v4444_v54 = vsel %vm3932_vm2, %v3676_v47, %v4188_v50  ;;  %v4508_v55 = vsel %vm3996_vm3, %v3740_v48, %v4252_v51 }
 0x1d9   :  { %v6243_v56 = vpack.c.bf16 %v4444_v54, %v4443_v52  ;;  %v6403_v57 = vpack.c.bf16 %v4508_v55, %v4507_v53  ;;  %v2257_v33 = vpop.f32.mrf.mxu2  ;;  %v2417_v61 = vpop.f32.mrf.mxu3  ;;  %v4317_v13 = vsel %vm3805_vm4, %v3549_v58, %v4061_v4  ;;  %v4381_v14 = vsel %vm3869_vm5, %v3613_v59, %v4125_v5  ;;  %v5722_v4 = vld [vmem:[%s8075_s0 + $0xf8] sm:$0xff] }
 0x1da   :  { %v1939_v62 = vpop.f32.mrf.mxu0  ;;  %v2099_v63 = vpop.f32.mrf.mxu1  ;;  %v3417_v2 = vmul.f32 %v7503_v8, %v2257_v33  ;;  %v3481_v3 = vmul.f32 %v7503_v8, %v2417_v61  ;;  %v5754_v5 = vld [vmem:[%s8075_s0 + $0x1f8] sm:$0xff] }
 0x1db   :  { %6543 = vst [vmem:[%s8078_s4 + $0x2a0] sm:$0xff] %v6243_v56   ;;  %v3290_v0 = vmul.f32 %v7503_v8, %v1939_v62  ;;  %v3354_v1 = vmul.f32 %v7503_v8, %v2099_v63 }
 0x1dc   :  { %6575 = vst [vmem:[%s8078_s4 + $0x3a0] sm:$0xff] %v6403_v57   ;;  %v3677_v11 = vadd.f32 %v7493_v60, %v3417_v2  ;;  %v3741_v12 = vadd.f32 %v7493_v60, %v3481_v3 }
 0x1dd   :  { %v3550_v6 = vadd.f32 %v7493_v60, %v3290_v0  ;;  %v3614_v7 = vadd.f32 %v7493_v60, %v3354_v1 }
 0x1de   :  { %v4189_v29 = vmul.f32 0.2, %v3677_v11  ;;  %v4253_v30 = vmul.f32 0.2, %v3741_v12  ;;  %vm3933_vm8 = vcmp.gt.f32.partialorder %v3677_v11, 0.0  ;;  %vm3997_vm9 = vcmp.gt.f32.partialorder %v3741_v12, 0.0 }
 0x1df   :  { %vm3806_vm6 = vcmp.gt.f32.partialorder %v3550_v6, 0.0  ;;  %v4062_v9 = vmul.f32 0.2, %v3550_v6  ;;  %vm3870_vm7 = vcmp.gt.f32.partialorder %v3614_v7, 0.0  ;;  %v4126_v10 = vmul.f32 0.2, %v3614_v7 }
 0x1e0   :  { %v4445_v38 = vsel %vm3933_vm8, %v3677_v11, %v4189_v29  ;;  %v4509_v39 = vsel %vm3997_vm9, %v3741_v12, %v4253_v30 }
 0x1e1   :  { %v4318_v15 = vsel %vm3806_vm6, %v3550_v6, %v4062_v9  ;;  %v4382_v16 = vsel %vm3870_vm7, %v3614_v7, %v4126_v10  ;;  %v2259_v17 = vpop.f32.mrf.mxu2  ;;  %v2419_v18 = vpop.f32.mrf.mxu3 }
 0x1e2   :  { %v5928_v21 = vpack.c.bf16 %v4318_v15, %v4317_v13  ;;  %v6088_v22 = vpack.c.bf16 %v4382_v16, %v4381_v14  ;;  %v3418_v23 = vmul.f32 %v7503_v8, %v2259_v17  ;;  %v3482_v24 = vmul.f32 %v7503_v8, %v2419_v18  ;;  %v1942_v25 = vpop.f32.mrf.mxu0  ;;  %v2102_v26 = vpop.f32.mrf.mxu1  ;;  %v5786_v13 = vld [vmem:[%s8075_s0 + $0x2f8] sm:$0xff] }
 0x1e3   :  { %v3291_v34 = vmul.f32 %v7503_v8, %v1942_v25  ;;  %v3355_v35 = vmul.f32 %v7503_v8, %v2102_v26  ;;  %v5818_v14 = vld [vmem:[%s8075_s0 + $0x3f8] sm:$0xff] }
 0x1e4   :  { %6480 = vst [vmem:[%s8078_s4 + $0xa8] sm:$0xff] %v5928_v21   ;;  %v3678_v31 = vadd.f32 %v7493_v60, %v3418_v23  ;;  %v3742_v32 = vadd.f32 %v7493_v60, %v3482_v24 }
 0x1e5   :  { %6512 = vst [vmem:[%s8078_s4 + $0x1a8] sm:$0xff] %v6088_v22   ;;  %5593 = vmatmul.msk.bf16.gmra.mxu0 %vm1438_vm0, %v5721_v19  ;;  %5625 = vmatmul.msk.bf16.gmra.mxu1 %vm1438_vm0, %v5753_v20  ;;  %v3551_v45 = vadd.f32 %v7493_v60, %v3291_v34  ;;  %v3615_v46 = vadd.f32 %v7493_v60, %v3355_v35 }
 0x1e6   :  { %vm3934_vm10 = vcmp.gt.f32.partialorder %v3678_v31, 0.0  ;;  %v4190_v36 = vmul.f32 0.2, %v3678_v31  ;;  %vm3998_vm11 = vcmp.gt.f32.partialorder %v3742_v32, 0.0  ;;  %v4254_v37 = vmul.f32 0.2, %v3742_v32  ;;  %5657 = vmatmul.msk.bf16.gmra.mxu2 %vm1438_vm0, %v5785_v27  ;;  %5689 = vmatmul.msk.bf16.gmra.mxu3 %vm1438_vm0, %v5817_v28 }
 0x1e7   :  { %v4063_v54 = vmul.f32 0.2, %v3551_v45  ;;  %v4127_v55 = vmul.f32 0.2, %v3615_v46  ;;  %vm3807_vm12 = vcmp.gt.f32.partialorder %v3551_v45, 0.0  ;;  %vm3871_vm13 = vcmp.gt.f32.partialorder %v3615_v46, 0.0 }
 0x1e8   :  { %v4446_v40 = vsel %vm3934_vm10, %v3678_v31, %v4190_v36  ;;  %v4510_v42 = vsel %vm3998_vm11, %v3742_v32, %v4254_v37 }
 0x1e9   :  { %v6248_v43 = vpack.c.bf16 %v4446_v40, %v4445_v38  ;;  %v6408_v44 = vpack.c.bf16 %v4510_v42, %v4509_v39  ;;  %v2262_v47 = vpop.f32.mrf.mxu2  ;;  %v2422_v48 = vpop.f32.mrf.mxu3  ;;  %v4319_v62 = vsel %vm3807_vm12, %v3551_v45, %v4063_v54  ;;  %v4383_v63 = vsel %vm3871_vm13, %v3615_v46, %v4127_v55 }
 0x1ea   :  { %v1944_v41 = vpop.f32.mrf.mxu0  ;;  %v2104_v49 = vpop.f32.mrf.mxu1  ;;  %v3419_v52 = vmul.f32 %v7503_v8, %v2262_v47  ;;  %v3483_v53 = vmul.f32 %v7503_v8, %v2422_v48 }
 0x1eb   :  { %6544 = vst [vmem:[%s8078_s4 + $0x2a8] sm:$0xff] %v6248_v43   ;;  %v3292_v50 = vmul.f32 %v7503_v8, %v1944_v41  ;;  %v3356_v51 = vmul.f32 %v7503_v8, %v2104_v49 }
 0x1ec   :  { %6576 = vst [vmem:[%s8078_s4 + $0x3a8] sm:$0xff] %v6408_v44   ;;  %v3679_v33 = vadd.f32 %v7493_v60, %v3419_v52  ;;  %v3743_v61 = vadd.f32 %v7493_v60, %v3483_v53 }
 0x1ed   :  { %v3552_v56 = vadd.f32 %v7493_v60, %v3292_v50  ;;  %v3616_v57 = vadd.f32 %v7493_v60, %v3356_v51 }
 0x1ee   :  { %v4191_v15 = vmul.f32 0.2, %v3679_v33  ;;  %v4255_v16 = vmul.f32 0.2, %v3743_v61  ;;  %vm3935_vm1 = vcmp.gt.f32.partialorder %v3679_v33, 0.0  ;;  %vm3999_vm2 = vcmp.gt.f32.partialorder %v3743_v61, 0.0 }
 0x1ef   :  { %vm3808_vm14 = vcmp.gt.f32.partialorder %v3552_v56, 0.0  ;;  %v4064_v58 = vmul.f32 0.2, %v3552_v56  ;;  %vm3872_vm15 = vcmp.gt.f32.partialorder %v3616_v57, 0.0  ;;  %v4128_v59 = vmul.f32 0.2, %v3616_v57 }
 0x1f0   :  { %v4447_v23 = vsel %vm3935_vm1, %v3679_v33, %v4191_v15  ;;  %v4511_v24 = vsel %vm3999_vm2, %v3743_v61, %v4255_v16 }
 0x1f1   :  { %v4320_v0 = vsel %vm3808_vm14, %v3552_v56, %v4064_v58  ;;  %v4384_v1 = vsel %vm3872_vm15, %v3616_v57, %v4128_v59  ;;  %v2264_v2 = vpop.f32.mrf.mxu2  ;;  %v2424_v3 = vpop.f32.mrf.mxu3 }
 0x1f2   :  { %v5933_v6 = vpack.c.bf16 %v4320_v0, %v4319_v62  ;;  %v6093_v7 = vpack.c.bf16 %v4384_v1, %v4383_v63  ;;  %v3420_v9 = vmul.f32 %v7503_v8, %v2264_v2  ;;  %v3484_v10 = vmul.f32 %v7503_v8, %v2424_v3  ;;  %v1947_v11 = vpop.f32.mrf.mxu0  ;;  %v2107_v12 = vpop.f32.mrf.mxu1 }
 0x1f3   :  { %v3293_v19 = vmul.f32 %v7503_v8, %v1947_v11  ;;  %v3357_v20 = vmul.f32 %v7503_v8, %v2107_v12 }
 0x1f4   :  { %6481 = vst [vmem:[%s8078_s4 + $0xb0] sm:$0xff] %v5933_v6   ;;  %v3680_v17 = vadd.f32 %v7493_v60, %v3420_v9  ;;  %v3744_v18 = vadd.f32 %v7493_v60, %v3484_v10 }
 0x1f5   :  { %6513 = vst [vmem:[%s8078_s4 + $0x1b0] sm:$0xff] %v6093_v7   ;;  %5594 = vmatmul.msk.bf16.gmra.mxu0 %vm1438_vm0, %v5722_v4  ;;  %5626 = vmatmul.msk.bf16.gmra.mxu1 %vm1438_vm0, %v5754_v5  ;;  %v3553_v29 = vadd.f32 %v7493_v60, %v3293_v19  ;;  %v3617_v30 = vadd.f32 %v7493_v60, %v3357_v20 }
 0x1f6   :  { %vm3936_vm3 = vcmp.gt.f32.partialorder %v3680_v17, 0.0  ;;  %v4192_v21 = vmul.f32 0.2, %v3680_v17  ;;  %vm4000_vm4 = vcmp.gt.f32.partialorder %v3744_v18, 0.0  ;;  %v4256_v22 = vmul.f32 0.2, %v3744_v18  ;;  %5658 = vmatmul.msk.bf16.gmra.mxu2 %vm1438_vm0, %v5786_v13  ;;  %5690 = vmatmul.msk.bf16.gmra.mxu3 %vm1438_vm0, %v5818_v14 }
 0x1f7   :  { %v4065_v40 = vmul.f32 0.2, %v3553_v29  ;;  %v4129_v42 = vmul.f32 0.2, %v3617_v30  ;;  %vm3809_vm0 = vcmp.gt.f32.partialorder %v3553_v29, 0.0  ;;  %vm3873_vm5 = vcmp.gt.f32.partialorder %v3617_v30, 0.0 }
 0x1f8   :  { %v4448_v25 = vsel %vm3936_vm3, %v3680_v17, %v4192_v21  ;;  %v4512_v26 = vsel %vm4000_vm4, %v3744_v18, %v4256_v22  ;;  %v7851_v22 = vld [vmem:[%s8077_s3] ss:$0 sm:$0xff] }
 0x1f9   :  { %v6253_v27 = vpack.c.bf16 %v4448_v25, %v4447_v23  ;;  %v6413_v28 = vpack.c.bf16 %v4512_v26, %v4511_v24  ;;  %v2267_v31 = vpop.f32.mrf.mxu2  ;;  %v2427_v32 = vpop.f32.mrf.mxu3  ;;  %v4321_v41 = vsel %vm3809_vm0, %v3553_v29, %v4065_v40  ;;  %v4385_v49 = vsel %vm3873_vm5, %v3617_v30, %v4129_v42 }
 0x1fa   :  { %v1949_v34 = vpop.f32.mrf.mxu0  ;;  %v2109_v35 = vpop.f32.mrf.mxu1  ;;  %v3421_v38 = vmul.f32 %v7503_v8, %v2267_v31  ;;  %v3485_v39 = vmul.f32 %v7503_v8, %v2427_v32 }
 0x1fb   :  { %6545 = vst [vmem:[%s8078_s4 + $0x2b0] sm:$0xff] %v6253_v27   ;;  %v3294_v36 = vmul.f32 %v7503_v8, %v1949_v34  ;;  %v3358_v37 = vmul.f32 %v7503_v8, %v2109_v35 }
 0x1fc   :  { %6577 = vst [vmem:[%s8078_s4 + $0x3b0] sm:$0xff] %v6413_v28   ;;  %v3681_v47 = vadd.f32 %v7493_v60, %v3421_v38  ;;  %v3745_v48 = vadd.f32 %v7493_v60, %v3485_v39 }
 0x1fd   :  { %v3554_v43 = vadd.f32 %v7493_v60, %v3294_v36  ;;  %v3618_v44 = vadd.f32 %v7493_v60, %v3358_v37  ;;  %v7860_v37 = vld [vmem:[%s8076_s2] ss:$0 sm:$0xff] }
 0x1fe   :  { %v4193_v33 = vmul.f32 0.2, %v3681_v47  ;;  %v4257_v61 = vmul.f32 0.2, %v3745_v48  ;;  %vm3937_vm8 = vcmp.gt.f32.partialorder %v3681_v47, 0.0  ;;  %vm4001_vm9 = vcmp.gt.f32.partialorder %v3745_v48, 0.0 }
 0x1ff   :  { %vm3810_vm6 = vcmp.gt.f32.partialorder %v3554_v43, 0.0  ;;  %v4066_v45 = vmul.f32 0.2, %v3554_v43  ;;  %vm3874_vm7 = vcmp.gt.f32.partialorder %v3618_v44, 0.0  ;;  %v4130_v46 = vmul.f32 0.2, %v3618_v44 }
 0x200   :  { %v4449_v4 = vsel %vm3937_vm8, %v3681_v47, %v4193_v33  ;;  %v4513_v5 = vsel %vm4001_vm9, %v3745_v48, %v4257_v61 }
 0x201   :  { %v4322_v50 = vsel %vm3810_vm6, %v3554_v43, %v4066_v45  ;;  %v4386_v51 = vsel %vm3874_vm7, %v3618_v44, %v4130_v46  ;;  %v2269_v52 = vpop.f32.mrf.mxu2  ;;  %v2429_v53 = vpop.f32.mrf.mxu3 }
 0x202   :  { %v5938_v54 = vpack.c.bf16 %v4322_v50, %v4321_v41  ;;  %v6098_v55 = vpack.c.bf16 %v4386_v51, %v4385_v49  ;;  %v3422_v56 = vmul.f32 %v7503_v8, %v2269_v52  ;;  %v3486_v57 = vmul.f32 %v7503_v8, %v2429_v53  ;;  %v1952_v58 = vpop.f32.mrf.mxu0  ;;  %v2112_v59 = vpop.f32.mrf.mxu1 }
 0x203   :  { %v3295_v0 = vmul.f32 %v7503_v8, %v1952_v58  ;;  %v3359_v1 = vmul.f32 %v7503_v8, %v2112_v59 }
 0x204   :  { %6482 = vst [vmem:[%s8078_s4 + $0xb8] sm:$0xff] %v5938_v54   ;;  %v3682_v62 = vadd.f32 %v7493_v60, %v3422_v56  ;;  %v3746_v63 = vadd.f32 %v7493_v60, %v3486_v57 }
 0x205   :  { %6514 = vst [vmem:[%s8078_s4 + $0x1b8] sm:$0xff] %v6098_v55   ;;  %v3555_v11 = vadd.f32 %v7493_v60, %v3295_v0  ;;  %v3619_v12 = vadd.f32 %v7493_v60, %v3359_v1 }
 0x206   :  { %vm3938_vm10 = vcmp.gt.f32.partialorder %v3682_v62, 0.0  ;;  %v4194_v2 = vmul.f32 0.2, %v3682_v62  ;;  %vm4002_vm11 = vcmp.gt.f32.partialorder %v3746_v63, 0.0  ;;  %v4258_v3 = vmul.f32 0.2, %v3746_v63 }
 0x207   :  { %v4067_v20 = vmul.f32 0.2, %v3555_v11  ;;  %v4131_v21 = vmul.f32 0.2, %v3619_v12  ;;  %vm3811_vm12 = vcmp.gt.f32.partialorder %v3555_v11, 0.0  ;;  %vm3875_vm13 = vcmp.gt.f32.partialorder %v3619_v12, 0.0 }
 0x208   :  { %v4450_v6 = vsel %vm3938_vm10, %v3682_v62, %v4194_v2  ;;  %v4514_v7 = vsel %vm4002_vm11, %v3746_v63, %v4258_v3 }
 0x209   :  { %v6258_v9 = vpack.c.bf16 %v4450_v6, %v4449_v4  ;;  %v6418_v10 = vpack.c.bf16 %v4514_v7, %v4513_v5  ;;  %v2272_v13 = vpop.f32.mrf.mxu2  ;;  %v2432_v14 = vpop.f32.mrf.mxu3  ;;  %v4323_v28 = vsel %vm3811_vm12, %v3555_v11, %v4067_v20  ;;  %v4387_v29 = vsel %vm3875_vm13, %v3619_v12, %v4131_v21 }
 0x20a   :  { %v1954_v15 = vpop.f32.mrf.mxu0  ;;  %v2114_v16 = vpop.f32.mrf.mxu1  ;;  %v3423_v19 = vmul.f32 %v7503_v8, %v2272_v13  ;;  %v3487_v60 = vmul.f32 %v7503_v8, %v2432_v14 }
 0x20b   :  { %6546 = vst [vmem:[%s8078_s4 + $0x2b8] sm:$0xff] %v6258_v9   ;;  %v3296_v17 = vmul.f32 %v7503_v8, %v1954_v15  ;;  %v3360_v18 = vmul.f32 %v7503_v8, %v2114_v16 }
 0x20c   :  { %6578 = vst [vmem:[%s8078_s4 + $0x3b8] sm:$0xff] %v6418_v10   ;;  %v3683_v27 = vadd.f32 %v7851_v22, %v3423_v19  ;;  %v3747_v8 = vadd.f32 %v7851_v22, %v3487_v60 }
 0x20d   :  { %v3556_v23 = vadd.f32 %v7851_v22, %v3296_v17  ;;  %v3620_v24 = vadd.f32 %v7851_v22, %v3360_v18 }
 0x20e   :  { %v4195_v43 = vmul.f32 0.2, %v3683_v27  ;;  %v4259_v44 = vmul.f32 0.2, %v3747_v8  ;;  %vm3939_vm1 = vcmp.gt.f32.partialorder %v3683_v27, 0.0  ;;  %vm4003_vm2 = vcmp.gt.f32.partialorder %v3747_v8, 0.0 }
 0x20f   :  { %vm3812_vm14 = vcmp.gt.f32.partialorder %v3556_v23, 0.0  ;;  %v4068_v25 = vmul.f32 0.2, %v3556_v23  ;;  %vm3876_vm15 = vcmp.gt.f32.partialorder %v3620_v24, 0.0  ;;  %v4132_v26 = vmul.f32 0.2, %v3620_v24 }
 0x210   :  { %v4451_v50 = vsel %vm3939_vm1, %v3683_v27, %v4195_v43  ;;  %v4515_v51 = vsel %vm4003_vm2, %v3747_v8, %v4259_v44 }
 0x211   :  { %v4324_v30 = vsel %vm3812_vm14, %v3556_v23, %v4068_v25  ;;  %v4388_v31 = vsel %vm3876_vm15, %v3620_v24, %v4132_v26  ;;  %v2274_v32 = vpop.f32.mrf.mxu2  ;;  %v2434_v34 = vpop.f32.mrf.mxu3 }
 0x212   :  { %v5943_v35 = vpack.c.bf16 %v4324_v30, %v4323_v28  ;;  %v6103_v36 = vpack.c.bf16 %v4388_v31, %v4387_v29  ;;  %v3424_v38 = vmul.f32 %v7860_v37, %v2274_v32  ;;  %v3488_v39 = vmul.f32 %v7860_v37, %v2434_v34  ;;  %v1957_v40 = vpop.f32.mrf.mxu0  ;;  %v2117_v42 = vpop.f32.mrf.mxu1 }
 0x213   :  { %v3297_v47 = vmul.f32 %v7860_v37, %v1957_v40  ;;  %v3361_v48 = vmul.f32 %v7860_v37, %v2117_v42 }
 0x214   :  { %6483 = vst [vmem:[%s8078_s4 + $0xc0] sm:$0xff] %v5943_v35   ;;  %v3684_v45 = vadd.f32 %v7851_v22, %v3424_v38  ;;  %v3748_v46 = vadd.f32 %v7851_v22, %v3488_v39 }
 0x215   :  { %6515 = vst [vmem:[%s8078_s4 + $0x1c0] sm:$0xff] %v6103_v36   ;;  %v3557_v56 = vadd.f32 %v7851_v22, %v3297_v47  ;;  %v3621_v57 = vadd.f32 %v7851_v22, %v3361_v48 }
 0x216   :  { %vm3940_vm3 = vcmp.gt.f32.partialorder %v3684_v45, 0.0  ;;  %v4196_v41 = vmul.f32 0.2, %v3684_v45  ;;  %vm4004_vm4 = vcmp.gt.f32.partialorder %v3748_v46, 0.0  ;;  %v4260_v49 = vmul.f32 0.2, %v3748_v46 }
 0x217   :  { %v4069_v2 = vmul.f32 0.2, %v3557_v56  ;;  %v4133_v3 = vmul.f32 0.2, %v3621_v57  ;;  %vm3813_vm0 = vcmp.gt.f32.partialorder %v3557_v56, 0.0  ;;  %vm3877_vm5 = vcmp.gt.f32.partialorder %v3621_v57, 0.0 }
 0x218   :  { %v4452_v52 = vsel %vm3940_vm3, %v3684_v45, %v4196_v41  ;;  %v4516_v53 = vsel %vm4004_vm4, %v3748_v46, %v4260_v49 }
 0x219   :  { %v6263_v54 = vpack.c.bf16 %v4452_v52, %v4451_v50  ;;  %v6423_v55 = vpack.c.bf16 %v4516_v53, %v4515_v51  ;;  %v2277_v58 = vpop.f32.mrf.mxu2  ;;  %v2437_v59 = vpop.f32.mrf.mxu3  ;;  %v4325_v11 = vsel %vm3813_vm0, %v3557_v56, %v4069_v2  ;;  %v4389_v12 = vsel %vm3877_vm5, %v3621_v57, %v4133_v3 }
 0x21a   :  { %v1959_v33 = vpop.f32.mrf.mxu0  ;;  %v2119_v61 = vpop.f32.mrf.mxu1  ;;  %v3425_v0 = vmul.f32 %v7860_v37, %v2277_v58  ;;  %v3489_v1 = vmul.f32 %v7860_v37, %v2437_v59 }
 0x21b   :  { %6547 = vst [vmem:[%s8078_s4 + $0x2c0] sm:$0xff] %v6263_v54   ;;  %v3298_v62 = vmul.f32 %v7860_v37, %v1959_v33  ;;  %v3362_v63 = vmul.f32 %v7860_v37, %v2119_v61 }
 0x21c   :  { %6579 = vst [vmem:[%s8078_s4 + $0x3c0] sm:$0xff] %v6423_v55   ;;  %v3685_v9 = vadd.f32 %v7851_v22, %v3425_v0  ;;  %v3749_v10 = vadd.f32 %v7851_v22, %v3489_v1 }
 0x21d   :  { %v3558_v4 = vadd.f32 %v7851_v22, %v3298_v62  ;;  %v3622_v5 = vadd.f32 %v7851_v22, %v3362_v63 }
 0x21e   :  { %v4197_v23 = vmul.f32 0.2, %v3685_v9  ;;  %v4261_v24 = vmul.f32 0.2, %v3749_v10  ;;  %vm3941_vm8 = vcmp.gt.f32.partialorder %v3685_v9, 0.0  ;;  %vm4005_vm9 = vcmp.gt.f32.partialorder %v3749_v10, 0.0 }
 0x21f   :  { %vm3814_vm6 = vcmp.gt.f32.partialorder %v3558_v4, 0.0  ;;  %v4070_v6 = vmul.f32 0.2, %v3558_v4  ;;  %vm3878_vm7 = vcmp.gt.f32.partialorder %v3622_v5, 0.0  ;;  %v4134_v7 = vmul.f32 0.2, %v3622_v5 }
 0x220   :  { %v4453_v30 = vsel %vm3941_vm8, %v3685_v9, %v4197_v23  ;;  %v4517_v31 = vsel %vm4005_vm9, %v3749_v10, %v4261_v24 }
 0x221   :  { %v4326_v13 = vsel %vm3814_vm6, %v3558_v4, %v4070_v6  ;;  %v4390_v14 = vsel %vm3878_vm7, %v3622_v5, %v4134_v7  ;;  %v2279_v15 = vpop.f32.mrf.mxu2  ;;  %v2439_v16 = vpop.f32.mrf.mxu3 }
 0x222   :  { %v5948_v17 = vpack.c.bf16 %v4326_v13, %v4325_v11  ;;  %v6108_v18 = vpack.c.bf16 %v4390_v14, %v4389_v12  ;;  %v3426_v19 = vmul.f32 %v7860_v37, %v2279_v15  ;;  %v3490_v60 = vmul.f32 %v7860_v37, %v2439_v16  ;;  %v1962_v20 = vpop.f32.mrf.mxu0  ;;  %v2122_v21 = vpop.f32.mrf.mxu1 }
 0x223   :  { %v3299_v27 = vmul.f32 %v7860_v37, %v1962_v20  ;;  %v3363_v8 = vmul.f32 %v7860_v37, %v2122_v21 }
 0x224   :  { %6484 = vst [vmem:[%s8078_s4 + $0xc8] sm:$0xff] %v5948_v17   ;;  %v3686_v25 = vadd.f32 %v7851_v22, %v3426_v19  ;;  %v3750_v26 = vadd.f32 %v7851_v22, %v3490_v60 }
 0x225   :  { %6516 = vst [vmem:[%s8078_s4 + $0x1c8] sm:$0xff] %v6108_v18   ;;  %v3559_v38 = vadd.f32 %v7851_v22, %v3299_v27  ;;  %v3623_v39 = vadd.f32 %v7851_v22, %v3363_v8 }
 0x226   :  { %vm3942_vm10 = vcmp.gt.f32.partialorder %v3686_v25, 0.0  ;;  %v4198_v28 = vmul.f32 0.2, %v3686_v25  ;;  %vm4006_vm11 = vcmp.gt.f32.partialorder %v3750_v26, 0.0  ;;  %v4262_v29 = vmul.f32 0.2, %v3750_v26 }
 0x227   :  { %v4071_v41 = vmul.f32 0.2, %v3559_v38  ;;  %v4135_v49 = vmul.f32 0.2, %v3623_v39  ;;  %vm3815_vm12 = vcmp.gt.f32.partialorder %v3559_v38, 0.0  ;;  %vm3879_vm13 = vcmp.gt.f32.partialorder %v3623_v39, 0.0 }
 0x228   :  { %v4454_v32 = vsel %vm3942_vm10, %v3686_v25, %v4198_v28  ;;  %v4518_v34 = vsel %vm4006_vm11, %v3750_v26, %v4262_v29 }
 0x229   :  { %v6268_v35 = vpack.c.bf16 %v4454_v32, %v4453_v30  ;;  %v6428_v36 = vpack.c.bf16 %v4518_v34, %v4517_v31  ;;  %v2282_v40 = vpop.f32.mrf.mxu2  ;;  %v2442_v42 = vpop.f32.mrf.mxu3  ;;  %v4327_v56 = vsel %vm3815_vm12, %v3559_v38, %v4071_v41  ;;  %v4391_v57 = vsel %vm3879_vm13, %v3623_v39, %v4135_v49 }
 0x22a   :  { %v1964_v43 = vpop.f32.mrf.mxu0  ;;  %v2124_v44 = vpop.f32.mrf.mxu1  ;;  %v3427_v47 = vmul.f32 %v7860_v37, %v2282_v40  ;;  %v3491_v48 = vmul.f32 %v7860_v37, %v2442_v42 }
 0x22b   :  { %6548 = vst [vmem:[%s8078_s4 + $0x2c8] sm:$0xff] %v6268_v35   ;;  %v3300_v45 = vmul.f32 %v7860_v37, %v1964_v43  ;;  %v3364_v46 = vmul.f32 %v7860_v37, %v2124_v44 }
 0x22c   :  { %6580 = vst [vmem:[%s8078_s4 + $0x3c8] sm:$0xff] %v6428_v36   ;;  %v3687_v54 = vadd.f32 %v7851_v22, %v3427_v47  ;;  %v3751_v55 = vadd.f32 %v7851_v22, %v3491_v48 }
 0x22d   :  { %v3560_v50 = vadd.f32 %v7851_v22, %v3300_v45  ;;  %v3624_v51 = vadd.f32 %v7851_v22, %v3364_v46 }
 0x22e   :  { %v4199_v4 = vmul.f32 0.2, %v3687_v54  ;;  %v4263_v5 = vmul.f32 0.2, %v3751_v55  ;;  %vm3943_vm1 = vcmp.gt.f32.partialorder %v3687_v54, 0.0  ;;  %vm4007_vm2 = vcmp.gt.f32.partialorder %v3751_v55, 0.0 }
 0x22f   :  { %vm3816_vm14 = vcmp.gt.f32.partialorder %v3560_v50, 0.0  ;;  %v4072_v52 = vmul.f32 0.2, %v3560_v50  ;;  %vm3880_vm15 = vcmp.gt.f32.partialorder %v3624_v51, 0.0  ;;  %v4136_v53 = vmul.f32 0.2, %v3624_v51 }
 0x230   :  { %v4455_v13 = vsel %vm3943_vm1, %v3687_v54, %v4199_v4  ;;  %v4519_v14 = vsel %vm4007_vm2, %v3751_v55, %v4263_v5 }
 0x231   :  { %v4328_v58 = vsel %vm3816_vm14, %v3560_v50, %v4072_v52  ;;  %v4392_v59 = vsel %vm3880_vm15, %v3624_v51, %v4136_v53  ;;  %v2284_v33 = vpop.f32.mrf.mxu2  ;;  %v2444_v61 = vpop.f32.mrf.mxu3 }
 0x232   :  { %v5953_v62 = vpack.c.bf16 %v4328_v58, %v4327_v56  ;;  %v6113_v63 = vpack.c.bf16 %v4392_v59, %v4391_v57  ;;  %v3428_v0 = vmul.f32 %v7860_v37, %v2284_v33  ;;  %v3492_v1 = vmul.f32 %v7860_v37, %v2444_v61  ;;  %v1967_v2 = vpop.f32.mrf.mxu0  ;;  %v2127_v3 = vpop.f32.mrf.mxu1 }
 0x233   :  { %v3301_v9 = vmul.f32 %v7860_v37, %v1967_v2  ;;  %v3365_v10 = vmul.f32 %v7860_v37, %v2127_v3 }
 0x234   :  { %6485 = vst [vmem:[%s8078_s4 + $0xd0] sm:$0xff] %v5953_v62   ;;  %v3688_v6 = vadd.f32 %v7851_v22, %v3428_v0  ;;  %v3752_v7 = vadd.f32 %v7851_v22, %v3492_v1 }
 0x235   :  { %6517 = vst [vmem:[%s8078_s4 + $0x1d0] sm:$0xff] %v6113_v63   ;;  %v3561_v19 = vadd.f32 %v7851_v22, %v3301_v9  ;;  %v3625_v60 = vadd.f32 %v7851_v22, %v3365_v10 }
 0x236   :  { %vm3944_vm3 = vcmp.gt.f32.partialorder %v3688_v6, 0.0  ;;  %v4200_v11 = vmul.f32 0.2, %v3688_v6  ;;  %vm4008_vm4 = vcmp.gt.f32.partialorder %v3752_v7, 0.0  ;;  %v4264_v12 = vmul.f32 0.2, %v3752_v7 }
 0x237   :  { %v4073_v28 = vmul.f32 0.2, %v3561_v19  ;;  %v4137_v29 = vmul.f32 0.2, %v3625_v60  ;;  %vm3817_vm0 = vcmp.gt.f32.partialorder %v3561_v19, 0.0  ;;  %vm3881_vm5 = vcmp.gt.f32.partialorder %v3625_v60, 0.0 }
 0x238   :  { %v4456_v15 = vsel %vm3944_vm3, %v3688_v6, %v4200_v11  ;;  %v4520_v16 = vsel %vm4008_vm4, %v3752_v7, %v4264_v12 }
 0x239   :  { %v6273_v17 = vpack.c.bf16 %v4456_v15, %v4455_v13  ;;  %v6433_v18 = vpack.c.bf16 %v4520_v16, %v4519_v14  ;;  %v2287_v20 = vpop.f32.mrf.mxu2  ;;  %v2447_v21 = vpop.f32.mrf.mxu3  ;;  %v4329_v38 = vsel %vm3817_vm0, %v3561_v19, %v4073_v28  ;;  %v4393_v39 = vsel %vm3881_vm5, %v3625_v60, %v4137_v29 }
 0x23a   :  { %v1969_v23 = vpop.f32.mrf.mxu0  ;;  %v2129_v24 = vpop.f32.mrf.mxu1  ;;  %v3429_v27 = vmul.f32 %v7860_v37, %v2287_v20  ;;  %v3493_v8 = vmul.f32 %v7860_v37, %v2447_v21 }
 0x23b   :  { %6549 = vst [vmem:[%s8078_s4 + $0x2d0] sm:$0xff] %v6273_v17   ;;  %v3302_v25 = vmul.f32 %v7860_v37, %v1969_v23  ;;  %v3366_v26 = vmul.f32 %v7860_v37, %v2129_v24 }
 0x23c   :  { %6581 = vst [vmem:[%s8078_s4 + $0x3d0] sm:$0xff] %v6433_v18   ;;  %v3689_v35 = vadd.f32 %v7851_v22, %v3429_v27  ;;  %v3753_v36 = vadd.f32 %v7851_v22, %v3493_v8 }
 0x23d   :  { %v3562_v30 = vadd.f32 %v7851_v22, %v3302_v25  ;;  %v3626_v31 = vadd.f32 %v7851_v22, %v3366_v26 }
 0x23e   :  { %v4201_v50 = vmul.f32 0.2, %v3689_v35  ;;  %v4265_v51 = vmul.f32 0.2, %v3753_v36  ;;  %vm3945_vm8 = vcmp.gt.f32.partialorder %v3689_v35, 0.0  ;;  %vm4009_vm9 = vcmp.gt.f32.partialorder %v3753_v36, 0.0 }
 0x23f   :  { %vm3818_vm6 = vcmp.gt.f32.partialorder %v3562_v30, 0.0  ;;  %v4074_v32 = vmul.f32 0.2, %v3562_v30  ;;  %vm3882_vm7 = vcmp.gt.f32.partialorder %v3626_v31, 0.0  ;;  %v4138_v34 = vmul.f32 0.2, %v3626_v31 }
 0x240   :  { %v4457_v58 = vsel %vm3945_vm8, %v3689_v35, %v4201_v50  ;;  %v4521_v59 = vsel %vm4009_vm9, %v3753_v36, %v4265_v51 }
 0x241   :  { %v4330_v40 = vsel %vm3818_vm6, %v3562_v30, %v4074_v32  ;;  %v4394_v42 = vsel %vm3882_vm7, %v3626_v31, %v4138_v34  ;;  %v2289_v43 = vpop.f32.mrf.mxu2  ;;  %v2449_v44 = vpop.f32.mrf.mxu3 }
 0x242   :  { %v5958_v45 = vpack.c.bf16 %v4330_v40, %v4329_v38  ;;  %v6118_v46 = vpack.c.bf16 %v4394_v42, %v4393_v39  ;;  %v3430_v47 = vmul.f32 %v7860_v37, %v2289_v43  ;;  %v3494_v48 = vmul.f32 %v7860_v37, %v2449_v44  ;;  %v1972_v41 = vpop.f32.mrf.mxu0  ;;  %v2132_v49 = vpop.f32.mrf.mxu1 }
 0x243   :  { %v3303_v54 = vmul.f32 %v7860_v37, %v1972_v41  ;;  %v3367_v55 = vmul.f32 %v7860_v37, %v2132_v49 }
 0x244   :  { %6486 = vst [vmem:[%s8078_s4 + $0xd8] sm:$0xff] %v5958_v45   ;;  %v3690_v52 = vadd.f32 %v7851_v22, %v3430_v47  ;;  %v3754_v53 = vadd.f32 %v7851_v22, %v3494_v48 }
 0x245   :  { %6518 = vst [vmem:[%s8078_s4 + $0x1d8] sm:$0xff] %v6118_v46   ;;  %v3563_v0 = vadd.f32 %v7851_v22, %v3303_v54  ;;  %v3627_v1 = vadd.f32 %v7851_v22, %v3367_v55 }
 0x246   :  { %vm3946_vm10 = vcmp.gt.f32.partialorder %v3690_v52, 0.0  ;;  %v4202_v56 = vmul.f32 0.2, %v3690_v52  ;;  %vm4010_vm11 = vcmp.gt.f32.partialorder %v3754_v53, 0.0  ;;  %v4266_v57 = vmul.f32 0.2, %v3754_v53 }
 0x247   :  { %v4075_v11 = vmul.f32 0.2, %v3563_v0  ;;  %v4139_v12 = vmul.f32 0.2, %v3627_v1  ;;  %vm3819_vm12 = vcmp.gt.f32.partialorder %v3563_v0, 0.0  ;;  %vm3883_vm13 = vcmp.gt.f32.partialorder %v3627_v1, 0.0 }
 0x248   :  { %v4458_v33 = vsel %vm3946_vm10, %v3690_v52, %v4202_v56  ;;  %v4522_v61 = vsel %vm4010_vm11, %v3754_v53, %v4266_v57 }
 0x249   :  { %v6278_v62 = vpack.c.bf16 %v4458_v33, %v4457_v58  ;;  %v6438_v63 = vpack.c.bf16 %v4522_v61, %v4521_v59  ;;  %v2292_v2 = vpop.f32.mrf.mxu2  ;;  %v2452_v3 = vpop.f32.mrf.mxu3  ;;  %v4331_v19 = vsel %vm3819_vm12, %v3563_v0, %v4075_v11  ;;  %v4395_v60 = vsel %vm3883_vm13, %v3627_v1, %v4139_v12 }
 0x24a   :  { %v1974_v4 = vpop.f32.mrf.mxu0  ;;  %v2134_v5 = vpop.f32.mrf.mxu1  ;;  %v3431_v9 = vmul.f32 %v7860_v37, %v2292_v2  ;;  %v3495_v10 = vmul.f32 %v7860_v37, %v2452_v3 }
 0x24b   :  { %6550 = vst [vmem:[%s8078_s4 + $0x2d8] sm:$0xff] %v6278_v62   ;;  %v3304_v6 = vmul.f32 %v7860_v37, %v1974_v4  ;;  %v3368_v7 = vmul.f32 %v7860_v37, %v2134_v5 }
 0x24c   :  { %6582 = vst [vmem:[%s8078_s4 + $0x3d8] sm:$0xff] %v6438_v63   ;;  %v3691_v17 = vadd.f32 %v7851_v22, %v3431_v9  ;;  %v3755_v18 = vadd.f32 %v7851_v22, %v3495_v10 }
 0x24d   :  { %v3564_v13 = vadd.f32 %v7851_v22, %v3304_v6  ;;  %v3628_v14 = vadd.f32 %v7851_v22, %v3368_v7 }
 0x24e   :  { %v4203_v30 = vmul.f32 0.2, %v3691_v17  ;;  %v4267_v31 = vmul.f32 0.2, %v3755_v18  ;;  %vm3947_vm1 = vcmp.gt.f32.partialorder %v3691_v17, 0.0  ;;  %vm4011_vm2 = vcmp.gt.f32.partialorder %v3755_v18, 0.0 }
 0x24f   :  { %vm3820_vm14 = vcmp.gt.f32.partialorder %v3564_v13, 0.0  ;;  %v4076_v15 = vmul.f32 0.2, %v3564_v13  ;;  %vm3884_vm15 = vcmp.gt.f32.partialorder %v3628_v14, 0.0  ;;  %v4140_v16 = vmul.f32 0.2, %v3628_v14 }
 0x250   :  { %v4459_v40 = vsel %vm3947_vm1, %v3691_v17, %v4203_v30  ;;  %v4523_v42 = vsel %vm4011_vm2, %v3755_v18, %v4267_v31 }
 0x251   :  { %v4332_v20 = vsel %vm3820_vm14, %v3564_v13, %v4076_v15  ;;  %v4396_v21 = vsel %vm3884_vm15, %v3628_v14, %v4140_v16  ;;  %v2294_v23 = vpop.f32.mrf.mxu2  ;;  %v2454_v24 = vpop.f32.mrf.mxu3 }
 0x252   :  { %v5963_v25 = vpack.c.bf16 %v4332_v20, %v4331_v19  ;;  %v6123_v26 = vpack.c.bf16 %v4396_v21, %v4395_v60  ;;  %v3432_v27 = vmul.f32 %v7860_v37, %v2294_v23  ;;  %v3496_v8 = vmul.f32 %v7860_v37, %v2454_v24  ;;  %v1977_v28 = vpop.f32.mrf.mxu0  ;;  %v2137_v29 = vpop.f32.mrf.mxu1 }
 0x253   :  { %v3305_v35 = vmul.f32 %v7860_v37, %v1977_v28  ;;  %v3369_v36 = vmul.f32 %v7860_v37, %v2137_v29 }
 0x254   :  { %6487 = vst [vmem:[%s8078_s4 + $0xe0] sm:$0xff] %v5963_v25   ;;  %v3692_v32 = vadd.f32 %v7851_v22, %v3432_v27  ;;  %v3756_v34 = vadd.f32 %v7851_v22, %v3496_v8 }
 0x255   :  { %6519 = vst [vmem:[%s8078_s4 + $0x1e0] sm:$0xff] %v6123_v26   ;;  %v3565_v47 = vadd.f32 %v7851_v22, %v3305_v35  ;;  %v3629_v48 = vadd.f32 %v7851_v22, %v3369_v36 }
 0x256   :  { %vm3948_vm3 = vcmp.gt.f32.partialorder %v3692_v32, 0.0  ;;  %v4204_v38 = vmul.f32 0.2, %v3692_v32  ;;  %vm4012_vm4 = vcmp.gt.f32.partialorder %v3756_v34, 0.0  ;;  %v4268_v39 = vmul.f32 0.2, %v3756_v34 }
 0x257   :  { %v4077_v56 = vmul.f32 0.2, %v3565_v47  ;;  %v4141_v57 = vmul.f32 0.2, %v3629_v48  ;;  %vm3821_vm0 = vcmp.gt.f32.partialorder %v3565_v47, 0.0  ;;  %vm3885_vm5 = vcmp.gt.f32.partialorder %v3629_v48, 0.0 }
 0x258   :  { %v4460_v43 = vsel %vm3948_vm3, %v3692_v32, %v4204_v38  ;;  %v4524_v44 = vsel %vm4012_vm4, %v3756_v34, %v4268_v39 }
 0x259   :  { %v6283_v45 = vpack.c.bf16 %v4460_v43, %v4459_v40  ;;  %v6443_v46 = vpack.c.bf16 %v4524_v44, %v4523_v42  ;;  %v2297_v41 = vpop.f32.mrf.mxu2  ;;  %v2457_v49 = vpop.f32.mrf.mxu3  ;;  %v4333_v0 = vsel %vm3821_vm0, %v3565_v47, %v4077_v56  ;;  %v4397_v1 = vsel %vm3885_vm5, %v3629_v48, %v4141_v57 }
 0x25a   :  { %v1979_v50 = vpop.f32.mrf.mxu0  ;;  %v2139_v51 = vpop.f32.mrf.mxu1  ;;  %v3433_v54 = vmul.f32 %v7860_v37, %v2297_v41  ;;  %v3497_v55 = vmul.f32 %v7860_v37, %v2457_v49 }
 0x25b   :  { %6551 = vst [vmem:[%s8078_s4 + $0x2e0] sm:$0xff] %v6283_v45   ;;  %v3306_v52 = vmul.f32 %v7860_v37, %v1979_v50  ;;  %v3370_v53 = vmul.f32 %v7860_v37, %v2139_v51 }
 0x25c   :  { %6583 = vst [vmem:[%s8078_s4 + $0x3e0] sm:$0xff] %v6443_v46   ;;  %v3693_v62 = vadd.f32 %v7851_v22, %v3433_v54  ;;  %v3757_v63 = vadd.f32 %v7851_v22, %v3497_v55 }
 0x25d   :  { %v3566_v58 = vadd.f32 %v7851_v22, %v3306_v52  ;;  %v3630_v59 = vadd.f32 %v7851_v22, %v3370_v53 }
 0x25e   :  { %v4205_v13 = vmul.f32 0.2, %v3693_v62  ;;  %v4269_v14 = vmul.f32 0.2, %v3757_v63  ;;  %vm3949_vm8 = vcmp.gt.f32.partialorder %v3693_v62, 0.0  ;;  %vm4013_vm9 = vcmp.gt.f32.partialorder %v3757_v63, 0.0 }
 0x25f   :  { %vm3822_vm6 = vcmp.gt.f32.partialorder %v3566_v58, 0.0  ;;  %v4078_v33 = vmul.f32 0.2, %v3566_v58  ;;  %vm3886_vm7 = vcmp.gt.f32.partialorder %v3630_v59, 0.0  ;;  %v4142_v61 = vmul.f32 0.2, %v3630_v59 }
 0x260   :  { %v4461_v20 = vsel %vm3949_vm8, %v3693_v62, %v4205_v13  ;;  %v4525_v21 = vsel %vm4013_vm9, %v3757_v63, %v4269_v14 }
 0x261   :  { %v4334_v2 = vsel %vm3822_vm6, %v3566_v58, %v4078_v33  ;;  %v4398_v3 = vsel %vm3886_vm7, %v3630_v59, %v4142_v61  ;;  %v2299_v4 = vpop.f32.mrf.mxu2  ;;  %v2459_v5 = vpop.f32.mrf.mxu3 }
 0x262   :  { %v5968_v6 = vpack.c.bf16 %v4334_v2, %v4333_v0  ;;  %v6128_v7 = vpack.c.bf16 %v4398_v3, %v4397_v1  ;;  %v3434_v9 = vmul.f32 %v7860_v37, %v2299_v4  ;;  %v3498_v10 = vmul.f32 %v7860_v37, %v2459_v5  ;;  %v1982_v11 = vpop.f32.mrf.mxu0  ;;  %v2142_v12 = vpop.f32.mrf.mxu1 }
 0x263   :  { %v3307_v17 = vmul.f32 %v7860_v37, %v1982_v11  ;;  %v3371_v18 = vmul.f32 %v7860_v37, %v2142_v12 }
 0x264   :  { %6488 = vst [vmem:[%s8078_s4 + $0xe8] sm:$0xff] %v5968_v6   ;;  %v3694_v15 = vadd.f32 %v7851_v22, %v3434_v9  ;;  %v3758_v16 = vadd.f32 %v7851_v22, %v3498_v10 }
 0x265   :  { %6520 = vst [vmem:[%s8078_s4 + $0x1e8] sm:$0xff] %v6128_v7   ;;  %v3567_v27 = vadd.f32 %v7851_v22, %v3307_v17  ;;  %v3631_v8 = vadd.f32 %v7851_v22, %v3371_v18 }
 0x266   :  { %vm3950_vm10 = vcmp.gt.f32.partialorder %v3694_v15, 0.0  ;;  %v4206_v19 = vmul.f32 0.2, %v3694_v15  ;;  %vm4014_vm11 = vcmp.gt.f32.partialorder %v3758_v16, 0.0  ;;  %v4270_v60 = vmul.f32 0.2, %v3758_v16 }
 0x267   :  { %v4079_v38 = vmul.f32 0.2, %v3567_v27  ;;  %v4143_v39 = vmul.f32 0.2, %v3631_v8  ;;  %vm3823_vm12 = vcmp.gt.f32.partialorder %v3567_v27, 0.0  ;;  %vm3887_vm13 = vcmp.gt.f32.partialorder %v3631_v8, 0.0 }
 0x268   :  { %v4462_v23 = vsel %vm3950_vm10, %v3694_v15, %v4206_v19  ;;  %v4526_v24 = vsel %vm4014_vm11, %v3758_v16, %v4270_v60 }
 0x269   :  { %v6288_v25 = vpack.c.bf16 %v4462_v23, %v4461_v20  ;;  %v6448_v26 = vpack.c.bf16 %v4526_v24, %v4525_v21  ;;  %v2302_v28 = vpop.f32.mrf.mxu2  ;;  %v2462_v29 = vpop.f32.mrf.mxu3  ;;  %v4335_v47 = vsel %vm3823_vm12, %v3567_v27, %v4079_v38  ;;  %v4399_v48 = vsel %vm3887_vm13, %v3631_v8, %v4143_v39 }
 0x26a   :  { %v1984_v30 = vpop.f32.mrf.mxu0  ;;  %v2144_v31 = vpop.f32.mrf.mxu1  ;;  %v3435_v35 = vmul.f32 %v7860_v37, %v2302_v28  ;;  %v3499_v36 = vmul.f32 %v7860_v37, %v2462_v29 }
 0x26b   :  { %6552 = vst [vmem:[%s8078_s4 + $0x2e8] sm:$0xff] %v6288_v25   ;;  %v3308_v32 = vmul.f32 %v7860_v37, %v1984_v30  ;;  %v3372_v34 = vmul.f32 %v7860_v37, %v2144_v31 }
 0x26c   :  { %6584 = vst [vmem:[%s8078_s4 + $0x3e8] sm:$0xff] %v6448_v26   ;;  %v3695_v45 = vadd.f32 %v7851_v22, %v3435_v35  ;;  %v3759_v46 = vadd.f32 %v7851_v22, %v3499_v36 }
 0x26d   :  { %v3568_v40 = vadd.f32 %v7851_v22, %v3308_v32  ;;  %v3632_v42 = vadd.f32 %v7851_v22, %v3372_v34 }
 0x26e   :  { %v4207_v58 = vmul.f32 0.2, %v3695_v45  ;;  %v4271_v59 = vmul.f32 0.2, %v3759_v46  ;;  %vm3951_vm1 = vcmp.gt.f32.partialorder %v3695_v45, 0.0  ;;  %vm4015_vm2 = vcmp.gt.f32.partialorder %v3759_v46, 0.0 }
 0x26f   :  { %vm3824_vm14 = vcmp.gt.f32.partialorder %v3568_v40, 0.0  ;;  %v4080_v43 = vmul.f32 0.2, %v3568_v40  ;;  %vm3888_vm15 = vcmp.gt.f32.partialorder %v3632_v42, 0.0  ;;  %v4144_v44 = vmul.f32 0.2, %v3632_v42 }
 0x270   :  { %v4463_v2 = vsel %vm3951_vm1, %v3695_v45, %v4207_v58  ;;  %v4527_v3 = vsel %vm4015_vm2, %v3759_v46, %v4271_v59 }
 0x271   :  { %v4336_v41 = vsel %vm3824_vm14, %v3568_v40, %v4080_v43  ;;  %v4400_v49 = vsel %vm3888_vm15, %v3632_v42, %v4144_v44  ;;  %v2304_v50 = vpop.f32.mrf.mxu2  ;;  %v2464_v51 = vpop.f32.mrf.mxu3 }
 0x272   :  { %v5973_v52 = vpack.c.bf16 %v4336_v41, %v4335_v47  ;;  %v6133_v53 = vpack.c.bf16 %v4400_v49, %v4399_v48  ;;  %v3436_v54 = vmul.f32 %v7860_v37, %v2304_v50  ;;  %v3500_v55 = vmul.f32 %v7860_v37, %v2464_v51  ;;  %v1987_v56 = vpop.f32.mrf.mxu0  ;;  %v2147_v57 = vpop.f32.mrf.mxu1 }
 0x273   :  { %v3309_v62 = vmul.f32 %v7860_v37, %v1987_v56  ;;  %v3373_v63 = vmul.f32 %v7860_v37, %v2147_v57 }
 0x274   :  { %6489 = vst [vmem:[%s8078_s4 + $0xf0] sm:$0xff] %v5973_v52   ;;  %v3696_v33 = vadd.f32 %v7851_v22, %v3436_v54  ;;  %v3760_v61 = vadd.f32 %v7851_v22, %v3500_v55 }
 0x275   :  { %6521 = vst [vmem:[%s8078_s4 + $0x1f0] sm:$0xff] %v6133_v53   ;;  %v3569_v9 = vadd.f32 %v7851_v22, %v3309_v62  ;;  %v3633_v10 = vadd.f32 %v7851_v22, %v3373_v63 }
 0x276   :  { %vm3952_vm3 = vcmp.gt.f32.partialorder %v3696_v33, 0.0  ;;  %v4208_v0 = vmul.f32 0.2, %v3696_v33  ;;  %vm4016_vm4 = vcmp.gt.f32.partialorder %v3760_v61, 0.0  ;;  %v4272_v1 = vmul.f32 0.2, %v3760_v61 }
 0x277   :  { %v4081_v19 = vmul.f32 0.2, %v3569_v9  ;;  %v4145_v60 = vmul.f32 0.2, %v3633_v10  ;;  %vm3825_vm0 = vcmp.gt.f32.partialorder %v3569_v9, 0.0  ;;  %vm3889_vm5 = vcmp.gt.f32.partialorder %v3633_v10, 0.0 }
 0x278   :  { %v4464_v4 = vsel %vm3952_vm3, %v3696_v33, %v4208_v0  ;;  %v4528_v5 = vsel %vm4016_vm4, %v3760_v61, %v4272_v1 }
 0x279   :  { %v6293_v6 = vpack.c.bf16 %v4464_v4, %v4463_v2  ;;  %v6453_v7 = vpack.c.bf16 %v4528_v5, %v4527_v3  ;;  %v2307_v11 = vpop.f32.mrf.mxu2  ;;  %v2467_v12 = vpop.f32.mrf.mxu3  ;;  %v4337_v27 = vsel %vm3825_vm0, %v3569_v9, %v4081_v19  ;;  %v4401_v8 = vsel %vm3889_vm5, %v3633_v10, %v4145_v60 }
 0x27a   :  { %v1989_v13 = vpop.f32.mrf.mxu0  ;;  %v2149_v14 = vpop.f32.mrf.mxu1  ;;  %v3437_v17 = vmul.f32 %v7860_v37, %v2307_v11  ;;  %v3501_v18 = vmul.f32 %v7860_v37, %v2467_v12 }
 0x27b   :  { %6553 = vst [vmem:[%s8078_s4 + $0x2f0] sm:$0xff] %v6293_v6   ;;  %v3310_v15 = vmul.f32 %v7860_v37, %v1989_v13  ;;  %v3374_v16 = vmul.f32 %v7860_v37, %v2149_v14 }
 0x27c   :  { %6585 = vst [vmem:[%s8078_s4 + $0x3f0] sm:$0xff] %v6453_v7   ;;  %v3697_v25 = vadd.f32 %v7851_v22, %v3437_v17  ;;  %v3761_v26 = vadd.f32 %v7851_v22, %v3501_v18 }
 0x27d   :  { %v3570_v20 = vadd.f32 %v7851_v22, %v3310_v15  ;;  %v3634_v21 = vadd.f32 %v7851_v22, %v3374_v16 }
 0x27e   :  { %v4209_v38 = vmul.f32 0.2, %v3697_v25  ;;  %v4273_v39 = vmul.f32 0.2, %v3761_v26  ;;  %vm3953_vm8 = vcmp.gt.f32.partialorder %v3697_v25, 0.0  ;;  %vm4017_vm9 = vcmp.gt.f32.partialorder %v3761_v26, 0.0 }
 0x27f   :  { %vm3826_vm6 = vcmp.gt.f32.partialorder %v3570_v20, 0.0  ;;  %v4082_v23 = vmul.f32 0.2, %v3570_v20  ;;  %vm3890_vm7 = vcmp.gt.f32.partialorder %v3634_v21, 0.0  ;;  %v4146_v24 = vmul.f32 0.2, %v3634_v21 }
 0x280   :  { %v4465_v44 = vsel %vm3953_vm8, %v3697_v25, %v4209_v38  ;;  %v4529_v45 = vsel %vm4017_vm9, %v3761_v26, %v4273_v39 }
 0x281   :  { %v4338_v28 = vsel %vm3826_vm6, %v3570_v20, %v4082_v23  ;;  %v4402_v29 = vsel %vm3890_vm7, %v3634_v21, %v4146_v24  ;;  %v2309_v30 = vpop.f32.mrf.mxu2  ;;  %v2469_v31 = vpop.f32.mrf.mxu3 }
 0x282   :  { %v5978_v32 = vpack.c.bf16 %v4338_v28, %v4337_v27  ;;  %v6138_v34 = vpack.c.bf16 %v4402_v29, %v4401_v8  ;;  %v3438_v35 = vmul.f32 %v7860_v37, %v2309_v30  ;;  %v3502_v36 = vmul.f32 %v7860_v37, %v2469_v31 }
 0x284   :  { %6490 = vst [vmem:[%s8078_s4 + $0xf8] sm:$0xff] %v5978_v32   ;;  %v3698_v40 = vadd.f32 %v7851_v22, %v3438_v35  ;;  %v3762_v42 = vadd.f32 %v7851_v22, %v3502_v36 }
 0x285   :  { %6522 = vst [vmem:[%s8078_s4 + $0x1f8] sm:$0xff] %v6138_v34  }
 0x286   :  { %vm3954_vm10 = vcmp.gt.f32.partialorder %v3698_v40, 0.0  ;;  %v4210_v43 = vmul.f32 0.2, %v3698_v40  ;;  %vm4018_vm11 = vcmp.gt.f32.partialorder %v3762_v42, 0.0  ;;  %v4274_v37 = vmul.f32 0.2, %v3762_v42 }
 0x288   :  { %v4466_v46 = vsel %vm3954_vm10, %v3698_v40, %v4210_v43  ;;  %v4530_v47 = vsel %vm4018_vm11, %v3762_v42, %v4274_v37 }
 0x289   :  { %v6298_v48 = vpack.c.bf16 %v4466_v46, %v4465_v44  ;;  %v6458_v41 = vpack.c.bf16 %v4530_v47, %v4529_v45 }
 0x28b   :  { %6554 = vst [vmem:[%s8078_s4 + $0x2f8] sm:$0xff] %v6298_v48  }
 0x28c   :  { %6586 = vst [vmem:[%s8078_s4 + $0x3f8] sm:$0xff] %v6458_v41  }

// kernel: discriminator_forward.6
= control target key start
LH: loop header
LB: loop body
LE: loop exit
PB: predicated region body
PF: predicated region fallthrough
CT: control target
= control target key end

     0   :  { %s1078_s1 = inlined_call_operand.vmem [shape: bf16[256,128], index: 1, kind: input, shape index: {}]   ;;  %s1079_s0 = inlined_call_operand.vmem [shape: bf16[128,256], index: 0, kind: input, shape index: {}]   ;;  %s1080_s2 = inlined_call_operand.vmem [shape: f32[1,128], index: 2, kind: input, shape index: {}]   ;;  %s1081_s3 = inlined_call_operand.vmem [shape: f32[1,128], index: 3, kind: input, shape index: {}]   ;;  %s1082_s4 = inlined_call_operand.vmem [shape: bf16[128,128], index: 4, kind: output, shape index: {0}]   ;;  %s1083_s5 = inlined_call_operand.vmem [shape: f32[8,128], index: 5, kind: output, shape index: {1}]  }
   0x1   :  { %v725_v0 = vld [vmem:[%s1078_s1 + $0x38] sm:$0xff]  ;;  %v724_v2 = vld [vmem:[%s1078_s1 + $0x30] sm:$0xff]  ;;  %v723_v4 = vld [vmem:[%s1078_s1 + $0x28] sm:$0xff] }
   0x2   :  { %v733_v1 = vld [vmem:[%s1078_s1 + $0x78] sm:$0xff]  ;;  %279 = vmatpush.bf16.msra.mxu0 %v725_v0  ;;  %v732_v3 = vld [vmem:[%s1078_s1 + $0x70] sm:$0xff]  ;;  %781 = vmatpush.bf16.msra.mxu2 %v725_v0  ;;  %v731_v5 = vld [vmem:[%s1078_s1 + $0x68] sm:$0xff] }
   0x3   :  { %328 = vmatpush.bf16.msra.mxu1 %v733_v1  ;;  %789 = vmatpush.bf16.msra.mxu3 %v733_v1  ;;  %v722_v6 = vld [vmem:[%s1078_s1 + $0x20] sm:$0xff]  ;;  %v721_v8 = vld [vmem:[%s1078_s1 + $0x18] sm:$0xff]  ;;  %v720_v10 = vld [vmem:[%s1078_s1 + $0x10] sm:$0xff] }
   0x4   :  { %v730_v7 = vld [vmem:[%s1078_s1 + $0x60] sm:$0xff]  ;;  %v729_v9 = vld [vmem:[%s1078_s1 + $0x58] sm:$0xff]  ;;  %v728_v11 = vld [vmem:[%s1078_s1 + $0x50] sm:$0xff] }
   0x5   :  { %v719_v12 = vld [vmem:[%s1078_s1 + $0x8] sm:$0xff]  ;;  %v718_v14 = vld [vmem:[%s1078_s1] sm:$0xff]  ;;  %v584_v28 = vld [vmem:[%s1079_s0 + $0x10] sm:$0xf] }
   0x6   :  { %280 = vmatpush.bf16.msra.mxu0 %v724_v2  ;;  %782 = vmatpush.bf16.msra.mxu2 %v724_v2  ;;  %v727_v13 = vld [vmem:[%s1078_s1 + $0x48] sm:$0xff]  ;;  %v726_v15 = vld [vmem:[%s1078_s1 + $0x40] sm:$0xff]  ;;  %v705_v29 = vld [vmem:[%s1079_s0 + $0x14] sm:$0xf0] }
   0x7   :  { %329 = vmatpush.bf16.msra.mxu1 %v732_v3  ;;  %790 = vmatpush.bf16.msra.mxu3 %v732_v3  ;;  %v576_v16 = vld [vmem:[%s1079_s0] sm:$0xf]  ;;  %v703_v17 = vld [vmem:[%s1079_s0 + $0x4] sm:$0xf0]  ;;  %v702_v18 = vld [vmem:[%s1079_s0 + $0x4] sm:$0xf]  ;;  %v585_v36 = vor.u32 %v705_v29, %v584_v28 }
   0x8   :  { %v578_v19 = vld [vmem:[%s1079_s0 + $0x8] sm:$0xf0]  ;;  %v608_v20 = vld [vmem:[%s1079_s0 + $0x40] sm:$0xf]  ;;  %v711_v21 = vld [vmem:[%s1079_s0 + $0x44] sm:$0xf0]  ;;  %v577_v24 = vor.u32 %v703_v17, %v576_v16 }
   0x9   :  { %v710_v22 = vld [vmem:[%s1079_s0 + $0x44] sm:$0xf]  ;;  %v610_v23 = vld [vmem:[%s1079_s0 + $0x48] sm:$0xf0]  ;;  %v581_v25 = vor.u32 %v702_v18, %v578_v19  ;;  %v609_v26 = vor.u32 %v711_v21, %v608_v20  ;;  %v704_v30 = vld [vmem:[%s1079_s0 + $0x14] sm:$0xf] }
   0xa   :  { %281 = vmatpush.bf16.msra.mxu0 %v723_v4  ;;  %783 = vmatpush.bf16.msra.mxu2 %v723_v4  ;;  %v613_v27 = vor.u32 %v710_v22, %v610_v23  ;;  %v586_v31 = vld [vmem:[%s1079_s0 + $0x18] sm:$0xf0]  ;;  %v616_v32 = vld [vmem:[%s1079_s0 + $0x50] sm:$0xf]  ;;  %v713_v33 = vld [vmem:[%s1079_s0 + $0x54] sm:$0xf0] }
   0xb   :  { %330 = vmatpush.bf16.msra.mxu1 %v731_v5  ;;  %791 = vmatpush.bf16.msra.mxu3 %v731_v5  ;;  %v712_v34 = vld [vmem:[%s1079_s0 + $0x54] sm:$0xf]  ;;  %v618_v35 = vld [vmem:[%s1079_s0 + $0x58] sm:$0xf0]  ;;  %v589_v37 = vor.u32 %v704_v30, %v586_v31  ;;  %v617_v38 = vor.u32 %v713_v33, %v616_v32  ;;  %v592_v40 = vld [vmem:[%s1079_s0 + $0x20] sm:$0xf] }
   0xc   :  { %v621_v39 = vor.u32 %v712_v34, %v618_v35  ;;  %v707_v41 = vld [vmem:[%s1079_s0 + $0x24] sm:$0xf0]  ;;  %v706_v42 = vld [vmem:[%s1079_s0 + $0x24] sm:$0xf]  ;;  %v594_v43 = vld [vmem:[%s1079_s0 + $0x28] sm:$0xf0] }
   0xd   :  { %v624_v44 = vld [vmem:[%s1079_s0 + $0x60] sm:$0xf]  ;;  %v715_v45 = vld [vmem:[%s1079_s0 + $0x64] sm:$0xf0]  ;;  %v714_v46 = vld [vmem:[%s1079_s0 + $0x64] sm:$0xf]  ;;  %v593_v48 = vor.u32 %v707_v41, %v592_v40  ;;  %v597_v49 = vor.u32 %v706_v42, %v594_v43 }
   0xe   :  { %282 = vmatpush.bf16.msra.mxu0 %v722_v6  ;;  %784 = vmatpush.bf16.msra.mxu2 %v722_v6  ;;  %v626_v47 = vld [vmem:[%s1079_s0 + $0x68] sm:$0xf0]  ;;  %v625_v50 = vor.u32 %v715_v45, %v624_v44  ;;  %v600_v52 = vld [vmem:[%s1079_s0 + $0x30] sm:$0xf]  ;;  %v709_v53 = vld [vmem:[%s1079_s0 + $0x34] sm:$0xf0] }
   0xf   :  { %331 = vmatpush.bf16.msra.mxu1 %v730_v7  ;;  %792 = vmatpush.bf16.msra.mxu3 %v730_v7  ;;  %v629_v51 = vor.u32 %v714_v46, %v626_v47  ;;  %v708_v54 = vld [vmem:[%s1079_s0 + $0x34] sm:$0xf]  ;;  %v602_v55 = vld [vmem:[%s1079_s0 + $0x38] sm:$0xf0]  ;;  %v632_v56 = vld [vmem:[%s1079_s0 + $0x70] sm:$0xf]  ;;  %v601_v60 = vor.u32 %v709_v53, %v600_v52 }
  0x10   :  { %v717_v57 = vld [vmem:[%s1079_s0 + $0x74] sm:$0xf0]  ;;  %v716_v58 = vld [vmem:[%s1079_s0 + $0x74] sm:$0xf]  ;;  %v634_v59 = vld [vmem:[%s1079_s0 + $0x78] sm:$0xf0]  ;;  %v605_v61 = vor.u32 %v708_v54, %v602_v55 }
  0x11   :  { %v633_v62 = vor.u32 %v717_v57, %v632_v56  ;;  %v637_v63 = vor.u32 %v716_v58, %v634_v59  ;;  %v976_v3 = vld [vmem:[%s1080_s2] ss:$0 sm:$0xff] }
  0x12   :  { %283 = vmatpush.bf16.msra.mxu0 %v721_v8  ;;  %785 = vmatpush.bf16.msra.mxu2 %v721_v8 }
  0x13   :  { %332 = vmatpush.bf16.msra.mxu1 %v729_v9  ;;  %793 = vmatpush.bf16.msra.mxu3 %v729_v9  ;;  %v982_v9 = vld [vmem:[%s1081_s3] ss:$0 sm:$0xff] }
  0x16   :  { %284 = vmatpush.bf16.msra.mxu0 %v720_v10  ;;  %786 = vmatpush.bf16.msra.mxu2 %v720_v10 }
  0x17   :  { %333 = vmatpush.bf16.msra.mxu1 %v728_v11  ;;  %794 = vmatpush.bf16.msra.mxu3 %v728_v11 }
  0x1a   :  { %285 = vmatpush.bf16.msra.mxu0 %v719_v12  ;;  %787 = vmatpush.bf16.msra.mxu2 %v719_v12 }
  0x1b   :  { %334 = vmatpush.bf16.msra.mxu1 %v727_v13  ;;  %795 = vmatpush.bf16.msra.mxu3 %v727_v13 }
  0x1e   :  { %286 = vmatpush.bf16.msra.mxu0 %v718_v14  ;;  %788 = vmatpush.bf16.msra.mxu2 %v718_v14 }
  0x1f   :  { %335 = vmatpush.bf16.msra.mxu1 %v726_v15  ;;  %796 = vmatpush.bf16.msra.mxu3 %v726_v15 }
  0x21   :  { %287 = vmatmul.bf16.vlgmr.msra.gmra.mxu0 %v577_v24  ;;  %307 = vmatmul.bf16.vlgmr.msra.gmra.mxu2 %v609_v26 }
  0x22   :  { %336 = vmatmul.bf16.vlgmr.msra.gmra.mxu1 %v581_v25  ;;  %356 = vmatmul.bf16.vlgmr.msra.gmra.mxu3 %v613_v27 }
  0x31   :  { %292 = vmatmul.bf16.gmra.mxu0 %v585_v36  ;;  %312 = vmatmul.bf16.gmra.mxu2 %v617_v38 }
  0x32   :  { %341 = vmatmul.bf16.gmra.mxu1 %v589_v37  ;;  %361 = vmatmul.bf16.gmra.mxu3 %v621_v39 }
  0x41   :  { %297 = vmatmul.bf16.gmra.mxu0 %v593_v48  ;;  %317 = vmatmul.bf16.gmra.mxu2 %v625_v50 }
  0x42   :  { %346 = vmatmul.bf16.gmra.mxu1 %v597_v49  ;;  %366 = vmatmul.bf16.gmra.mxu3 %v629_v51 }
  0x51   :  { %302 = vmatmul.bf16.gmra.mxu0 %v601_v60  ;;  %322 = vmatmul.bf16.gmra.mxu2 %v633_v62 }
  0x52   :  { %351 = vmatmul.bf16.gmra.mxu1 %v605_v61  ;;  %371 = vmatmul.bf16.gmra.mxu3 %v637_v63 }
  0x9e   :  { %v288_v0 = vpop.f32.mrf.mxu0 }
  0x9f   :  { %v337_v1 = vpop.f32.mrf.mxu1 }
  0xa0   :  { %v338_v2 = vadd.f32 %v337_v1, %v288_v0 }
  0xa2   :  { %v432_v8 = vmul.f32 %v976_v3, %v338_v2 }
  0xa4   :  { %v308_v4 = vpop.f32.mrf.mxu2  ;;  %v986_v13 = vadd.f32 %v982_v9, %v432_v8 }
  0xa5   :  { %v357_v5 = vpop.f32.mrf.mxu3 }
  0xa6   :  { %v290_v6 = vpop.f32.mrf.mxu0  ;;  %v358_v11 = vadd.f32 %v357_v5, %v308_v4 }
  0xa7   :  { %v339_v7 = vpop.f32.mrf.mxu1 }
  0xa8   :  { %v340_v10 = vadd.f32 %v339_v7, %v290_v6  ;;  %v440_v15 = vmul.f32 %v976_v3, %v358_v11  ;;  %v521_v7 = vmul.f32 %v986_v13, %v986_v13 }
  0xaa   :  { %v433_v12 = vmul.f32 %v976_v3, %v340_v10  ;;  %v998_v22 = vadd.f32 %v982_v9, %v440_v15 }
  0xac   :  { %v989_v14 = vadd.f32 %v982_v9, %v433_v12  ;;  %v310_v17 = vpop.f32.mrf.mxu2 }
  0xad   :  { %v359_v18 = vpop.f32.mrf.mxu3 }
  0xae   :  { %v737_v16 = vpack.c.bf16 %v989_v14, %v986_v13  ;;  %v293_v19 = vpop.f32.mrf.mxu0  ;;  %v360_v21 = vadd.f32 %v359_v18, %v310_v17  ;;  %v522_v2 = vmul.f32 %v989_v14, %v989_v14  ;;  %v500_v8 = vadd.f32 %v989_v14, %v986_v13 }
  0xaf   :  { %v342_v20 = vpop.f32.mrf.mxu1 }
  0xb0   :  { %738 = vst [vmem:[%s1082_s4] sm:$0xff] %v737_v16   ;;  %v441_v23 = vmul.f32 %v976_v3, %v360_v21  ;;  %v343_v25 = vadd.f32 %v342_v20, %v293_v19  ;;  %v537_v15 = vadd.f32 %v522_v2, %v521_v7 }
  0xb2   :  { %v1002_v24 = vadd.f32 %v982_v9, %v441_v23  ;;  %v434_v31 = vmul.f32 %v976_v3, %v343_v25 }
  0xb4   :  { %v757_v26 = vpack.c.bf16 %v1002_v24, %v998_v22  ;;  %v313_v27 = vpop.f32.mrf.mxu2  ;;  %v454_v35 = vadd.f32 %v982_v9, %v434_v31 }
  0xb5   :  { %v362_v28 = vpop.f32.mrf.mxu3 }
  0xb6   :  { %777 = vst [vmem:[%s1082_s4 + $0x20] sm:$0xff] %v757_v26   ;;  %v295_v29 = vpop.f32.mrf.mxu0  ;;  %v363_v33 = vadd.f32 %v362_v28, %v313_v27  ;;  %v523_v10 = vmul.f32 %v454_v35, %v454_v35  ;;  %v501_v16 = vadd.f32 %v500_v8, %v454_v35 }
  0xb7   :  { %v344_v30 = vpop.f32.mrf.mxu1 }
  0xb8   :  { %v345_v32 = vadd.f32 %v344_v30, %v295_v29  ;;  %v442_v37 = vmul.f32 %v976_v3, %v363_v33  ;;  %v538_v19 = vadd.f32 %v537_v15, %v523_v10 }
  0xba   :  { %v435_v34 = vmul.f32 %v976_v3, %v345_v32  ;;  %v1018_v44 = vadd.f32 %v982_v9, %v442_v37 }
  0xbc   :  { %v455_v36 = vadd.f32 %v982_v9, %v435_v34  ;;  %v315_v39 = vpop.f32.mrf.mxu2 }
  0xbd   :  { %v364_v40 = vpop.f32.mrf.mxu3 }
  0xbe   :  { %v742_v38 = vpack.c.bf16 %v455_v36, %v454_v35  ;;  %v298_v41 = vpop.f32.mrf.mxu0  ;;  %v365_v43 = vadd.f32 %v364_v40, %v315_v39  ;;  %v524_v17 = vmul.f32 %v455_v36, %v455_v36  ;;  %v502_v20 = vadd.f32 %v501_v16, %v455_v36 }
  0xbf   :  { %v347_v42 = vpop.f32.mrf.mxu1 }
  0xc0   :  { %774 = vst [vmem:[%s1082_s4 + $0x8] sm:$0xff] %v742_v38   ;;  %v443_v45 = vmul.f32 %v976_v3, %v365_v43  ;;  %v348_v47 = vadd.f32 %v347_v42, %v298_v41  ;;  %v539_v27 = vadd.f32 %v538_v19, %v524_v17  ;;  %v558_v17 = vlaneseq }
  0xc2   :  { %v1022_v46 = vadd.f32 %v982_v9, %v443_v45  ;;  %v436_v53 = vmul.f32 %v976_v3, %v348_v47 }
  0xc4   :  { %v762_v48 = vpack.c.bf16 %v1022_v46, %v1018_v44  ;;  %v318_v49 = vpop.f32.mrf.mxu2  ;;  %v456_v57 = vadd.f32 %v982_v9, %v436_v53 }
  0xc5   :  { %v367_v50 = vpop.f32.mrf.mxu3 }
  0xc6   :  { %778 = vst [vmem:[%s1082_s4 + $0x28] sm:$0xff] %v762_v48   ;;  %v300_v51 = vpop.f32.mrf.mxu0  ;;  %v368_v55 = vadd.f32 %v367_v50, %v318_v49  ;;  %v525_v21 = vmul.f32 %v456_v57, %v456_v57  ;;  %v503_v28 = vadd.f32 %v502_v20, %v456_v57  ;;  %v529_v49 = vmul.f32 %v998_v22, %v998_v22 }
  0xc7   :  { %v349_v52 = vpop.f32.mrf.mxu1 }
  0xc8   :  { %v350_v54 = vadd.f32 %v349_v52, %v300_v51  ;;  %v444_v59 = vmul.f32 %v976_v3, %v368_v55  ;;  %v540_v32 = vadd.f32 %v539_v27, %v525_v21 }
  0xca   :  { %v437_v56 = vmul.f32 %v976_v3, %v350_v54  ;;  %v464_v5 = vadd.f32 %v982_v9, %v444_v59  ;;  %v530_v54 = vmul.f32 %v1002_v24, %v1002_v24 }
  0xcc   :  { %v457_v58 = vadd.f32 %v982_v9, %v437_v56  ;;  %v320_v61 = vpop.f32.mrf.mxu2 }
  0xcd   :  { %v369_v62 = vpop.f32.mrf.mxu3 }
  0xce   :  { %v747_v60 = vpack.c.bf16 %v457_v58, %v456_v57  ;;  %v303_v63 = vpop.f32.mrf.mxu0  ;;  %v370_v1 = vadd.f32 %v369_v62, %v320_v61  ;;  %v526_v29 = vmul.f32 %v457_v58, %v457_v58  ;;  %v504_v33 = vadd.f32 %v503_v28, %v457_v58 }
  0xcf   :  { %v352_v0 = vpop.f32.mrf.mxu1  ;;  %v531_v58 = vmul.f32 %v1018_v44, %v1018_v44  ;;  %v532_v61 = vmul.f32 %v1022_v46, %v1022_v46 }
  0xd0   :  { %775 = vst [vmem:[%s1082_s4 + $0x10] sm:$0xff] %v747_v60   ;;  %v353_v4 = vadd.f32 %v352_v0, %v303_v63  ;;  %v445_v6 = vmul.f32 %v976_v3, %v370_v1  ;;  %v541_v36 = vadd.f32 %v540_v32, %v526_v29 }
  0xd2   :  { %v438_v11 = vmul.f32 %v976_v3, %v353_v4  ;;  %v465_v12 = vadd.f32 %v982_v9, %v445_v6 }
  0xd4   :  { %v767_v18 = vpack.c.bf16 %v465_v12, %v464_v5  ;;  %v458_v23 = vadd.f32 %v982_v9, %v438_v11  ;;  %v323_v25 = vpop.f32.mrf.mxu2  ;;  %v534_v0 = vmul.f32 %v465_v12, %v465_v12 }
  0xd5   :  { %v372_v26 = vpop.f32.mrf.mxu3 }
  0xd6   :  { %779 = vst [vmem:[%s1082_s4 + $0x30] sm:$0xff] %v767_v18   ;;  %v305_v13 = vpop.f32.mrf.mxu0  ;;  %v373_v31 = vadd.f32 %v372_v26, %v323_v25  ;;  %v527_v34 = vmul.f32 %v458_v23, %v458_v23  ;;  %v505_v37 = vadd.f32 %v504_v33, %v458_v23 }
  0xd7   :  { %v354_v14 = vpop.f32.mrf.mxu1 }
  0xd8   :  { %v355_v30 = vadd.f32 %v354_v14, %v305_v13  ;;  %v446_v39 = vmul.f32 %v976_v3, %v373_v31  ;;  %v542_v40 = vadd.f32 %v541_v36, %v527_v34 }
  0xda   :  { %v439_v35 = vmul.f32 %v976_v3, %v355_v30  ;;  %v466_v52 = vadd.f32 %v982_v9, %v446_v39 }
  0xdc   :  { %v459_v38 = vadd.f32 %v982_v9, %v439_v35  ;;  %v325_v45 = vpop.f32.mrf.mxu2 }
  0xdd   :  { %v374_v47 = vpop.f32.mrf.mxu3 }
  0xde   :  { %v752_v41 = vpack.c.bf16 %v459_v38, %v458_v23  ;;  %v506_v42 = vadd.f32 %v505_v37, %v459_v38  ;;  %v528_v43 = vmul.f32 %v459_v38, %v459_v38  ;;  %v375_v48 = vadd.f32 %v374_v47, %v325_v45 }
  0xe0   :  { %776 = vst [vmem:[%s1082_s4 + $0x18] sm:$0xff] %v752_v41   ;;  %v507_v50 = vadd.f32 %v506_v42, %v998_v22  ;;  %v543_v51 = vadd.f32 %v542_v40, %v528_v43  ;;  %v447_v53 = vmul.f32 %v976_v3, %v375_v48 }
  0xe2   :  { %v508_v55 = vadd.f32 %v507_v50, %v1002_v24  ;;  %v544_v56 = vadd.f32 %v543_v51, %v529_v49  ;;  %v467_v57 = vadd.f32 %v982_v9, %v447_v53  ;;  %v533_v24 = vmul.f32 %v464_v5, %v464_v5 }
  0xe4   :  { %v509_v59 = vadd.f32 %v508_v55, %v1018_v44  ;;  %v545_v60 = vadd.f32 %v544_v56, %v530_v54  ;;  %v772_v22 = vpack.c.bf16 %v467_v57, %v466_v52  ;;  %v535_v44 = vmul.f32 %v466_v52, %v466_v52 }
  0xe5   :  { %v536_v10 = vmul.f32 %v467_v57, %v467_v57 }
  0xe6   :  { %v546_v62 = vadd.f32 %v545_v60, %v531_v58  ;;  %v510_v3 = vadd.f32 %v509_v59, %v1022_v46  ;;  %780 = vst [vmem:[%s1082_s4 + $0x38] sm:$0xff] %v772_v22  }
  0xe8   :  { %v511_v63 = vadd.f32 %v510_v3, %v464_v5  ;;  %v547_v9 = vadd.f32 %v546_v62, %v532_v61  ;;  %v559_v5 = vshrl.u32 %v558_v17, 7 }
  0xea   :  { %v512_v1 = vadd.f32 %v511_v63, %v465_v12  ;;  %v548_v2 = vadd.f32 %v547_v9, %v533_v24  ;;  %vm560_vm0 = vcmp.eq.s32.totalorder %v559_v5, 0  ;;  %vm562_vm1 = vcmp.eq.s32.totalorder %v559_v5, 1 }
  0xec   :  { %v513_v4 = vadd.f32 %v512_v1, %v466_v52  ;;  %v549_v6 = vadd.f32 %v548_v2, %v534_v0 }
  0xee   :  { %v550_v7 = vadd.f32 %v549_v6, %v535_v44  ;;  %v514_v8 = vadd.f32 %v513_v4, %v467_v57 }
  0xf0   :  { %v515_v11 = vrot.slane %v514_v8, 4  ;;  %v551_v15 = vadd.f32 %v550_v7, %v536_v10 }
  0xf2   :  { %v516_v16 = vadd.f32 %v515_v11, %v514_v8  ;;  %v552_v46 = vrot.slane %v551_v15, 4 }
  0xf4   :  { %v517_v18 = vrot.slane %v516_v16, 2  ;;  %v553_v19 = vadd.f32 %v552_v46, %v551_v15 }
  0xf6   :  { %v518_v20 = vadd.f32 %v517_v18, %v516_v16  ;;  %v554_v21 = vrot.slane %v553_v19, 2 }
  0xf8   :  { %v519_v23 = vrot.slane %v518_v20, 1  ;;  %v555_v25 = vadd.f32 %v554_v21, %v553_v19 }
  0xfa   :  { %v520_v12 = vadd.f32 %v519_v23, %v518_v20  ;;  %v556_v26 = vrot.slane %v555_v25, 1 }
  0xfc   :  { %v557_v13 = vadd.f32 %v556_v26, %v555_v25  ;;  %v561_v14 = vsel %vm560_vm0, %v520_v12, 0.0 }
  0xfe   :  { %v563_v27 = vsel %vm562_vm1, %v557_v13, 0.0 }
  0xff   :  { %v564_v28 = vadd.f32 %v563_v27, %v561_v14 }
 0x101   :  { %565 = vst [vmem:[%s1083_s5] sm:$0xff] %v564_v28 }

// kernel: discriminator_forward.7
= control target key start
LH: loop header
LB: loop body
LE: loop exit
PB: predicated region body
PF: predicated region fallthrough
CT: control target
= control target key end

     0   :  { %s890_s1 = inlined_call_operand.vmem [shape: bf16[512,128], index: 1, kind: input, shape index: {}]   ;;  %s891_s0 = inlined_call_operand.vmem [shape: bf16[32,512], index: 0, kind: input, shape index: {}]   ;;  %s892_s2 = inlined_call_operand.vmem [shape: f32[1,128], index: 2, kind: input, shape index: {}]   ;;  %s893_s3 = inlined_call_operand.vmem [shape: f32[1,128], index: 3, kind: input, shape index: {}]   ;;  %s894_s4 = inlined_call_operand.vmem [shape: bf16[32,128], index: 4, kind: output, shape index: {0}]   ;;  %s895_s5 = inlined_call_operand.vmem [shape: f32[8,128], index: 5, kind: output, shape index: {1}]  }
   0x1   :  { %v663_v0 = vld [vmem:[%s890_s1 + $0x38] sm:$0xff]  ;;  %v662_v4 = vld [vmem:[%s890_s1 + $0x30] sm:$0xff]  ;;  %v661_v8 = vld [vmem:[%s890_s1 + $0x28] sm:$0xff] }
   0x2   :  { %v671_v1 = vld [vmem:[%s890_s1 + $0x78] sm:$0xff]  ;;  %335 = vmatpush.bf16.msra.mxu0 %v663_v0  ;;  %v670_v5 = vld [vmem:[%s890_s1 + $0x70] sm:$0xff]  ;;  %v669_v9 = vld [vmem:[%s890_s1 + $0x68] sm:$0xff] }
   0x3   :  { %v679_v2 = vld [vmem:[%s890_s1 + $0xb8] sm:$0xff]  ;;  %354 = vmatpush.bf16.msra.mxu1 %v671_v1  ;;  %v678_v6 = vld [vmem:[%s890_s1 + $0xb0] sm:$0xff]  ;;  %v677_v10 = vld [vmem:[%s890_s1 + $0xa8] sm:$0xff] }
   0x4   :  { %v687_v3 = vld [vmem:[%s890_s1 + $0xf8] sm:$0xff]  ;;  %373 = vmatpush.bf16.msra.mxu2 %v679_v2  ;;  %v686_v7 = vld [vmem:[%s890_s1 + $0xf0] sm:$0xff]  ;;  %v685_v11 = vld [vmem:[%s890_s1 + $0xe8] sm:$0xff] }
   0x5   :  { %392 = vmatpush.bf16.msra.mxu3 %v687_v3  ;;  %v660_v12 = vld [vmem:[%s890_s1 + $0x20] sm:$0xff]  ;;  %v659_v16 = vld [vmem:[%s890_s1 + $0x18] sm:$0xff]  ;;  %v658_v20 = vld [vmem:[%s890_s1 + $0x10] sm:$0xff] }
   0x6   :  { %336 = vmatpush.bf16.msra.mxu0 %v662_v4  ;;  %v668_v13 = vld [vmem:[%s890_s1 + $0x60] sm:$0xff]  ;;  %v667_v17 = vld [vmem:[%s890_s1 + $0x58] sm:$0xff]  ;;  %v666_v21 = vld [vmem:[%s890_s1 + $0x50] sm:$0xff] }
   0x7   :  { %355 = vmatpush.bf16.msra.mxu1 %v670_v5  ;;  %v676_v14 = vld [vmem:[%s890_s1 + $0xa0] sm:$0xff]  ;;  %v675_v18 = vld [vmem:[%s890_s1 + $0x98] sm:$0xff]  ;;  %v674_v22 = vld [vmem:[%s890_s1 + $0x90] sm:$0xff] }
   0x8   :  { %374 = vmatpush.bf16.msra.mxu2 %v678_v6  ;;  %v684_v15 = vld [vmem:[%s890_s1 + $0xe0] sm:$0xff]  ;;  %v683_v19 = vld [vmem:[%s890_s1 + $0xd8] sm:$0xff]  ;;  %v682_v23 = vld [vmem:[%s890_s1 + $0xd0] sm:$0xff] }
   0x9   :  { %393 = vmatpush.bf16.msra.mxu3 %v686_v7  ;;  %v657_v24 = vld [vmem:[%s890_s1 + $0x8] sm:$0xff]  ;;  %v656_v28 = vld [vmem:[%s890_s1] sm:$0xff]  ;;  %v650_v33 = vld [vmem:[%s891_s0 + $0xc] sm:$0xf0] }
   0xa   :  { %337 = vmatpush.bf16.msra.mxu0 %v661_v8  ;;  %v665_v25 = vld [vmem:[%s890_s1 + $0x48] sm:$0xff]  ;;  %v664_v29 = vld [vmem:[%s890_s1 + $0x40] sm:$0xff]  ;;  %v492_v35 = vld [vmem:[%s891_s0 + $0x10] sm:$0xf0] }
   0xb   :  { %356 = vmatpush.bf16.msra.mxu1 %v669_v9  ;;  %v673_v26 = vld [vmem:[%s890_s1 + $0x88] sm:$0xff]  ;;  %v672_v30 = vld [vmem:[%s890_s1 + $0x80] sm:$0xff]  ;;  %v651_v37 = vld [vmem:[%s891_s0 + $0x14] sm:$0xf0] }
   0xc   :  { %375 = vmatpush.bf16.msra.mxu2 %v677_v10  ;;  %v681_v27 = vld [vmem:[%s890_s1 + $0xc8] sm:$0xff]  ;;  %v680_v31 = vld [vmem:[%s890_s1 + $0xc0] sm:$0xff]  ;;  %v500_v39 = vld [vmem:[%s891_s0 + $0x18] sm:$0xf0] }
   0xd   :  { %394 = vmatpush.bf16.msra.mxu3 %v685_v11  ;;  %v490_v32 = vld [vmem:[%s891_s0] sm:$0xf]  ;;  %v648_v34 = vld [vmem:[%s891_s0 + $0x4] sm:$0xf]  ;;  %v498_v36 = vld [vmem:[%s891_s0 + $0x8] sm:$0xf] }
   0xe   :  { %338 = vmatpush.bf16.msra.mxu0 %v660_v12  ;;  %v649_v38 = vld [vmem:[%s891_s0 + $0xc] sm:$0xf]  ;;  %v491_v40 = vor.u32 %v650_v33, %v490_v32  ;;  %v495_v41 = vor.u32 %v648_v34, %v492_v35  ;;  %v499_v42 = vor.u32 %v651_v37, %v498_v36  ;;  %v506_v44 = vld [vmem:[%s891_s0 + $0x20] sm:$0xf]  ;;  %v654_v45 = vld [vmem:[%s891_s0 + $0x2c] sm:$0xf0] }
   0xf   :  { %357 = vmatpush.bf16.msra.mxu1 %v668_v13  ;;  %v503_v43 = vor.u32 %v649_v38, %v500_v39  ;;  %v652_v46 = vld [vmem:[%s891_s0 + $0x24] sm:$0xf]  ;;  %v508_v47 = vld [vmem:[%s891_s0 + $0x30] sm:$0xf0]  ;;  %v514_v48 = vld [vmem:[%s891_s0 + $0x28] sm:$0xf]  ;;  %v507_v52 = vor.u32 %v654_v45, %v506_v44  ;;  %v472_v45 = vlaneseq }
  0x10   :  { %376 = vmatpush.bf16.msra.mxu2 %v676_v14  ;;  %v655_v49 = vld [vmem:[%s891_s0 + $0x34] sm:$0xf0]  ;;  %v653_v50 = vld [vmem:[%s891_s0 + $0x2c] sm:$0xf]  ;;  %v516_v51 = vld [vmem:[%s891_s0 + $0x38] sm:$0xf0]  ;;  %v511_v53 = vor.u32 %v652_v46, %v508_v47 }
  0x11   :  { %395 = vmatpush.bf16.msra.mxu3 %v684_v15  ;;  %v515_v54 = vor.u32 %v655_v49, %v514_v48  ;;  %v519_v55 = vor.u32 %v653_v50, %v516_v51  ;;  %v699_v1 = vld [vmem:[%s892_s2] ss:$0 sm:$0xff]  ;;  %v473_v50 = vshrl.u32 %v472_v45, 7 }
  0x12   :  { %339 = vmatpush.bf16.msra.mxu0 %v659_v16  ;;  %v700_v9 = vld [vmem:[%s893_s3] ss:$0 sm:$0xff] }
  0x13   :  { %358 = vmatpush.bf16.msra.mxu1 %v667_v17  ;;  %vm474_vm0 = vcmp.eq.s32.totalorder %v473_v50, 0  ;;  %vm476_vm1 = vcmp.eq.s32.totalorder %v473_v50, 1 }
  0x14   :  { %377 = vmatpush.bf16.msra.mxu2 %v675_v18 }
  0x15   :  { %396 = vmatpush.bf16.msra.mxu3 %v683_v19 }
  0x16   :  { %340 = vmatpush.bf16.msra.mxu0 %v658_v20 }
  0x17   :  { %359 = vmatpush.bf16.msra.mxu1 %v666_v21 }
  0x18   :  { %378 = vmatpush.bf16.msra.mxu2 %v674_v22 }
  0x19   :  { %397 = vmatpush.bf16.msra.mxu3 %v682_v23 }
  0x1a   :  { %341 = vmatpush.bf16.msra.mxu0 %v657_v24 }
  0x1b   :  { %360 = vmatpush.bf16.msra.mxu1 %v665_v25 }
  0x1c   :  { %379 = vmatpush.bf16.msra.mxu2 %v673_v26 }
  0x1d   :  { %398 = vmatpush.bf16.msra.mxu3 %v681_v27 }
  0x1e   :  { %342 = vmatpush.bf16.msra.mxu0 %v656_v28 }
  0x1f   :  { %361 = vmatpush.bf16.msra.mxu1 %v664_v29 }
  0x20   :  { %380 = vmatpush.bf16.msra.mxu2 %v672_v30 }
  0x21   :  { %399 = vmatpush.bf16.msra.mxu3 %v680_v31  ;;  %343 = vmatmul.bf16.vlgmr.msra.gmra.mxu0 %v491_v40 }
  0x22   :  { %362 = vmatmul.bf16.vlgmr.msra.gmra.mxu1 %v495_v41 }
  0x23   :  { %381 = vmatmul.bf16.vlgmr.msra.gmra.mxu2 %v499_v42 }
  0x24   :  { %400 = vmatmul.bf16.vlgmr.msra.gmra.mxu3 %v503_v43 }
  0x31   :  { %348 = vmatmul.bf16.gmra.mxu0 %v507_v52 }
  0x32   :  { %367 = vmatmul.bf16.gmra.mxu1 %v511_v53 }
  0x33   :  { %386 = vmatmul.bf16.gmra.mxu2 %v515_v54 }
  0x34   :  { %405 = vmatmul.bf16.gmra.mxu3 %v519_v55 }
  0x9e   :  { %v344_v56 = vpop.f32.mrf.mxu0 }
  0x9f   :  { %v363_v57 = vpop.f32.mrf.mxu1 }
  0xa0   :  { %v364_v58 = vadd.f32 %v363_v57, %v344_v56 }
  0xa6   :  { %v382_v59 = vpop.f32.mrf.mxu2  ;;  %v346_v61 = vpop.f32.mrf.mxu0 }
  0xa7   :  { %v401_v60 = vpop.f32.mrf.mxu3  ;;  %v365_v62 = vpop.f32.mrf.mxu1  ;;  %v383_v63 = vadd.f32 %v382_v59, %v364_v58 }
  0xa8   :  { %v366_v2 = vadd.f32 %v365_v62, %v346_v61 }
  0xa9   :  { %v402_v0 = vadd.f32 %v401_v60, %v383_v63 }
  0xab   :  { %v430_v8 = vmul.f32 %v699_v1, %v402_v0 }
  0xad   :  { %v438_v13 = vadd.f32 %v700_v9, %v430_v8 }
  0xae   :  { %v384_v3 = vpop.f32.mrf.mxu2  ;;  %v349_v6 = vpop.f32.mrf.mxu0 }
  0xaf   :  { %v403_v4 = vpop.f32.mrf.mxu3  ;;  %v385_v5 = vadd.f32 %v384_v3, %v366_v2  ;;  %v368_v7 = vpop.f32.mrf.mxu1  ;;  %v459_v30 = vmul.f32 %v438_v13, %v438_v13 }
  0xb0   :  { %v369_v12 = vadd.f32 %v368_v7, %v349_v6 }
  0xb1   :  { %v404_v10 = vadd.f32 %v403_v4, %v385_v5 }
  0xb3   :  { %v431_v11 = vmul.f32 %v699_v1, %v404_v10 }
  0xb5   :  { %v439_v14 = vadd.f32 %v700_v9, %v431_v11 }
  0xb6   :  { %v387_v15 = vpop.f32.mrf.mxu2  ;;  %v351_v20 = vpop.f32.mrf.mxu0 }
  0xb7   :  { %v406_v16 = vpop.f32.mrf.mxu3  ;;  %v691_v17 = vpack.c.bf16 %v439_v14, %v438_v13  ;;  %v388_v18 = vadd.f32 %v387_v15, %v369_v12  ;;  %v370_v21 = vpop.f32.mrf.mxu1  ;;  %v460_v28 = vmul.f32 %v439_v14, %v439_v14  ;;  %v450_v31 = vadd.f32 %v439_v14, %v438_v13 }
  0xb8   :  { %v371_v23 = vadd.f32 %v370_v21, %v351_v20 }
  0xb9   :  { %692 = vst [vmem:[%s894_s4] sm:$0xff] %v691_v17   ;;  %v407_v19 = vadd.f32 %v406_v16, %v388_v18  ;;  %v463_v34 = vadd.f32 %v460_v28, %v459_v30 }
  0xbb   :  { %v432_v22 = vmul.f32 %v699_v1, %v407_v19 }
  0xbd   :  { %v440_v25 = vadd.f32 %v700_v9, %v432_v22 }
  0xbe   :  { %v389_v24 = vpop.f32.mrf.mxu2 }
  0xbf   :  { %v390_v26 = vadd.f32 %v389_v24, %v371_v23  ;;  %v408_v27 = vpop.f32.mrf.mxu3  ;;  %v461_v32 = vmul.f32 %v440_v25, %v440_v25  ;;  %v451_v35 = vadd.f32 %v450_v31, %v440_v25 }
  0xc1   :  { %v409_v29 = vadd.f32 %v408_v27, %v390_v26  ;;  %v464_v37 = vadd.f32 %v463_v34, %v461_v32 }
  0xc3   :  { %v433_v33 = vmul.f32 %v699_v1, %v409_v29 }
  0xc5   :  { %v441_v36 = vadd.f32 %v700_v9, %v433_v33 }
  0xc7   :  { %v696_v38 = vpack.c.bf16 %v441_v36, %v440_v25  ;;  %v452_v39 = vadd.f32 %v451_v35, %v441_v36  ;;  %v462_v40 = vmul.f32 %v441_v36, %v441_v36 }
  0xc9   :  { %698 = vst [vmem:[%s894_s4 + $0x8] sm:$0xff] %v696_v38   ;;  %v453_v41 = vrot.slane %v452_v39, 4  ;;  %v465_v42 = vadd.f32 %v464_v37, %v462_v40 }
  0xcb   :  { %v454_v43 = vadd.f32 %v453_v41, %v452_v39  ;;  %v466_v44 = vrot.slane %v465_v42, 4 }
  0xcd   :  { %v455_v46 = vrot.slane %v454_v43, 2  ;;  %v467_v47 = vadd.f32 %v466_v44, %v465_v42 }
  0xcf   :  { %v456_v48 = vadd.f32 %v455_v46, %v454_v43  ;;  %v468_v49 = vrot.slane %v467_v47, 2 }
  0xd1   :  { %v457_v51 = vrot.slane %v456_v48, 1  ;;  %v469_v52 = vadd.f32 %v468_v49, %v467_v47 }
  0xd3   :  { %v458_v53 = vadd.f32 %v457_v51, %v456_v48  ;;  %v470_v54 = vrot.slane %v469_v52, 1 }
  0xd5   :  { %v471_v55 = vadd.f32 %v470_v54, %v469_v52  ;;  %v475_v56 = vsel %vm474_vm0, %v458_v53, 0.0 }
  0xd7   :  { %v477_v57 = vsel %vm476_vm1, %v471_v55, 0.0 }
  0xd8   :  { %v478_v58 = vadd.f32 %v477_v57, %v475_v56 }
  0xda   :  { %479 = vst [vmem:[%s895_s5] sm:$0xff] %v478_v58 }

</bundles_post_ra>
